<compile_context>
chip_gen: v7x
topology: tpu7x:2x2x1
jax: 0.10.0
libtpu: 0.0.40
codegen_flags: <defaults>
</compile_context>

<pallas_src>
import numpy as np
import jax
import jax.numpy as jnp
from jax.experimental import pallas as pl
from jax.experimental.pallas import tpu as pltpu


# MXU operand dtype for the five in-kernel matmuls.  bfloat16 is the production
# choice (review item); f32 keeps the demo's tight check vs. the f32 reference.
MXU_DTYPE = jnp.float32


# ----------------------------- small math helpers -----------------------------
def _erf(x):
    # Abramowitz & Stegun 7.1.26 rational approximation, |err| < 1.5e-7.
    a1, a2, a3, a4, a5 = 0.254829592, -0.284496736, 1.421413741, -1.453152027, 1.061405429
    p = 0.3275911
    s = jnp.where(x >= 0.0, 1.0, -1.0)
    z = jnp.abs(x)
    t = 1.0 / (1.0 + p * z)
    poly = ((((a5 * t + a4) * t + a3) * t + a2) * t + a1) * t
    return s * (1.0 - poly * jnp.exp(-z * z))


def _gelu_exact(x):
    return 0.5 * x * (1.0 + _erf(x * 0.7071067811865476))


# ----------------------------- parameter packing ------------------------------
PACKED_ORDER = ("wc1big", "bc1rep", "caw1", "cab1", "caw2", "cab2",
                "w55band", "whband", "twv", "dwb", "wc2big", "bc2rep")


def _pack_params(p, H, W, C):
    """Repack PyTorch-style parameters into lane-dense (W*C on lanes) form."""
    f32 = jnp.float32
    WC = W * C

    def rep_w(v):                                     # (1, D) -> (1, W*D)
        return jnp.tile(jnp.reshape(v, (1, -1)).astype(f32), (1, W))

    def block_diag(w):                                # (Cin, Co) -> (W*Cin, W*Co)
        Cin, Co = w.shape
        return jnp.einsum("uv,cd->ucvd", jnp.eye(W, dtype=f32),
                          w.astype(f32)).reshape(W * Cin, W * Co)

    def h_band(wk_c, pad):
        # (K, C) horizontal depthwise taps -> (WC, WC) banded block matrix so that
        # (rows, WC) @ band == the 1xK depthwise conv over w (zero-padded columns).
        K = wk_c.shape[0]
        A = jnp.zeros((W, C, W, C), f32)
        for j in range(K):
            o = j - pad
            E = jnp.eye(W, k=-o, dtype=f32)            # E[w+o, w] = 1 (in-range only)
            A = A + jnp.einsum("uv,cd->ucvd", E, jnp.diag(wk_c[j].astype(f32)))
        return A.reshape(WC, WC)

    def v_taps(w):                                     # (K, 1, C) -> (K, WC)
        K = w.shape[0]
        return jnp.stack([jnp.tile(w[i, 0, :].astype(f32), (W,)) for i in range(K)], 0)

    w55 = p["w55"].astype(f32)                         # (5, 5, C)
    return dict(
        wc1big=block_diag(p["wc1"]),                            # (WC, WC)
        bc1rep=rep_w(p["bc1"]),                                 # (1, WC)
        caw1=jnp.tile(p["wf1"].T.astype(f32), (1, W)),          # (Cr, WC): [j, wC+c]=wf1[c,j]
        cab1=jnp.tile(jnp.reshape(p["bf1"], (-1, 1)).astype(f32), (1, WC)),   # (Cr, WC)
        caw2=jnp.tile(p["wf2"].astype(f32), (1, W)),            # (Cr, WC): [j, wC+c]=wf2[j,c]
        cab2=rep_w(p["bf2"]),                                   # (1, WC)
        # per-row 1x5 bands of the 5x5 depthwise, packed to N = 5*WC
        w55band=jnp.concatenate([h_band(w55[i], 2) for i in range(5)], axis=1),
        # 1x7 / 1x11 / 1x21 horizontal depthwise bands, packed to N = 3*WC
        whband=jnp.concatenate([h_band(p["w17"][0], 3),
                                h_band(p["w111"][0], 5),
                                h_band(p["w121"][0], 10)], axis=1),
        twv=jnp.concatenate([v_taps(p["w71"]),
                             v_taps(p["w11_1"]),
                             v_taps(p["w21_1"])], axis=0),      # (39, WC)
        dwb=jnp.concatenate([rep_w(p[k]) for k in
                             ("b55", "b17", "b71", "b111", "b11_1", "b121", "b21_1")], 0),
        wc2big=block_diag(p["wc2"]),                            # (WC, W*Cout)
        bc2rep=rep_w(p["bc2"]),                                 # (1, W*Cout)
    )


# ------------------------------- fused forward ---------------------------------
def cpca_forward(x_nhwc, params, *, block_b=None):
    B, H, W, C = x_nhwc.shape
    Cout = params["wc2"].shape[1]
    Cr = params["wf1"].shape[1]
    WC, WCo = W * C, W * Cout
    if (C & (C - 1)) or (W & (W - 1)):
        raise ValueError("roll-tree reductions require power-of-two W and C")

    if block_b is None:
        # Fold the whole batch into one block (max MXU M).  On v7x pass
        # block_b = B // 2 so the "parallel" grid axis keeps both TCs busy.
        block_b = B
    if B % block_b:
        raise ValueError("B must be divisible by block_b")
    BT = block_b
    M = BT * H                                         # MXU M dimension per grid step

    packed = _pack_params(params, H, W, C)
    plist = [packed[k] for k in PACKED_ORDER]
    x2d = jnp.reshape(x_nhwc.astype(jnp.float32), (B * H, WC))

    # (hres lane-chunk, horizontal-bias row, vertical: twv row0, K, pad, bias row)
    branches = ((0, 1, 0, 7, 3, 2),
                (1, 3, 7, 11, 5, 4),
                (2, 5, 18, 21, 10, 6))

    def kernel(x_ref, wc1_ref, bc1_ref, caw1_ref, cab1_ref, caw2_ref, cab2_ref,
               w55b_ref, whb_ref, twv_ref, dwb_ref, wc2_ref, bc2_ref, o_ref):

        def mdot(a, w_ref):                            # MXU matmul, f32 accumulation
            return jnp.dot(a.astype(MXU_DTYPE), w_ref[...].astype(MXU_DTYPE),
                           preferred_element_type=jnp.float32)

        x = x_ref[...]                                 # (M, WC) f32, M = block_b*H rows

        # ---- conv1 (1x1): block-diagonal MXU matmul over all M rows + exact GELU
        t = mdot(x, wc1_ref) + bc1_ref[...]
        t = _gelu_exact(t)

        # ---- channel attention (VPU + XLU only) ---------------------------------
        def lane_tree(v, op, start, stop):
            r, s = v, start
            while s < stop:
                r = op(r, pltpu.roll(r, s, axis=1))
                s *= 2
            return r

        srows, mrows = [], []
        for b in range(BT):                            # aligned (H, WC) per-image slices
            tb = t[b * H:(b + 1) * H, :]
            srows.append(jnp.sum(tb, axis=0, keepdims=True))
            mrows.append(jnp.max(tb, axis=0, keepdims=True))
        ssum = srows[0] if BT == 1 else jnp.concatenate(srows, axis=0)     # (BT, WC)
        smax = mrows[0] if BT == 1 else jnp.concatenate(mrows, axis=0)
        # per-channel pooled stats replicated across W on the lanes (C-periodic);
        # NOTE: the roll-tree relies on the operands being exactly C-periodic
        # across the W*C lanes (holds whenever the full W*C row is the lane dim).
        avg_rep = lane_tree(ssum, jnp.add, C, WC) * (1.0 / (H * W))
        max_rep = lane_tree(smax, jnp.maximum, C, WC)

        def ca_mlp(v_rep):                             # (BT, WC) -> (BT, WC)
            acc = cab2_ref[...]
            for j in range(Cr):
                hj = lane_tree(v_rep * caw1_ref[j:j + 1, :], jnp.add, 1, C)
                hj = jnp.maximum(hj + cab1_ref[j:j + 1, :], 0.0)
                acc = acc + hj * caw2_ref[j:j + 1, :]
            return 1.0 / (1.0 + jnp.exp(-acc))         # exact sigmoid

        gate = ca_mlp(avg_rep) + ca_mlp(max_rep)       # (BT, WC), C-periodic per row
        if BT == 1:
            feat = t * gate
        else:
            feat = jnp.concatenate(
                [t[b * H:(b + 1) * H, :] * gate[b:b + 1, :] for b in range(BT)], axis=0)

        # ---- depthwise convs -----------------------------------------------------
        # Precomputed 0/1 row masks (one per vertical offset): zero padding at the
        # top/bottom of each image and no cross-image reads in the stacked block.
        row1 = jax.lax.broadcasted_iota(jnp.int32, (H, WC), 0)
        row_local = row1 if BT == 1 else jnp.concatenate([row1] * BT, axis=0)   # (M, WC)
        masks = {}

        def row_mask(o):
            if o not in masks:
                masks[o] = jnp.logical_and(row_local + o >= 0,
                                           row_local + o < H).astype(jnp.float32)
            return masks[o]

        def vshift(src, o):                            # out[r] = src[r+o] (zero padded)
            if o == 0:
                return src
            return pltpu.roll(src, (-o) % M, axis=0) * row_mask(o)

        # 5x5 depthwise: the five per-row 1x5 horizontal convs run as ONE banded
        # MXU matmul (N = 5*WC); vertical composition = 5 masked sublane rolls.
        g = mdot(feat, w55b_ref)                       # (M, 5*WC)
        x_init = dwb_ref[0:1, :]
        for i in range(5):
            x_init = x_init + vshift(g[:, i * WC:(i + 1) * WC], i - 2)

        # 1x7 / 1x11 / 1x21 horizontal depthwise convs: one banded matmul, N = 3*WC.
        hres = mdot(x_init, whb_ref)                   # (M, 3*WC)

        def dw_v(src, row0, K, pad, brow):             # K x 1 vertical depthwise
            acc = dwb_ref[brow:brow + 1, :]
            for i in range(K):
                acc = acc + vshift(src, i - pad) * twv_ref[row0 + i:row0 + i + 1, :]
            return acc

        xsum = x_init
        for chunk, hb, vr0, vk, vp, vb in branches:
            h = hres[:, chunk * WC:(chunk + 1) * WC] + dwb_ref[hb:hb + 1, :]
            xsum = xsum + dw_v(h, vr0, vk, vp, vb)

        # ---- spatial attention (conv1 reused), gate, conv2 (MXU) -----------------
        satt = mdot(xsum, wc1_ref) + bc1_ref[...]
        out = mdot(satt * feat, wc2_ref) + bc2_ref[...]
        o_ref[...] = out.astype(o_ref.dtype)

    def _const_spec(arr):
        nd = arr.ndim
        return pl.BlockSpec(tuple(arr.shape), lambda i, _n=nd: (0,) * _n)

    in_specs = [pl.BlockSpec((M, WC), lambda i: (i, 0))]
    in_specs += [_const_spec(a) for a in plist]
    out_spec = pl.BlockSpec((M, WCo), lambda i: (i, 0))

    fn = pl.pallas_call(
        kernel,
        out_shape=jax.ShapeDtypeStruct((B * H, WCo), jnp.float32),
        grid_spec=pltpu.PrefetchScalarGridSpec(
            num_scalar_prefetch=0,
            grid=(B // BT,),
            in_specs=in_specs,
            out_specs=out_spec,
        ),
        compiler_params=pltpu.CompilerParams(
            dimension_semantics=("parallel",),         # batch blocks are independent
            vmem_limit_bytes=32 * 1024 * 1024,
        ),
    )
    out2d = fn(x2d, *plist)
    return jnp.reshape(out2d, (B, H, W, Cout))


# --------------------- pure-JAX reference (for checking) ---------------------
def ref_forward(x_nhwc, p):
    B, H, W, C = x_nhwc.shape

    def conv1x1(v, w, b):
        return jnp.einsum("bhwc,cd->bhwd", v, w) + b.reshape(1, 1, 1, -1)

    t = conv1x1(x_nhwc, p["wc1"], p["bc1"])
    t = jax.nn.gelu(t, approximate=False)

    avg = jnp.mean(t, axis=(1, 2), keepdims=True)
    mx = jnp.max(t, axis=(1, 2), keepdims=True)

    def mlp(v):
        h = jax.nn.relu(jnp.einsum("bhwc,cd->bhwd", v, p["wf1"]) + p["bf1"].reshape(1, 1, 1, -1))
        h = jnp.einsum("bhwc,cd->bhwd", h, p["wf2"]) + p["bf2"].reshape(1, 1, 1, -1)
        return jax.nn.sigmoid(h)

    feat = t * (mlp(avg) + mlp(mx))

    def dw(v, w, ph, pw, b):
        kh, kw, _ = w.shape
        vp = jnp.pad(v, ((0, 0), (ph, ph), (pw, pw), (0, 0)))
        acc = jnp.zeros_like(v) + b.reshape(1, 1, 1, -1)
        for i in range(kh):
            for j in range(kw):
                acc = acc + vp[:, i:i + H, j:j + W, :] * w[i, j].reshape(1, 1, 1, -1)
        return acc

    x_init = dw(feat, p["w55"], 2, 2, p["b55"])
    x1 = dw(dw(x_init, p["w17"], 0, 3, p["b17"]), p["w71"], 3, 0, p["b71"])
    x2 = dw(dw(x_init, p["w111"], 0, 5, p["b111"]), p["w11_1"], 5, 0, p["b11_1"])
    x3 = dw(dw(x_init, p["w121"], 0, 10, p["b121"]), p["w21_1"], 10, 0, p["b21_1"])
    xs = x1 + x2 + x3 + x_init

    satt = conv1x1(xs, p["wc1"], p["bc1"])
    return conv1x1(satt * feat, p["wc2"], p["bc2"])


if __name__ == "__main__":
    key = jax.random.PRNGKey(0)
    B, C, H, W = 2, 8, 16, 16          # channels = 8 (each input carries C//2 = 4)
    Cout = 8
    Cr = C // 4                        # channelAttention_reduce = 4

    ks = jax.random.split(key, 24)

    def nrm(kk, shape, s=0.1):
        return jax.random.normal(kk, shape, jnp.float32) * s

    params = {
        "wc1":   nrm(ks[0], (C, C)),        "bc1":   nrm(ks[1], (1, C), 0.05),
        "wf1":   nrm(ks[2], (C, Cr)),       "bf1":   nrm(ks[3], (1, Cr), 0.05),
        "wf2":   nrm(ks[4], (Cr, C)),       "bf2":   nrm(ks[5], (1, C), 0.05),
        "w55":   nrm(ks[6], (5, 5, C)),     "b55":   nrm(ks[7], (1, C), 0.05),
        "w17":   nrm(ks[8], (1, 7, C)),     "b17":   nrm(ks[9], (1, C), 0.05),
        "w71":   nrm(ks[10], (7, 1, C)),    "b71":   nrm(ks[11], (1, C), 0.05),
        "w111":  nrm(ks[12], (1, 11, C)),   "b111":  nrm(ks[13], (1, C), 0.05),
        "w11_1": nrm(ks[14], (11, 1, C)),   "b11_1": nrm(ks[15], (1, C), 0.05),
        "w121":  nrm(ks[16], (1, 21, C)),   "b121":  nrm(ks[17], (1, C), 0.05),
        "w21_1": nrm(ks[18], (21, 1, C)),   "b21_1": nrm(ks[19], (1, C), 0.05),
        "wc2":   nrm(ks[20], (C, Cout)),    "bc2":   nrm(ks[21], (1, Cout), 0.05),
    }

    # PyTorch forward takes x = (x[0], x[1]), each NCHW (B, C//2, H, W), cat'd on dim=1.
    x0_nchw = jax.random.normal(ks[22], (B, C // 2, H, W), jnp.float32)
    x1_nchw = jax.random.normal(ks[23], (B, C // 2, H, W), jnp.float32)
    x_cat_nchw = jnp.concatenate([x0_nchw, x1_nchw], axis=1)      # (B, C, H, W)
    x_nhwc = jnp.transpose(x_cat_nchw, (0, 2, 3, 1))              # kernel layout: NHWC

    out = cpca_forward(x_nhwc, params)                            # batch folded, grid=(1,)
    out = jax.block_until_ready(out)

    ref = ref_forward(x_nhwc, params)
    np.testing.assert_allclose(np.asarray(out), np.asarray(ref), rtol=1e-3, atol=2e-4)

    print("KERNEL_OK")
</pallas_src>

<mosaic_0001>
module attributes {stable_mosaic.version = 11 : i64} {
  func.func @kernel(%arg0: i32, %arg1: memref<32x128xf32, #tpu.memory_space<vmem>>, %arg2: memref<128x128xf32, #tpu.memory_space<vmem>>, %arg3: memref<1x128xf32, #tpu.memory_space<vmem>>, %arg4: memref<2x128xf32, #tpu.memory_space<vmem>>, %arg5: memref<2x128xf32, #tpu.memory_space<vmem>>, %arg6: memref<2x128xf32, #tpu.memory_space<vmem>>, %arg7: memref<1x128xf32, #tpu.memory_space<vmem>>, %arg8: memref<128x640xf32, #tpu.memory_space<vmem>>, %arg9: memref<128x384xf32, #tpu.memory_space<vmem>>, %arg10: memref<39x128xf32, #tpu.memory_space<vmem>>, %arg11: memref<7x128xf32, #tpu.memory_space<vmem>>, %arg12: memref<128x128xf32, #tpu.memory_space<vmem>>, %arg13: memref<1x128xf32, #tpu.memory_space<vmem>>, %arg14: memref<32x128xf32, #tpu.memory_space<vmem>>) attributes {dimension_semantics = [#tpu.dimension_semantics<parallel>], iteration_bounds = array<i64: 1>, scalar_prefetch = 0 : i64, scratch_operands = 0 : i64, tpu.core_type = #tpu.core_type<tc>, window_params = [{transform_indices = @transform_0, window_bounds = array<i64: 32, 128>}, {pipeline_mode = #tpu.pipeline_mode<synchronous>, transform_indices = @transform_1, window_bounds = array<i64: 128, 128>}, {pipeline_mode = #tpu.pipeline_mode<synchronous>, transform_indices = @transform_2, window_bounds = array<i64: 1, 128>}, {pipeline_mode = #tpu.pipeline_mode<synchronous>, transform_indices = @transform_3, window_bounds = array<i64: 2, 128>}, {pipeline_mode = #tpu.pipeline_mode<synchronous>, transform_indices = @transform_4, window_bounds = array<i64: 2, 128>}, {pipeline_mode = #tpu.pipeline_mode<synchronous>, transform_indices = @transform_5, window_bounds = array<i64: 2, 128>}, {pipeline_mode = #tpu.pipeline_mode<synchronous>, transform_indices = @transform_6, window_bounds = array<i64: 1, 128>}, {pipeline_mode = #tpu.pipeline_mode<synchronous>, transform_indices = @transform_7, window_bounds = array<i64: 128, 640>}, {pipeline_mode = #tpu.pipeline_mode<synchronous>, transform_indices = @transform_8, window_bounds = array<i64: 128, 384>}, {pipeline_mode = #tpu.pipeline_mode<synchronous>, transform_indices = @transform_9, window_bounds = array<i64: 39, 128>}, {pipeline_mode = #tpu.pipeline_mode<synchronous>, transform_indices = @transform_10, window_bounds = array<i64: 7, 128>}, {pipeline_mode = #tpu.pipeline_mode<synchronous>, transform_indices = @transform_11, window_bounds = array<i64: 128, 128>}, {pipeline_mode = #tpu.pipeline_mode<synchronous>, transform_indices = @transform_12, window_bounds = array<i64: 1, 128>}, {transform_indices = @transform_13, window_bounds = array<i64: 32, 128>}]} {
    %c0 = arith.constant 0 : index
    %c0_0 = arith.constant 0 : index
    %0 = vector.load %arg1[%c0, %c0_0] : memref<32x128xf32, #tpu.memory_space<vmem>>, vector<32x128xf32>
    %c0_1 = arith.constant 0 : index
    %c0_2 = arith.constant 0 : index
    %1 = vector.load %arg2[%c0_1, %c0_2] : memref<128x128xf32, #tpu.memory_space<vmem>>, vector<128x128xf32>
    %cst = arith.constant dense<0.000000e+00> : vector<32x128xf32>
    %2 = tpu.matmul %0, %1, %cst {dimension_numbers = #tpu.dot_dimension_numbers<[1], [0], [0], [1], [0, 0, 1, 1], [], []>} : vector<32x128xf32>, vector<128x128xf32>, vector<32x128xf32> -> vector<32x128xf32>
    %c0_3 = arith.constant 0 : index
    %c0_4 = arith.constant 0 : index
    %3 = vector.load %arg3[%c0_3, %c0_4] : memref<1x128xf32, #tpu.memory_space<vmem>>, vector<1x128xf32>
    %4 = vector.broadcast %3 : vector<1x128xf32> to vector<32x128xf32>
    %5 = arith.addf %2, %4 : vector<32x128xf32>
    %cst_5 = arith.constant 5.000000e-01 : f32
    %6 = vector.broadcast %cst_5 : f32 to vector<32x128xf32>
    %7 = arith.mulf %6, %5 : vector<32x128xf32>
    %cst_6 = arith.constant 0.707106769 : f32
    %8 = vector.broadcast %cst_6 : f32 to vector<32x128xf32>
    %9 = arith.mulf %5, %8 : vector<32x128xf32>
    %cst_7 = arith.constant 0.000000e+00 : f32
    %10 = vector.broadcast %cst_7 : f32 to vector<32x128xf32>
    %11 = arith.cmpf oge, %9, %10 : vector<32x128xf32>
    %cst_8 = arith.constant 1.000000e+00 : f32
    %cst_9 = arith.constant -1.000000e+00 : f32
    %12 = vector.broadcast %cst_8 : f32 to vector<32x128xf32>
    %13 = vector.broadcast %cst_9 : f32 to vector<32x128xf32>
    %14 = arith.select %11, %12, %13 : vector<32x128xi1>, vector<32x128xf32>
    %15 = math.absf %9 : vector<32x128xf32>
    %cst_10 = arith.constant 0.327591091 : f32
    %16 = vector.broadcast %cst_10 : f32 to vector<32x128xf32>
    %17 = arith.mulf %16, %15 : vector<32x128xf32>
    %cst_11 = arith.constant 1.000000e+00 : f32
    %18 = vector.broadcast %cst_11 : f32 to vector<32x128xf32>
    %19 = arith.addf %18, %17 : vector<32x128xf32>
    %cst_12 = arith.constant 1.000000e+00 : f32
    %20 = vector.broadcast %cst_12 : f32 to vector<32x128xf32>
    %21 = arith.divf %20, %19 : vector<32x128xf32>
    %cst_13 = arith.constant 1.06140542 : f32
    %22 = vector.broadcast %cst_13 : f32 to vector<32x128xf32>
    %23 = arith.mulf %22, %21 : vector<32x128xf32>
    %cst_14 = arith.constant -1.45315206 : f32
    %24 = vector.broadcast %cst_14 : f32 to vector<32x128xf32>
    %25 = arith.addf %23, %24 : vector<32x128xf32>
    %26 = arith.mulf %25, %21 : vector<32x128xf32>
    %cst_15 = arith.constant 1.42141378 : f32
    %27 = vector.broadcast %cst_15 : f32 to vector<32x128xf32>
    %28 = arith.addf %26, %27 : vector<32x128xf32>
    %29 = arith.mulf %28, %21 : vector<32x128xf32>
    %cst_16 = arith.constant -0.284496725 : f32
    %30 = vector.broadcast %cst_16 : f32 to vector<32x128xf32>
    %31 = arith.addf %29, %30 : vector<32x128xf32>
    %32 = arith.mulf %31, %21 : vector<32x128xf32>
    %cst_17 = arith.constant 0.254829586 : f32
    %33 = vector.broadcast %cst_17 : f32 to vector<32x128xf32>
    %34 = arith.addf %32, %33 : vector<32x128xf32>
    %35 = arith.mulf %34, %21 : vector<32x128xf32>
    %cst_18 = arith.constant 0.000000e+00 : f32
    %36 = vector.broadcast %cst_18 : f32 to vector<32x128xf32>
    %37 = arith.subf %36, %15 : vector<32x128xf32>
    %38 = arith.mulf %37, %15 : vector<32x128xf32>
    %39 = math.exp %38 : vector<32x128xf32>
    %40 = arith.mulf %35, %39 : vector<32x128xf32>
    %cst_19 = arith.constant 1.000000e+00 : f32
    %41 = vector.broadcast %cst_19 : f32 to vector<32x128xf32>
    %42 = arith.subf %41, %40 : vector<32x128xf32>
    %43 = arith.mulf %14, %42 : vector<32x128xf32>
    %cst_20 = arith.constant 1.000000e+00 : f32
    %44 = vector.broadcast %cst_20 : f32 to vector<32x128xf32>
    %45 = arith.addf %44, %43 : vector<32x128xf32>
    %46 = arith.mulf %7, %45 : vector<32x128xf32>
    %47 = vector.extract_strided_slice %46 {offsets = [0, 0], sizes = [16, 128], strides = [1, 1]} : vector<32x128xf32> to vector<16x128xf32>
    %cst_21 = arith.constant dense<0.000000e+00> : vector<128xf32>
    %48 = vector.multi_reduction <add>, %47, %cst_21 [0] : vector<16x128xf32> to vector<128xf32>
    %49 = vector.shape_cast %48 : vector<128xf32> to vector<1x128xf32>
    %cst_22 = arith.constant dense<0xFF800000> : vector<128xf32>
    %50 = vector.multi_reduction <maximumf>, %47, %cst_22 [0] : vector<16x128xf32> to vector<128xf32>
    %51 = vector.shape_cast %50 : vector<128xf32> to vector<1x128xf32>
    %52 = vector.extract_strided_slice %46 {offsets = [16, 0], sizes = [16, 128], strides = [1, 1]} : vector<32x128xf32> to vector<16x128xf32>
    %cst_23 = arith.constant dense<0.000000e+00> : vector<128xf32>
    %53 = vector.multi_reduction <add>, %52, %cst_23 [0] : vector<16x128xf32> to vector<128xf32>
    %54 = vector.shape_cast %53 : vector<128xf32> to vector<1x128xf32>
    %cst_24 = arith.constant dense<0xFF800000> : vector<128xf32>
    %55 = vector.multi_reduction <maximumf>, %52, %cst_24 [0] : vector<16x128xf32> to vector<128xf32>
    %56 = vector.shape_cast %55 : vector<128xf32> to vector<1x128xf32>
    %57 = tpu.concatenate %49, %54 in 0 : vector<1x128xf32>, vector<1x128xf32> -> vector<2x128xf32>
    %58 = tpu.concatenate %51, %56 in 0 : vector<1x128xf32>, vector<1x128xf32> -> vector<2x128xf32>
    %c8_i32 = arith.constant 8 : i32
    %59 = tpu.dynamic_rotate %57 by %c8_i32 dim 1 : vector<2x128xf32>, i32 -> vector<2x128xf32>
    %60 = arith.addf %57, %59 : vector<2x128xf32>
    %c16_i32 = arith.constant 16 : i32
    %61 = tpu.dynamic_rotate %60 by %c16_i32 dim 1 : vector<2x128xf32>, i32 -> vector<2x128xf32>
    %62 = arith.addf %60, %61 : vector<2x128xf32>
    %c32_i32 = arith.constant 32 : i32
    %63 = tpu.dynamic_rotate %62 by %c32_i32 dim 1 : vector<2x128xf32>, i32 -> vector<2x128xf32>
    %64 = arith.addf %62, %63 : vector<2x128xf32>
    %c64_i32 = arith.constant 64 : i32
    %65 = tpu.dynamic_rotate %64 by %c64_i32 dim 1 : vector<2x128xf32>, i32 -> vector<2x128xf32>
    %66 = arith.addf %64, %65 : vector<2x128xf32>
    %cst_25 = arith.constant 3.906250e-03 : f32
    %67 = vector.broadcast %cst_25 : f32 to vector<2x128xf32>
    %68 = arith.mulf %66, %67 : vector<2x128xf32>
    %c8_i32_26 = arith.constant 8 : i32
    %69 = tpu.dynamic_rotate %58 by %c8_i32_26 dim 1 : vector<2x128xf32>, i32 -> vector<2x128xf32>
    %70 = arith.maximumf %58, %69 : vector<2x128xf32>
    %c16_i32_27 = arith.constant 16 : i32
    %71 = tpu.dynamic_rotate %70 by %c16_i32_27 dim 1 : vector<2x128xf32>, i32 -> vector<2x128xf32>
    %72 = arith.maximumf %70, %71 : vector<2x128xf32>
    %c32_i32_28 = arith.constant 32 : i32
    %73 = tpu.dynamic_rotate %72 by %c32_i32_28 dim 1 : vector<2x128xf32>, i32 -> vector<2x128xf32>
    %74 = arith.maximumf %72, %73 : vector<2x128xf32>
    %c64_i32_29 = arith.constant 64 : i32
    %75 = tpu.dynamic_rotate %74 by %c64_i32_29 dim 1 : vector<2x128xf32>, i32 -> vector<2x128xf32>
    %76 = arith.maximumf %74, %75 : vector<2x128xf32>
    %c0_30 = arith.constant 0 : index
    %c0_31 = arith.constant 0 : index
    %77 = vector.load %arg7[%c0_30, %c0_31] : memref<1x128xf32, #tpu.memory_space<vmem>>, vector<1x128xf32>
    %c0_32 = arith.constant 0 : index
    %c0_33 = arith.constant 0 : index
    %78 = vector.load %arg4[%c0_32, %c0_33] : memref<2x128xf32, #tpu.memory_space<vmem>>, vector<1x128xf32>
    %79 = vector.broadcast %78 : vector<1x128xf32> to vector<2x128xf32>
    %80 = arith.mulf %68, %79 : vector<2x128xf32>
    %c1_i32 = arith.constant 1 : i32
    %81 = tpu.dynamic_rotate %80 by %c1_i32 dim 1 : vector<2x128xf32>, i32 -> vector<2x128xf32>
    %82 = arith.addf %80, %81 : vector<2x128xf32>
    %c2_i32 = arith.constant 2 : i32
    %83 = tpu.dynamic_rotate %82 by %c2_i32 dim 1 : vector<2x128xf32>, i32 -> vector<2x128xf32>
    %84 = arith.addf %82, %83 : vector<2x128xf32>
    %c4_i32 = arith.constant 4 : i32
    %85 = tpu.dynamic_rotate %84 by %c4_i32 dim 1 : vector<2x128xf32>, i32 -> vector<2x128xf32>
    %86 = arith.addf %84, %85 : vector<2x128xf32>
    %c0_34 = arith.constant 0 : index
    %c0_35 = arith.constant 0 : index
    %87 = vector.load %arg5[%c0_34, %c0_35] : memref<2x128xf32, #tpu.memory_space<vmem>>, vector<1x128xf32>
    %88 = vector.broadcast %87 : vector<1x128xf32> to vector<2x128xf32>
    %89 = arith.addf %86, %88 : vector<2x128xf32>
    %cst_36 = arith.constant 0.000000e+00 : f32
    %90 = vector.broadcast %cst_36 : f32 to vector<2x128xf32>
    %91 = arith.maximumf %89, %90 : vector<2x128xf32>
    %c0_37 = arith.constant 0 : index
    %c0_38 = arith.constant 0 : index
    %92 = vector.load %arg6[%c0_37, %c0_38] : memref<2x128xf32, #tpu.memory_space<vmem>>, vector<1x128xf32>
    %93 = vector.broadcast %92 : vector<1x128xf32> to vector<2x128xf32>
    %94 = arith.mulf %91, %93 : vector<2x128xf32>
    %95 = vector.broadcast %77 : vector<1x128xf32> to vector<2x128xf32>
    %96 = arith.addf %95, %94 : vector<2x128xf32>
    %c1 = arith.constant 1 : index
    %c0_39 = arith.constant 0 : index
    %97 = vector.load %arg4[%c1, %c0_39] : memref<2x128xf32, #tpu.memory_space<vmem>>, vector<1x128xf32>
    %98 = vector.broadcast %97 : vector<1x128xf32> to vector<2x128xf32>
    %99 = arith.mulf %68, %98 : vector<2x128xf32>
    %c1_i32_40 = arith.constant 1 : i32
    %100 = tpu.dynamic_rotate %99 by %c1_i32_40 dim 1 : vector<2x128xf32>, i32 -> vector<2x128xf32>
    %101 = arith.addf %99, %100 : vector<2x128xf32>
    %c2_i32_41 = arith.constant 2 : i32
    %102 = tpu.dynamic_rotate %101 by %c2_i32_41 dim 1 : vector<2x128xf32>, i32 -> vector<2x128xf32>
    %103 = arith.addf %101, %102 : vector<2x128xf32>
    %c4_i32_42 = arith.constant 4 : i32
    %104 = tpu.dynamic_rotate %103 by %c4_i32_42 dim 1 : vector<2x128xf32>, i32 -> vector<2x128xf32>
    %105 = arith.addf %103, %104 : vector<2x128xf32>
    %c1_43 = arith.constant 1 : index
    %c0_44 = arith.constant 0 : index
    %106 = vector.load %arg5[%c1_43, %c0_44] : memref<2x128xf32, #tpu.memory_space<vmem>>, vector<1x128xf32>
    %107 = vector.broadcast %106 : vector<1x128xf32> to vector<2x128xf32>
    %108 = arith.addf %105, %107 : vector<2x128xf32>
    %cst_45 = arith.constant 0.000000e+00 : f32
    %109 = vector.broadcast %cst_45 : f32 to vector<2x128xf32>
    %110 = arith.maximumf %108, %109 : vector<2x128xf32>
    %c1_46 = arith.constant 1 : index
    %c0_47 = arith.constant 0 : index
    %111 = vector.load %arg6[%c1_46, %c0_47] : memref<2x128xf32, #tpu.memory_space<vmem>>, vector<1x128xf32>
    %112 = vector.broadcast %111 : vector<1x128xf32> to vector<2x128xf32>
    %113 = arith.mulf %110, %112 : vector<2x128xf32>
    %114 = arith.addf %96, %113 : vector<2x128xf32>
    %cst_48 = arith.constant 0.000000e+00 : f32
    %115 = vector.broadcast %cst_48 : f32 to vector<2x128xf32>
    %116 = arith.subf %115, %114 : vector<2x128xf32>
    %117 = math.exp %116 : vector<2x128xf32>
    %cst_49 = arith.constant 1.000000e+00 : f32
    %118 = vector.broadcast %cst_49 : f32 to vector<2x128xf32>
    %119 = arith.addf %118, %117 : vector<2x128xf32>
    %cst_50 = arith.constant 1.000000e+00 : f32
    %120 = vector.broadcast %cst_50 : f32 to vector<2x128xf32>
    %121 = arith.divf %120, %119 : vector<2x128xf32>
    %c0_51 = arith.constant 0 : index
    %c0_52 = arith.constant 0 : index
    %122 = vector.load %arg7[%c0_51, %c0_52] : memref<1x128xf32, #tpu.memory_space<vmem>>, vector<1x128xf32>
    %c0_53 = arith.constant 0 : index
    %c0_54 = arith.constant 0 : index
    %123 = vector.load %arg4[%c0_53, %c0_54] : memref<2x128xf32, #tpu.memory_space<vmem>>, vector<1x128xf32>
    %124 = vector.broadcast %123 : vector<1x128xf32> to vector<2x128xf32>
    %125 = arith.mulf %76, %124 : vector<2x128xf32>
    %c1_i32_55 = arith.constant 1 : i32
    %126 = tpu.dynamic_rotate %125 by %c1_i32_55 dim 1 : vector<2x128xf32>, i32 -> vector<2x128xf32>
    %127 = arith.addf %125, %126 : vector<2x128xf32>
    %c2_i32_56 = arith.constant 2 : i32
    %128 = tpu.dynamic_rotate %127 by %c2_i32_56 dim 1 : vector<2x128xf32>, i32 -> vector<2x128xf32>
    %129 = arith.addf %127, %128 : vector<2x128xf32>
    %c4_i32_57 = arith.constant 4 : i32
    %130 = tpu.dynamic_rotate %129 by %c4_i32_57 dim 1 : vector<2x128xf32>, i32 -> vector<2x128xf32>
    %131 = arith.addf %129, %130 : vector<2x128xf32>
    %c0_58 = arith.constant 0 : index
    %c0_59 = arith.constant 0 : index
    %132 = vector.load %arg5[%c0_58, %c0_59] : memref<2x128xf32, #tpu.memory_space<vmem>>, vector<1x128xf32>
    %133 = vector.broadcast %132 : vector<1x128xf32> to vector<2x128xf32>
    %134 = arith.addf %131, %133 : vector<2x128xf32>
    %cst_60 = arith.constant 0.000000e+00 : f32
    %135 = vector.broadcast %cst_60 : f32 to vector<2x128xf32>
    %136 = arith.maximumf %134, %135 : vector<2x128xf32>
    %c0_61 = arith.constant 0 : index
    %c0_62 = arith.constant 0 : index
    %137 = vector.load %arg6[%c0_61, %c0_62] : memref<2x128xf32, #tpu.memory_space<vmem>>, vector<1x128xf32>
    %138 = vector.broadcast %137 : vector<1x128xf32> to vector<2x128xf32>
    %139 = arith.mulf %136, %138 : vector<2x128xf32>
    %140 = vector.broadcast %122 : vector<1x128xf32> to vector<2x128xf32>
    %141 = arith.addf %140, %139 : vector<2x128xf32>
    %c1_63 = arith.constant 1 : index
    %c0_64 = arith.constant 0 : index
    %142 = vector.load %arg4[%c1_63, %c0_64] : memref<2x128xf32, #tpu.memory_space<vmem>>, vector<1x128xf32>
    %143 = vector.broadcast %142 : vector<1x128xf32> to vector<2x128xf32>
    %144 = arith.mulf %76, %143 : vector<2x128xf32>
    %c1_i32_65 = arith.constant 1 : i32
    %145 = tpu.dynamic_rotate %144 by %c1_i32_65 dim 1 : vector<2x128xf32>, i32 -> vector<2x128xf32>
    %146 = arith.addf %144, %145 : vector<2x128xf32>
    %c2_i32_66 = arith.constant 2 : i32
    %147 = tpu.dynamic_rotate %146 by %c2_i32_66 dim 1 : vector<2x128xf32>, i32 -> vector<2x128xf32>
    %148 = arith.addf %146, %147 : vector<2x128xf32>
    %c4_i32_67 = arith.constant 4 : i32
    %149 = tpu.dynamic_rotate %148 by %c4_i32_67 dim 1 : vector<2x128xf32>, i32 -> vector<2x128xf32>
    %150 = arith.addf %148, %149 : vector<2x128xf32>
    %c1_68 = arith.constant 1 : index
    %c0_69 = arith.constant 0 : index
    %151 = vector.load %arg5[%c1_68, %c0_69] : memref<2x128xf32, #tpu.memory_space<vmem>>, vector<1x128xf32>
    %152 = vector.broadcast %151 : vector<1x128xf32> to vector<2x128xf32>
    %153 = arith.addf %150, %152 : vector<2x128xf32>
    %cst_70 = arith.constant 0.000000e+00 : f32
    %154 = vector.broadcast %cst_70 : f32 to vector<2x128xf32>
    %155 = arith.maximumf %153, %154 : vector<2x128xf32>
    %c1_71 = arith.constant 1 : index
    %c0_72 = arith.constant 0 : index
    %156 = vector.load %arg6[%c1_71, %c0_72] : memref<2x128xf32, #tpu.memory_space<vmem>>, vector<1x128xf32>
    %157 = vector.broadcast %156 : vector<1x128xf32> to vector<2x128xf32>
    %158 = arith.mulf %155, %157 : vector<2x128xf32>
    %159 = arith.addf %141, %158 : vector<2x128xf32>
    %cst_73 = arith.constant 0.000000e+00 : f32
    %160 = vector.broadcast %cst_73 : f32 to vector<2x128xf32>
    %161 = arith.subf %160, %159 : vector<2x128xf32>
    %162 = math.exp %161 : vector<2x128xf32>
    %cst_74 = arith.constant 1.000000e+00 : f32
    %163 = vector.broadcast %cst_74 : f32 to vector<2x128xf32>
    %164 = arith.addf %163, %162 : vector<2x128xf32>
    %cst_75 = arith.constant 1.000000e+00 : f32
    %165 = vector.broadcast %cst_75 : f32 to vector<2x128xf32>
    %166 = arith.divf %165, %164 : vector<2x128xf32>
    %167 = arith.addf %121, %166 : vector<2x128xf32>
    %168 = vector.extract_strided_slice %46 {offsets = [0, 0], sizes = [16, 128], strides = [1, 1]} : vector<32x128xf32> to vector<16x128xf32>
    %169 = vector.extract_strided_slice %167 {offsets = [0, 0], sizes = [1, 128], strides = [1, 1]} : vector<2x128xf32> to vector<1x128xf32>
    %170 = vector.broadcast %169 : vector<1x128xf32> to vector<16x128xf32>
    %171 = arith.mulf %168, %170 : vector<16x128xf32>
    %172 = vector.extract_strided_slice %46 {offsets = [16, 0], sizes = [16, 128], strides = [1, 1]} : vector<32x128xf32> to vector<16x128xf32>
    %173 = vector.extract_strided_slice %167 {offsets = [1, 0], sizes = [1, 128], strides = [1, 1]} : vector<2x128xf32> to vector<1x128xf32>
    %174 = vector.broadcast %173 : vector<1x128xf32> to vector<16x128xf32>
    %175 = arith.mulf %172, %174 : vector<16x128xf32>
    %176 = tpu.concatenate %171, %175 in 0 : vector<16x128xf32>, vector<16x128xf32> -> vector<32x128xf32>
    %177 = tpu.iota {dimensions = array<i32: 0>} : vector<16x128xi32>
    %178 = tpu.concatenate %177, %177 in 0 : vector<16x128xi32>, vector<16x128xi32> -> vector<32x128xi32>
    %c0_76 = arith.constant 0 : index
    %c0_77 = arith.constant 0 : index
    %179 = vector.load %arg8[%c0_76, %c0_77] : memref<128x640xf32, #tpu.memory_space<vmem>>, vector<128x640xf32>
    %cst_78 = arith.constant dense<0.000000e+00> : vector<32x640xf32>
    %180 = tpu.matmul %176, %179, %cst_78 {dimension_numbers = #tpu.dot_dimension_numbers<[1], [0], [0], [1], [0, 0, 1, 1], [], []>} : vector<32x128xf32>, vector<128x640xf32>, vector<32x640xf32> -> vector<32x640xf32>
    %c0_79 = arith.constant 0 : index
    %c0_80 = arith.constant 0 : index
    %181 = vector.load %arg11[%c0_79, %c0_80] : memref<7x128xf32, #tpu.memory_space<vmem>>, vector<1x128xf32>
    %182 = vector.extract_strided_slice %180 {offsets = [0, 0], sizes = [32, 128], strides = [1, 1]} : vector<32x640xf32> to vector<32x128xf32>
    %c2_i32_81 = arith.constant 2 : i32
    %183 = tpu.dynamic_rotate %182 by %c2_i32_81 dim 0 : vector<32x128xf32>, i32 -> vector<32x128xf32>
    %c-2_i32 = arith.constant -2 : i32
    %184 = vector.broadcast %c-2_i32 : i32 to vector<32x128xi32>
    %185 = arith.addi %178, %184 : vector<32x128xi32>
    %c0_i32 = arith.constant 0 : i32
    %186 = vector.broadcast %c0_i32 : i32 to vector<32x128xi32>
    %187 = arith.cmpi sge, %185, %186 : vector<32x128xi32>
    %c-2_i32_82 = arith.constant -2 : i32
    %188 = vector.broadcast %c-2_i32_82 : i32 to vector<32x128xi32>
    %189 = arith.addi %178, %188 : vector<32x128xi32>
    %c16_i32_83 = arith.constant 16 : i32
    %190 = vector.broadcast %c16_i32_83 : i32 to vector<32x128xi32>
    %191 = arith.cmpi slt, %189, %190 : vector<32x128xi32>
    %192 = arith.andi %187, %191 : vector<32x128xi1>
    %193 = arith.extui %192 : vector<32x128xi1> to vector<32x128xi32>
    %194 = arith.sitofp %193 : vector<32x128xi32> to vector<32x128xf32>
    %195 = arith.mulf %183, %194 : vector<32x128xf32>
    %196 = vector.broadcast %181 : vector<1x128xf32> to vector<32x128xf32>
    %197 = arith.addf %196, %195 : vector<32x128xf32>
    %198 = vector.extract_strided_slice %180 {offsets = [0, 128], sizes = [32, 128], strides = [1, 1]} : vector<32x640xf32> to vector<32x128xf32>
    %c1_i32_84 = arith.constant 1 : i32
    %199 = tpu.dynamic_rotate %198 by %c1_i32_84 dim 0 : vector<32x128xf32>, i32 -> vector<32x128xf32>
    %c-1_i32 = arith.constant -1 : i32
    %200 = vector.broadcast %c-1_i32 : i32 to vector<32x128xi32>
    %201 = arith.addi %178, %200 : vector<32x128xi32>
    %c0_i32_85 = arith.constant 0 : i32
    %202 = vector.broadcast %c0_i32_85 : i32 to vector<32x128xi32>
    %203 = arith.cmpi sge, %201, %202 : vector<32x128xi32>
    %c-1_i32_86 = arith.constant -1 : i32
    %204 = vector.broadcast %c-1_i32_86 : i32 to vector<32x128xi32>
    %205 = arith.addi %178, %204 : vector<32x128xi32>
    %c16_i32_87 = arith.constant 16 : i32
    %206 = vector.broadcast %c16_i32_87 : i32 to vector<32x128xi32>
    %207 = arith.cmpi slt, %205, %206 : vector<32x128xi32>
    %208 = arith.andi %203, %207 : vector<32x128xi1>
    %209 = arith.extui %208 : vector<32x128xi1> to vector<32x128xi32>
    %210 = arith.sitofp %209 : vector<32x128xi32> to vector<32x128xf32>
    %211 = arith.mulf %199, %210 : vector<32x128xf32>
    %212 = arith.addf %197, %211 : vector<32x128xf32>
    %213 = vector.extract_strided_slice %180 {offsets = [0, 256], sizes = [32, 128], strides = [1, 1]} : vector<32x640xf32> to vector<32x128xf32>
    %214 = arith.addf %212, %213 : vector<32x128xf32>
    %215 = vector.extract_strided_slice %180 {offsets = [0, 384], sizes = [32, 128], strides = [1, 1]} : vector<32x640xf32> to vector<32x128xf32>
    %c31_i32 = arith.constant 31 : i32
    %216 = tpu.dynamic_rotate %215 by %c31_i32 dim 0 : vector<32x128xf32>, i32 -> vector<32x128xf32>
    %c1_i32_88 = arith.constant 1 : i32
    %217 = vector.broadcast %c1_i32_88 : i32 to vector<32x128xi32>
    %218 = arith.addi %178, %217 : vector<32x128xi32>
    %c0_i32_89 = arith.constant 0 : i32
    %219 = vector.broadcast %c0_i32_89 : i32 to vector<32x128xi32>
    %220 = arith.cmpi sge, %218, %219 : vector<32x128xi32>
    %c1_i32_90 = arith.constant 1 : i32
    %221 = vector.broadcast %c1_i32_90 : i32 to vector<32x128xi32>
    %222 = arith.addi %178, %221 : vector<32x128xi32>
    %c16_i32_91 = arith.constant 16 : i32
    %223 = vector.broadcast %c16_i32_91 : i32 to vector<32x128xi32>
    %224 = arith.cmpi slt, %222, %223 : vector<32x128xi32>
    %225 = arith.andi %220, %224 : vector<32x128xi1>
    %226 = arith.extui %225 : vector<32x128xi1> to vector<32x128xi32>
    %227 = arith.sitofp %226 : vector<32x128xi32> to vector<32x128xf32>
    %228 = arith.mulf %216, %227 : vector<32x128xf32>
    %229 = arith.addf %214, %228 : vector<32x128xf32>
    %230 = vector.extract_strided_slice %180 {offsets = [0, 512], sizes = [32, 128], strides = [1, 1]} : vector<32x640xf32> to vector<32x128xf32>
    %c30_i32 = arith.constant 30 : i32
    %231 = tpu.dynamic_rotate %230 by %c30_i32 dim 0 : vector<32x128xf32>, i32 -> vector<32x128xf32>
    %c2_i32_92 = arith.constant 2 : i32
    %232 = vector.broadcast %c2_i32_92 : i32 to vector<32x128xi32>
    %233 = arith.addi %178, %232 : vector<32x128xi32>
    %c0_i32_93 = arith.constant 0 : i32
    %234 = vector.broadcast %c0_i32_93 : i32 to vector<32x128xi32>
    %235 = arith.cmpi sge, %233, %234 : vector<32x128xi32>
    %c2_i32_94 = arith.constant 2 : i32
    %236 = vector.broadcast %c2_i32_94 : i32 to vector<32x128xi32>
    %237 = arith.addi %178, %236 : vector<32x128xi32>
    %c16_i32_95 = arith.constant 16 : i32
    %238 = vector.broadcast %c16_i32_95 : i32 to vector<32x128xi32>
    %239 = arith.cmpi slt, %237, %238 : vector<32x128xi32>
    %240 = arith.andi %235, %239 : vector<32x128xi1>
    %241 = arith.extui %240 : vector<32x128xi1> to vector<32x128xi32>
    %242 = arith.sitofp %241 : vector<32x128xi32> to vector<32x128xf32>
    %243 = arith.mulf %231, %242 : vector<32x128xf32>
    %244 = arith.addf %229, %243 : vector<32x128xf32>
    %c0_96 = arith.constant 0 : index
    %c0_97 = arith.constant 0 : index
    %245 = vector.load %arg9[%c0_96, %c0_97] : memref<128x384xf32, #tpu.memory_space<vmem>>, vector<128x384xf32>
    %cst_98 = arith.constant dense<0.000000e+00> : vector<32x384xf32>
    %246 = tpu.matmul %244, %245, %cst_98 {dimension_numbers = #tpu.dot_dimension_numbers<[1], [0], [0], [1], [0, 0, 1, 1], [], []>} : vector<32x128xf32>, vector<128x384xf32>, vector<32x384xf32> -> vector<32x384xf32>
    %247 = vector.extract_strided_slice %246 {offsets = [0, 0], sizes = [32, 128], strides = [1, 1]} : vector<32x384xf32> to vector<32x128xf32>
    %c1_99 = arith.constant 1 : index
    %c0_100 = arith.constant 0 : index
    %248 = vector.load %arg11[%c1_99, %c0_100] : memref<7x128xf32, #tpu.memory_space<vmem>>, vector<1x128xf32>
    %249 = vector.broadcast %248 : vector<1x128xf32> to vector<32x128xf32>
    %250 = arith.addf %247, %249 : vector<32x128xf32>
    %c2 = arith.constant 2 : index
    %c0_101 = arith.constant 0 : index
    %251 = vector.load %arg11[%c2, %c0_101] : memref<7x128xf32, #tpu.memory_space<vmem>>, vector<1x128xf32>
    %c3_i32 = arith.constant 3 : i32
    %252 = tpu.dynamic_rotate %250 by %c3_i32 dim 0 : vector<32x128xf32>, i32 -> vector<32x128xf32>
    %c-3_i32 = arith.constant -3 : i32
    %253 = vector.broadcast %c-3_i32 : i32 to vector<32x128xi32>
    %254 = arith.addi %178, %253 : vector<32x128xi32>
    %c0_i32_102 = arith.constant 0 : i32
    %255 = vector.broadcast %c0_i32_102 : i32 to vector<32x128xi32>
    %256 = arith.cmpi sge, %254, %255 : vector<32x128xi32>
    %c-3_i32_103 = arith.constant -3 : i32
    %257 = vector.broadcast %c-3_i32_103 : i32 to vector<32x128xi32>
    %258 = arith.addi %178, %257 : vector<32x128xi32>
    %c16_i32_104 = arith.constant 16 : i32
    %259 = vector.broadcast %c16_i32_104 : i32 to vector<32x128xi32>
    %260 = arith.cmpi slt, %258, %259 : vector<32x128xi32>
    %261 = arith.andi %256, %260 : vector<32x128xi1>
    %262 = arith.extui %261 : vector<32x128xi1> to vector<32x128xi32>
    %263 = arith.sitofp %262 : vector<32x128xi32> to vector<32x128xf32>
    %264 = arith.mulf %252, %263 : vector<32x128xf32>
    %c0_105 = arith.constant 0 : index
    %c0_106 = arith.constant 0 : index
    %265 = vector.load %arg10[%c0_105, %c0_106] : memref<39x128xf32, #tpu.memory_space<vmem>>, vector<1x128xf32>
    %266 = vector.broadcast %265 : vector<1x128xf32> to vector<32x128xf32>
    %267 = arith.mulf %264, %266 : vector<32x128xf32>
    %268 = vector.broadcast %251 : vector<1x128xf32> to vector<32x128xf32>
    %269 = arith.addf %268, %267 : vector<32x128xf32>
    %c2_i32_107 = arith.constant 2 : i32
    %270 = tpu.dynamic_rotate %250 by %c2_i32_107 dim 0 : vector<32x128xf32>, i32 -> vector<32x128xf32>
    %271 = arith.mulf %270, %194 : vector<32x128xf32>
    %c1_108 = arith.constant 1 : index
    %c0_109 = arith.constant 0 : index
    %272 = vector.load %arg10[%c1_108, %c0_109] : memref<39x128xf32, #tpu.memory_space<vmem>>, vector<1x128xf32>
    %273 = vector.broadcast %272 : vector<1x128xf32> to vector<32x128xf32>
    %274 = arith.mulf %271, %273 : vector<32x128xf32>
    %275 = arith.addf %269, %274 : vector<32x128xf32>
    %c1_i32_110 = arith.constant 1 : i32
    %276 = tpu.dynamic_rotate %250 by %c1_i32_110 dim 0 : vector<32x128xf32>, i32 -> vector<32x128xf32>
    %277 = arith.mulf %276, %210 : vector<32x128xf32>
    %c2_111 = arith.constant 2 : index
    %c0_112 = arith.constant 0 : index
    %278 = vector.load %arg10[%c2_111, %c0_112] : memref<39x128xf32, #tpu.memory_space<vmem>>, vector<1x128xf32>
    %279 = vector.broadcast %278 : vector<1x128xf32> to vector<32x128xf32>
    %280 = arith.mulf %277, %279 : vector<32x128xf32>
    %281 = arith.addf %275, %280 : vector<32x128xf32>
    %c3 = arith.constant 3 : index
    %c0_113 = arith.constant 0 : index
    %282 = vector.load %arg10[%c3, %c0_113] : memref<39x128xf32, #tpu.memory_space<vmem>>, vector<1x128xf32>
    %283 = vector.broadcast %282 : vector<1x128xf32> to vector<32x128xf32>
    %284 = arith.mulf %250, %283 : vector<32x128xf32>
    %285 = arith.addf %281, %284 : vector<32x128xf32>
    %c31_i32_114 = arith.constant 31 : i32
    %286 = tpu.dynamic_rotate %250 by %c31_i32_114 dim 0 : vector<32x128xf32>, i32 -> vector<32x128xf32>
    %287 = arith.mulf %286, %227 : vector<32x128xf32>
    %c4 = arith.constant 4 : index
    %c0_115 = arith.constant 0 : index
    %288 = vector.load %arg10[%c4, %c0_115] : memref<39x128xf32, #tpu.memory_space<vmem>>, vector<1x128xf32>
    %289 = vector.broadcast %288 : vector<1x128xf32> to vector<32x128xf32>
    %290 = arith.mulf %287, %289 : vector<32x128xf32>
    %291 = arith.addf %285, %290 : vector<32x128xf32>
    %c30_i32_116 = arith.constant 30 : i32
    %292 = tpu.dynamic_rotate %250 by %c30_i32_116 dim 0 : vector<32x128xf32>, i32 -> vector<32x128xf32>
    %293 = arith.mulf %292, %242 : vector<32x128xf32>
    %c5 = arith.constant 5 : index
    %c0_117 = arith.constant 0 : index
    %294 = vector.load %arg10[%c5, %c0_117] : memref<39x128xf32, #tpu.memory_space<vmem>>, vector<1x128xf32>
    %295 = vector.broadcast %294 : vector<1x128xf32> to vector<32x128xf32>
    %296 = arith.mulf %293, %295 : vector<32x128xf32>
    %297 = arith.addf %291, %296 : vector<32x128xf32>
    %c29_i32 = arith.constant 29 : i32
    %298 = tpu.dynamic_rotate %250 by %c29_i32 dim 0 : vector<32x128xf32>, i32 -> vector<32x128xf32>
    %c3_i32_118 = arith.constant 3 : i32
    %299 = vector.broadcast %c3_i32_118 : i32 to vector<32x128xi32>
    %300 = arith.addi %178, %299 : vector<32x128xi32>
    %c0_i32_119 = arith.constant 0 : i32
    %301 = vector.broadcast %c0_i32_119 : i32 to vector<32x128xi32>
    %302 = arith.cmpi sge, %300, %301 : vector<32x128xi32>
    %c3_i32_120 = arith.constant 3 : i32
    %303 = vector.broadcast %c3_i32_120 : i32 to vector<32x128xi32>
    %304 = arith.addi %178, %303 : vector<32x128xi32>
    %c16_i32_121 = arith.constant 16 : i32
    %305 = vector.broadcast %c16_i32_121 : i32 to vector<32x128xi32>
    %306 = arith.cmpi slt, %304, %305 : vector<32x128xi32>
    %307 = arith.andi %302, %306 : vector<32x128xi1>
    %308 = arith.extui %307 : vector<32x128xi1> to vector<32x128xi32>
    %309 = arith.sitofp %308 : vector<32x128xi32> to vector<32x128xf32>
    %310 = arith.mulf %298, %309 : vector<32x128xf32>
    %c6 = arith.constant 6 : index
    %c0_122 = arith.constant 0 : index
    %311 = vector.load %arg10[%c6, %c0_122] : memref<39x128xf32, #tpu.memory_space<vmem>>, vector<1x128xf32>
    %312 = vector.broadcast %311 : vector<1x128xf32> to vector<32x128xf32>
    %313 = arith.mulf %310, %312 : vector<32x128xf32>
    %314 = arith.addf %297, %313 : vector<32x128xf32>
    %315 = arith.addf %244, %314 : vector<32x128xf32>
    %316 = vector.extract_strided_slice %246 {offsets = [0, 128], sizes = [32, 128], strides = [1, 1]} : vector<32x384xf32> to vector<32x128xf32>
    %c3_123 = arith.constant 3 : index
    %c0_124 = arith.constant 0 : index
    %317 = vector.load %arg11[%c3_123, %c0_124] : memref<7x128xf32, #tpu.memory_space<vmem>>, vector<1x128xf32>
    %318 = vector.broadcast %317 : vector<1x128xf32> to vector<32x128xf32>
    %319 = arith.addf %316, %318 : vector<32x128xf32>
    %c4_125 = arith.constant 4 : index
    %c0_126 = arith.constant 0 : index
    %320 = vector.load %arg11[%c4_125, %c0_126] : memref<7x128xf32, #tpu.memory_space<vmem>>, vector<1x128xf32>
    %c5_i32 = arith.constant 5 : i32
    %321 = tpu.dynamic_rotate %319 by %c5_i32 dim 0 : vector<32x128xf32>, i32 -> vector<32x128xf32>
    %c-5_i32 = arith.constant -5 : i32
    %322 = vector.broadcast %c-5_i32 : i32 to vector<32x128xi32>
    %323 = arith.addi %178, %322 : vector<32x128xi32>
    %c0_i32_127 = arith.constant 0 : i32
    %324 = vector.broadcast %c0_i32_127 : i32 to vector<32x128xi32>
    %325 = arith.cmpi sge, %323, %324 : vector<32x128xi32>
    %c-5_i32_128 = arith.constant -5 : i32
    %326 = vector.broadcast %c-5_i32_128 : i32 to vector<32x128xi32>
    %327 = arith.addi %178, %326 : vector<32x128xi32>
    %c16_i32_129 = arith.constant 16 : i32
    %328 = vector.broadcast %c16_i32_129 : i32 to vector<32x128xi32>
    %329 = arith.cmpi slt, %327, %328 : vector<32x128xi32>
    %330 = arith.andi %325, %329 : vector<32x128xi1>
    %331 = arith.extui %330 : vector<32x128xi1> to vector<32x128xi32>
    %332 = arith.sitofp %331 : vector<32x128xi32> to vector<32x128xf32>
    %333 = arith.mulf %321, %332 : vector<32x128xf32>
    %c7 = arith.constant 7 : index
    %c0_130 = arith.constant 0 : index
    %334 = vector.load %arg10[%c7, %c0_130] : memref<39x128xf32, #tpu.memory_space<vmem>>, vector<1x128xf32>
    %335 = vector.broadcast %334 : vector<1x128xf32> to vector<32x128xf32>
    %336 = arith.mulf %333, %335 : vector<32x128xf32>
    %337 = vector.broadcast %320 : vector<1x128xf32> to vector<32x128xf32>
    %338 = arith.addf %337, %336 : vector<32x128xf32>
    %c4_i32_131 = arith.constant 4 : i32
    %339 = tpu.dynamic_rotate %319 by %c4_i32_131 dim 0 : vector<32x128xf32>, i32 -> vector<32x128xf32>
    %c-4_i32 = arith.constant -4 : i32
    %340 = vector.broadcast %c-4_i32 : i32 to vector<32x128xi32>
    %341 = arith.addi %178, %340 : vector<32x128xi32>
    %c0_i32_132 = arith.constant 0 : i32
    %342 = vector.broadcast %c0_i32_132 : i32 to vector<32x128xi32>
    %343 = arith.cmpi sge, %341, %342 : vector<32x128xi32>
    %c-4_i32_133 = arith.constant -4 : i32
    %344 = vector.broadcast %c-4_i32_133 : i32 to vector<32x128xi32>
    %345 = arith.addi %178, %344 : vector<32x128xi32>
    %c16_i32_134 = arith.constant 16 : i32
    %346 = vector.broadcast %c16_i32_134 : i32 to vector<32x128xi32>
    %347 = arith.cmpi slt, %345, %346 : vector<32x128xi32>
    %348 = arith.andi %343, %347 : vector<32x128xi1>
    %349 = arith.extui %348 : vector<32x128xi1> to vector<32x128xi32>
    %350 = arith.sitofp %349 : vector<32x128xi32> to vector<32x128xf32>
    %351 = arith.mulf %339, %350 : vector<32x128xf32>
    %c8 = arith.constant 8 : index
    %c0_135 = arith.constant 0 : index
    %352 = vector.load %arg10[%c8, %c0_135] : memref<39x128xf32, #tpu.memory_space<vmem>>, vector<1x128xf32>
    %353 = vector.broadcast %352 : vector<1x128xf32> to vector<32x128xf32>
    %354 = arith.mulf %351, %353 : vector<32x128xf32>
    %355 = arith.addf %338, %354 : vector<32x128xf32>
    %c3_i32_136 = arith.constant 3 : i32
    %356 = tpu.dynamic_rotate %319 by %c3_i32_136 dim 0 : vector<32x128xf32>, i32 -> vector<32x128xf32>
    %357 = arith.mulf %356, %263 : vector<32x128xf32>
    %c9 = arith.constant 9 : index
    %c0_137 = arith.constant 0 : index
    %358 = vector.load %arg10[%c9, %c0_137] : memref<39x128xf32, #tpu.memory_space<vmem>>, vector<1x128xf32>
    %359 = vector.broadcast %358 : vector<1x128xf32> to vector<32x128xf32>
    %360 = arith.mulf %357, %359 : vector<32x128xf32>
    %361 = arith.addf %355, %360 : vector<32x128xf32>
    %c2_i32_138 = arith.constant 2 : i32
    %362 = tpu.dynamic_rotate %319 by %c2_i32_138 dim 0 : vector<32x128xf32>, i32 -> vector<32x128xf32>
    %363 = arith.mulf %362, %194 : vector<32x128xf32>
    %c10 = arith.constant 10 : index
    %c0_139 = arith.constant 0 : index
    %364 = vector.load %arg10[%c10, %c0_139] : memref<39x128xf32, #tpu.memory_space<vmem>>, vector<1x128xf32>
    %365 = vector.broadcast %364 : vector<1x128xf32> to vector<32x128xf32>
    %366 = arith.mulf %363, %365 : vector<32x128xf32>
    %367 = arith.addf %361, %366 : vector<32x128xf32>
    %c1_i32_140 = arith.constant 1 : i32
    %368 = tpu.dynamic_rotate %319 by %c1_i32_140 dim 0 : vector<32x128xf32>, i32 -> vector<32x128xf32>
    %369 = arith.mulf %368, %210 : vector<32x128xf32>
    %c11 = arith.constant 11 : index
    %c0_141 = arith.constant 0 : index
    %370 = vector.load %arg10[%c11, %c0_141] : memref<39x128xf32, #tpu.memory_space<vmem>>, vector<1x128xf32>
    %371 = vector.broadcast %370 : vector<1x128xf32> to vector<32x128xf32>
    %372 = arith.mulf %369, %371 : vector<32x128xf32>
    %373 = arith.addf %367, %372 : vector<32x128xf32>
    %c12 = arith.constant 12 : index
    %c0_142 = arith.constant 0 : index
    %374 = vector.load %arg10[%c12, %c0_142] : memref<39x128xf32, #tpu.memory_space<vmem>>, vector<1x128xf32>
    %375 = vector.broadcast %374 : vector<1x128xf32> to vector<32x128xf32>
    %376 = arith.mulf %319, %375 : vector<32x128xf32>
    %377 = arith.addf %373, %376 : vector<32x128xf32>
    %c31_i32_143 = arith.constant 31 : i32
    %378 = tpu.dynamic_rotate %319 by %c31_i32_143 dim 0 : vector<32x128xf32>, i32 -> vector<32x128xf32>
    %379 = arith.mulf %378, %227 : vector<32x128xf32>
    %c13 = arith.constant 13 : index
    %c0_144 = arith.constant 0 : index
    %380 = vector.load %arg10[%c13, %c0_144] : memref<39x128xf32, #tpu.memory_space<vmem>>, vector<1x128xf32>
    %381 = vector.broadcast %380 : vector<1x128xf32> to vector<32x128xf32>
    %382 = arith.mulf %379, %381 : vector<32x128xf32>
    %383 = arith.addf %377, %382 : vector<32x128xf32>
    %c30_i32_145 = arith.constant 30 : i32
    %384 = tpu.dynamic_rotate %319 by %c30_i32_145 dim 0 : vector<32x128xf32>, i32 -> vector<32x128xf32>
    %385 = arith.mulf %384, %242 : vector<32x128xf32>
    %c14 = arith.constant 14 : index
    %c0_146 = arith.constant 0 : index
    %386 = vector.load %arg10[%c14, %c0_146] : memref<39x128xf32, #tpu.memory_space<vmem>>, vector<1x128xf32>
    %387 = vector.broadcast %386 : vector<1x128xf32> to vector<32x128xf32>
    %388 = arith.mulf %385, %387 : vector<32x128xf32>
    %389 = arith.addf %383, %388 : vector<32x128xf32>
    %c29_i32_147 = arith.constant 29 : i32
    %390 = tpu.dynamic_rotate %319 by %c29_i32_147 dim 0 : vector<32x128xf32>, i32 -> vector<32x128xf32>
    %391 = arith.mulf %390, %309 : vector<32x128xf32>
    %c15 = arith.constant 15 : index
    %c0_148 = arith.constant 0 : index
    %392 = vector.load %arg10[%c15, %c0_148] : memref<39x128xf32, #tpu.memory_space<vmem>>, vector<1x128xf32>
    %393 = vector.broadcast %392 : vector<1x128xf32> to vector<32x128xf32>
    %394 = arith.mulf %391, %393 : vector<32x128xf32>
    %395 = arith.addf %389, %394 : vector<32x128xf32>
    %c28_i32 = arith.constant 28 : i32
    %396 = tpu.dynamic_rotate %319 by %c28_i32 dim 0 : vector<32x128xf32>, i32 -> vector<32x128xf32>
    %c4_i32_149 = arith.constant 4 : i32
    %397 = vector.broadcast %c4_i32_149 : i32 to vector<32x128xi32>
    %398 = arith.addi %178, %397 : vector<32x128xi32>
    %c0_i32_150 = arith.constant 0 : i32
    %399 = vector.broadcast %c0_i32_150 : i32 to vector<32x128xi32>
    %400 = arith.cmpi sge, %398, %399 : vector<32x128xi32>
    %c4_i32_151 = arith.constant 4 : i32
    %401 = vector.broadcast %c4_i32_151 : i32 to vector<32x128xi32>
    %402 = arith.addi %178, %401 : vector<32x128xi32>
    %c16_i32_152 = arith.constant 16 : i32
    %403 = vector.broadcast %c16_i32_152 : i32 to vector<32x128xi32>
    %404 = arith.cmpi slt, %402, %403 : vector<32x128xi32>
    %405 = arith.andi %400, %404 : vector<32x128xi1>
    %406 = arith.extui %405 : vector<32x128xi1> to vector<32x128xi32>
    %407 = arith.sitofp %406 : vector<32x128xi32> to vector<32x128xf32>
    %408 = arith.mulf %396, %407 : vector<32x128xf32>
    %c16 = arith.constant 16 : index
    %c0_153 = arith.constant 0 : index
    %409 = vector.load %arg10[%c16, %c0_153] : memref<39x128xf32, #tpu.memory_space<vmem>>, vector<1x128xf32>
    %410 = vector.broadcast %409 : vector<1x128xf32> to vector<32x128xf32>
    %411 = arith.mulf %408, %410 : vector<32x128xf32>
    %412 = arith.addf %395, %411 : vector<32x128xf32>
    %c27_i32 = arith.constant 27 : i32
    %413 = tpu.dynamic_rotate %319 by %c27_i32 dim 0 : vector<32x128xf32>, i32 -> vector<32x128xf32>
    %c5_i32_154 = arith.constant 5 : i32
    %414 = vector.broadcast %c5_i32_154 : i32 to vector<32x128xi32>
    %415 = arith.addi %178, %414 : vector<32x128xi32>
    %c0_i32_155 = arith.constant 0 : i32
    %416 = vector.broadcast %c0_i32_155 : i32 to vector<32x128xi32>
    %417 = arith.cmpi sge, %415, %416 : vector<32x128xi32>
    %c5_i32_156 = arith.constant 5 : i32
    %418 = vector.broadcast %c5_i32_156 : i32 to vector<32x128xi32>
    %419 = arith.addi %178, %418 : vector<32x128xi32>
    %c16_i32_157 = arith.constant 16 : i32
    %420 = vector.broadcast %c16_i32_157 : i32 to vector<32x128xi32>
    %421 = arith.cmpi slt, %419, %420 : vector<32x128xi32>
    %422 = arith.andi %417, %421 : vector<32x128xi1>
    %423 = arith.extui %422 : vector<32x128xi1> to vector<32x128xi32>
    %424 = arith.sitofp %423 : vector<32x128xi32> to vector<32x128xf32>
    %425 = arith.mulf %413, %424 : vector<32x128xf32>
    %c17 = arith.constant 17 : index
    %c0_158 = arith.constant 0 : index
    %426 = vector.load %arg10[%c17, %c0_158] : memref<39x128xf32, #tpu.memory_space<vmem>>, vector<1x128xf32>
    %427 = vector.broadcast %426 : vector<1x128xf32> to vector<32x128xf32>
    %428 = arith.mulf %425, %427 : vector<32x128xf32>
    %429 = arith.addf %412, %428 : vector<32x128xf32>
    %430 = arith.addf %315, %429 : vector<32x128xf32>
    %431 = vector.extract_strided_slice %246 {offsets = [0, 256], sizes = [32, 128], strides = [1, 1]} : vector<32x384xf32> to vector<32x128xf32>
    %c5_159 = arith.constant 5 : index
    %c0_160 = arith.constant 0 : index
    %432 = vector.load %arg11[%c5_159, %c0_160] : memref<7x128xf32, #tpu.memory_space<vmem>>, vector<1x128xf32>
    %433 = vector.broadcast %432 : vector<1x128xf32> to vector<32x128xf32>
    %434 = arith.addf %431, %433 : vector<32x128xf32>
    %c6_161 = arith.constant 6 : index
    %c0_162 = arith.constant 0 : index
    %435 = vector.load %arg11[%c6_161, %c0_162] : memref<7x128xf32, #tpu.memory_space<vmem>>, vector<1x128xf32>
    %c10_i32 = arith.constant 10 : i32
    %436 = tpu.dynamic_rotate %434 by %c10_i32 dim 0 : vector<32x128xf32>, i32 -> vector<32x128xf32>
    %c-10_i32 = arith.constant -10 : i32
    %437 = vector.broadcast %c-10_i32 : i32 to vector<32x128xi32>
    %438 = arith.addi %178, %437 : vector<32x128xi32>
    %c0_i32_163 = arith.constant 0 : i32
    %439 = vector.broadcast %c0_i32_163 : i32 to vector<32x128xi32>
    %440 = arith.cmpi sge, %438, %439 : vector<32x128xi32>
    %c-10_i32_164 = arith.constant -10 : i32
    %441 = vector.broadcast %c-10_i32_164 : i32 to vector<32x128xi32>
    %442 = arith.addi %178, %441 : vector<32x128xi32>
    %c16_i32_165 = arith.constant 16 : i32
    %443 = vector.broadcast %c16_i32_165 : i32 to vector<32x128xi32>
    %444 = arith.cmpi slt, %442, %443 : vector<32x128xi32>
    %445 = arith.andi %440, %444 : vector<32x128xi1>
    %446 = arith.extui %445 : vector<32x128xi1> to vector<32x128xi32>
    %447 = arith.sitofp %446 : vector<32x128xi32> to vector<32x128xf32>
    %448 = arith.mulf %436, %447 : vector<32x128xf32>
    %c18 = arith.constant 18 : index
    %c0_166 = arith.constant 0 : index
    %449 = vector.load %arg10[%c18, %c0_166] : memref<39x128xf32, #tpu.memory_space<vmem>>, vector<1x128xf32>
    %450 = vector.broadcast %449 : vector<1x128xf32> to vector<32x128xf32>
    %451 = arith.mulf %448, %450 : vector<32x128xf32>
    %452 = vector.broadcast %435 : vector<1x128xf32> to vector<32x128xf32>
    %453 = arith.addf %452, %451 : vector<32x128xf32>
    %c9_i32 = arith.constant 9 : i32
    %454 = tpu.dynamic_rotate %434 by %c9_i32 dim 0 : vector<32x128xf32>, i32 -> vector<32x128xf32>
    %c-9_i32 = arith.constant -9 : i32
    %455 = vector.broadcast %c-9_i32 : i32 to vector<32x128xi32>
    %456 = arith.addi %178, %455 : vector<32x128xi32>
    %c0_i32_167 = arith.constant 0 : i32
    %457 = vector.broadcast %c0_i32_167 : i32 to vector<32x128xi32>
    %458 = arith.cmpi sge, %456, %457 : vector<32x128xi32>
    %c-9_i32_168 = arith.constant -9 : i32
    %459 = vector.broadcast %c-9_i32_168 : i32 to vector<32x128xi32>
    %460 = arith.addi %178, %459 : vector<32x128xi32>
    %c16_i32_169 = arith.constant 16 : i32
    %461 = vector.broadcast %c16_i32_169 : i32 to vector<32x128xi32>
    %462 = arith.cmpi slt, %460, %461 : vector<32x128xi32>
    %463 = arith.andi %458, %462 : vector<32x128xi1>
    %464 = arith.extui %463 : vector<32x128xi1> to vector<32x128xi32>
    %465 = arith.sitofp %464 : vector<32x128xi32> to vector<32x128xf32>
    %466 = arith.mulf %454, %465 : vector<32x128xf32>
    %c19 = arith.constant 19 : index
    %c0_170 = arith.constant 0 : index
    %467 = vector.load %arg10[%c19, %c0_170] : memref<39x128xf32, #tpu.memory_space<vmem>>, vector<1x128xf32>
    %468 = vector.broadcast %467 : vector<1x128xf32> to vector<32x128xf32>
    %469 = arith.mulf %466, %468 : vector<32x128xf32>
    %470 = arith.addf %453, %469 : vector<32x128xf32>
    %c8_i32_171 = arith.constant 8 : i32
    %471 = tpu.dynamic_rotate %434 by %c8_i32_171 dim 0 : vector<32x128xf32>, i32 -> vector<32x128xf32>
    %c-8_i32 = arith.constant -8 : i32
    %472 = vector.broadcast %c-8_i32 : i32 to vector<32x128xi32>
    %473 = arith.addi %178, %472 : vector<32x128xi32>
    %c0_i32_172 = arith.constant 0 : i32
    %474 = vector.broadcast %c0_i32_172 : i32 to vector<32x128xi32>
    %475 = arith.cmpi sge, %473, %474 : vector<32x128xi32>
    %c-8_i32_173 = arith.constant -8 : i32
    %476 = vector.broadcast %c-8_i32_173 : i32 to vector<32x128xi32>
    %477 = arith.addi %178, %476 : vector<32x128xi32>
    %c16_i32_174 = arith.constant 16 : i32
    %478 = vector.broadcast %c16_i32_174 : i32 to vector<32x128xi32>
    %479 = arith.cmpi slt, %477, %478 : vector<32x128xi32>
    %480 = arith.andi %475, %479 : vector<32x128xi1>
    %481 = arith.extui %480 : vector<32x128xi1> to vector<32x128xi32>
    %482 = arith.sitofp %481 : vector<32x128xi32> to vector<32x128xf32>
    %483 = arith.mulf %471, %482 : vector<32x128xf32>
    %c20 = arith.constant 20 : index
    %c0_175 = arith.constant 0 : index
    %484 = vector.load %arg10[%c20, %c0_175] : memref<39x128xf32, #tpu.memory_space<vmem>>, vector<1x128xf32>
    %485 = vector.broadcast %484 : vector<1x128xf32> to vector<32x128xf32>
    %486 = arith.mulf %483, %485 : vector<32x128xf32>
    %487 = arith.addf %470, %486 : vector<32x128xf32>
    %c7_i32 = arith.constant 7 : i32
    %488 = tpu.dynamic_rotate %434 by %c7_i32 dim 0 : vector<32x128xf32>, i32 -> vector<32x128xf32>
    %c-7_i32 = arith.constant -7 : i32
    %489 = vector.broadcast %c-7_i32 : i32 to vector<32x128xi32>
    %490 = arith.addi %178, %489 : vector<32x128xi32>
    %c0_i32_176 = arith.constant 0 : i32
    %491 = vector.broadcast %c0_i32_176 : i32 to vector<32x128xi32>
    %492 = arith.cmpi sge, %490, %491 : vector<32x128xi32>
    %c-7_i32_177 = arith.constant -7 : i32
    %493 = vector.broadcast %c-7_i32_177 : i32 to vector<32x128xi32>
    %494 = arith.addi %178, %493 : vector<32x128xi32>
    %c16_i32_178 = arith.constant 16 : i32
    %495 = vector.broadcast %c16_i32_178 : i32 to vector<32x128xi32>
    %496 = arith.cmpi slt, %494, %495 : vector<32x128xi32>
    %497 = arith.andi %492, %496 : vector<32x128xi1>
    %498 = arith.extui %497 : vector<32x128xi1> to vector<32x128xi32>
    %499 = arith.sitofp %498 : vector<32x128xi32> to vector<32x128xf32>
    %500 = arith.mulf %488, %499 : vector<32x128xf32>
    %c21 = arith.constant 21 : index
    %c0_179 = arith.constant 0 : index
    %501 = vector.load %arg10[%c21, %c0_179] : memref<39x128xf32, #tpu.memory_space<vmem>>, vector<1x128xf32>
    %502 = vector.broadcast %501 : vector<1x128xf32> to vector<32x128xf32>
    %503 = arith.mulf %500, %502 : vector<32x128xf32>
    %504 = arith.addf %487, %503 : vector<32x128xf32>
    %c6_i32 = arith.constant 6 : i32
    %505 = tpu.dynamic_rotate %434 by %c6_i32 dim 0 : vector<32x128xf32>, i32 -> vector<32x128xf32>
    %c-6_i32 = arith.constant -6 : i32
    %506 = vector.broadcast %c-6_i32 : i32 to vector<32x128xi32>
    %507 = arith.addi %178, %506 : vector<32x128xi32>
    %c0_i32_180 = arith.constant 0 : i32
    %508 = vector.broadcast %c0_i32_180 : i32 to vector<32x128xi32>
    %509 = arith.cmpi sge, %507, %508 : vector<32x128xi32>
    %c-6_i32_181 = arith.constant -6 : i32
    %510 = vector.broadcast %c-6_i32_181 : i32 to vector<32x128xi32>
    %511 = arith.addi %178, %510 : vector<32x128xi32>
    %c16_i32_182 = arith.constant 16 : i32
    %512 = vector.broadcast %c16_i32_182 : i32 to vector<32x128xi32>
    %513 = arith.cmpi slt, %511, %512 : vector<32x128xi32>
    %514 = arith.andi %509, %513 : vector<32x128xi1>
    %515 = arith.extui %514 : vector<32x128xi1> to vector<32x128xi32>
    %516 = arith.sitofp %515 : vector<32x128xi32> to vector<32x128xf32>
    %517 = arith.mulf %505, %516 : vector<32x128xf32>
    %c22 = arith.constant 22 : index
    %c0_183 = arith.constant 0 : index
    %518 = vector.load %arg10[%c22, %c0_183] : memref<39x128xf32, #tpu.memory_space<vmem>>, vector<1x128xf32>
    %519 = vector.broadcast %518 : vector<1x128xf32> to vector<32x128xf32>
    %520 = arith.mulf %517, %519 : vector<32x128xf32>
    %521 = arith.addf %504, %520 : vector<32x128xf32>
    %c5_i32_184 = arith.constant 5 : i32
    %522 = tpu.dynamic_rotate %434 by %c5_i32_184 dim 0 : vector<32x128xf32>, i32 -> vector<32x128xf32>
    %523 = arith.mulf %522, %332 : vector<32x128xf32>
    %c23 = arith.constant 23 : index
    %c0_185 = arith.constant 0 : index
    %524 = vector.load %arg10[%c23, %c0_185] : memref<39x128xf32, #tpu.memory_space<vmem>>, vector<1x128xf32>
    %525 = vector.broadcast %524 : vector<1x128xf32> to vector<32x128xf32>
    %526 = arith.mulf %523, %525 : vector<32x128xf32>
    %527 = arith.addf %521, %526 : vector<32x128xf32>
    %c4_i32_186 = arith.constant 4 : i32
    %528 = tpu.dynamic_rotate %434 by %c4_i32_186 dim 0 : vector<32x128xf32>, i32 -> vector<32x128xf32>
    %529 = arith.mulf %528, %350 : vector<32x128xf32>
    %c24 = arith.constant 24 : index
    %c0_187 = arith.constant 0 : index
    %530 = vector.load %arg10[%c24, %c0_187] : memref<39x128xf32, #tpu.memory_space<vmem>>, vector<1x128xf32>
    %531 = vector.broadcast %530 : vector<1x128xf32> to vector<32x128xf32>
    %532 = arith.mulf %529, %531 : vector<32x128xf32>
    %533 = arith.addf %527, %532 : vector<32x128xf32>
    %c3_i32_188 = arith.constant 3 : i32
    %534 = tpu.dynamic_rotate %434 by %c3_i32_188 dim 0 : vector<32x128xf32>, i32 -> vector<32x128xf32>
    %535 = arith.mulf %534, %263 : vector<32x128xf32>
    %c25 = arith.constant 25 : index
    %c0_189 = arith.constant 0 : index
    %536 = vector.load %arg10[%c25, %c0_189] : memref<39x128xf32, #tpu.memory_space<vmem>>, vector<1x128xf32>
    %537 = vector.broadcast %536 : vector<1x128xf32> to vector<32x128xf32>
    %538 = arith.mulf %535, %537 : vector<32x128xf32>
    %539 = arith.addf %533, %538 : vector<32x128xf32>
    %c2_i32_190 = arith.constant 2 : i32
    %540 = tpu.dynamic_rotate %434 by %c2_i32_190 dim 0 : vector<32x128xf32>, i32 -> vector<32x128xf32>
    %541 = arith.mulf %540, %194 : vector<32x128xf32>
    %c26 = arith.constant 26 : index
    %c0_191 = arith.constant 0 : index
    %542 = vector.load %arg10[%c26, %c0_191] : memref<39x128xf32, #tpu.memory_space<vmem>>, vector<1x128xf32>
    %543 = vector.broadcast %542 : vector<1x128xf32> to vector<32x128xf32>
    %544 = arith.mulf %541, %543 : vector<32x128xf32>
    %545 = arith.addf %539, %544 : vector<32x128xf32>
    %c1_i32_192 = arith.constant 1 : i32
    %546 = tpu.dynamic_rotate %434 by %c1_i32_192 dim 0 : vector<32x128xf32>, i32 -> vector<32x128xf32>
    %547 = arith.mulf %546, %210 : vector<32x128xf32>
    %c27 = arith.constant 27 : index
    %c0_193 = arith.constant 0 : index
    %548 = vector.load %arg10[%c27, %c0_193] : memref<39x128xf32, #tpu.memory_space<vmem>>, vector<1x128xf32>
    %549 = vector.broadcast %548 : vector<1x128xf32> to vector<32x128xf32>
    %550 = arith.mulf %547, %549 : vector<32x128xf32>
    %551 = arith.addf %545, %550 : vector<32x128xf32>
    %c28 = arith.constant 28 : index
    %c0_194 = arith.constant 0 : index
    %552 = vector.load %arg10[%c28, %c0_194] : memref<39x128xf32, #tpu.memory_space<vmem>>, vector<1x128xf32>
    %553 = vector.broadcast %552 : vector<1x128xf32> to vector<32x128xf32>
    %554 = arith.mulf %434, %553 : vector<32x128xf32>
    %555 = arith.addf %551, %554 : vector<32x128xf32>
    %c31_i32_195 = arith.constant 31 : i32
    %556 = tpu.dynamic_rotate %434 by %c31_i32_195 dim 0 : vector<32x128xf32>, i32 -> vector<32x128xf32>
    %557 = arith.mulf %556, %227 : vector<32x128xf32>
    %c29 = arith.constant 29 : index
    %c0_196 = arith.constant 0 : index
    %558 = vector.load %arg10[%c29, %c0_196] : memref<39x128xf32, #tpu.memory_space<vmem>>, vector<1x128xf32>
    %559 = vector.broadcast %558 : vector<1x128xf32> to vector<32x128xf32>
    %560 = arith.mulf %557, %559 : vector<32x128xf32>
    %561 = arith.addf %555, %560 : vector<32x128xf32>
    %c30_i32_197 = arith.constant 30 : i32
    %562 = tpu.dynamic_rotate %434 by %c30_i32_197 dim 0 : vector<32x128xf32>, i32 -> vector<32x128xf32>
    %563 = arith.mulf %562, %242 : vector<32x128xf32>
    %c30 = arith.constant 30 : index
    %c0_198 = arith.constant 0 : index
    %564 = vector.load %arg10[%c30, %c0_198] : memref<39x128xf32, #tpu.memory_space<vmem>>, vector<1x128xf32>
    %565 = vector.broadcast %564 : vector<1x128xf32> to vector<32x128xf32>
    %566 = arith.mulf %563, %565 : vector<32x128xf32>
    %567 = arith.addf %561, %566 : vector<32x128xf32>
    %c29_i32_199 = arith.constant 29 : i32
    %568 = tpu.dynamic_rotate %434 by %c29_i32_199 dim 0 : vector<32x128xf32>, i32 -> vector<32x128xf32>
    %569 = arith.mulf %568, %309 : vector<32x128xf32>
    %c31 = arith.constant 31 : index
    %c0_200 = arith.constant 0 : index
    %570 = vector.load %arg10[%c31, %c0_200] : memref<39x128xf32, #tpu.memory_space<vmem>>, vector<1x128xf32>
    %571 = vector.broadcast %570 : vector<1x128xf32> to vector<32x128xf32>
    %572 = arith.mulf %569, %571 : vector<32x128xf32>
    %573 = arith.addf %567, %572 : vector<32x128xf32>
    %c28_i32_201 = arith.constant 28 : i32
    %574 = tpu.dynamic_rotate %434 by %c28_i32_201 dim 0 : vector<32x128xf32>, i32 -> vector<32x128xf32>
    %575 = arith.mulf %574, %407 : vector<32x128xf32>
    %c32 = arith.constant 32 : index
    %c0_202 = arith.constant 0 : index
    %576 = vector.load %arg10[%c32, %c0_202] : memref<39x128xf32, #tpu.memory_space<vmem>>, vector<1x128xf32>
    %577 = vector.broadcast %576 : vector<1x128xf32> to vector<32x128xf32>
    %578 = arith.mulf %575, %577 : vector<32x128xf32>
    %579 = arith.addf %573, %578 : vector<32x128xf32>
    %c27_i32_203 = arith.constant 27 : i32
    %580 = tpu.dynamic_rotate %434 by %c27_i32_203 dim 0 : vector<32x128xf32>, i32 -> vector<32x128xf32>
    %581 = arith.mulf %580, %424 : vector<32x128xf32>
    %c33 = arith.constant 33 : index
    %c0_204 = arith.constant 0 : index
    %582 = vector.load %arg10[%c33, %c0_204] : memref<39x128xf32, #tpu.memory_space<vmem>>, vector<1x128xf32>
    %583 = vector.broadcast %582 : vector<1x128xf32> to vector<32x128xf32>
    %584 = arith.mulf %581, %583 : vector<32x128xf32>
    %585 = arith.addf %579, %584 : vector<32x128xf32>
    %c26_i32 = arith.constant 26 : i32
    %586 = tpu.dynamic_rotate %434 by %c26_i32 dim 0 : vector<32x128xf32>, i32 -> vector<32x128xf32>
    %c6_i32_205 = arith.constant 6 : i32
    %587 = vector.broadcast %c6_i32_205 : i32 to vector<32x128xi32>
    %588 = arith.addi %178, %587 : vector<32x128xi32>
    %c0_i32_206 = arith.constant 0 : i32
    %589 = vector.broadcast %c0_i32_206 : i32 to vector<32x128xi32>
    %590 = arith.cmpi sge, %588, %589 : vector<32x128xi32>
    %c6_i32_207 = arith.constant 6 : i32
    %591 = vector.broadcast %c6_i32_207 : i32 to vector<32x128xi32>
    %592 = arith.addi %178, %591 : vector<32x128xi32>
    %c16_i32_208 = arith.constant 16 : i32
    %593 = vector.broadcast %c16_i32_208 : i32 to vector<32x128xi32>
    %594 = arith.cmpi slt, %592, %593 : vector<32x128xi32>
    %595 = arith.andi %590, %594 : vector<32x128xi1>
    %596 = arith.extui %595 : vector<32x128xi1> to vector<32x128xi32>
    %597 = arith.sitofp %596 : vector<32x128xi32> to vector<32x128xf32>
    %598 = arith.mulf %586, %597 : vector<32x128xf32>
    %c34 = arith.constant 34 : index
    %c0_209 = arith.constant 0 : index
    %599 = vector.load %arg10[%c34, %c0_209] : memref<39x128xf32, #tpu.memory_space<vmem>>, vector<1x128xf32>
    %600 = vector.broadcast %599 : vector<1x128xf32> to vector<32x128xf32>
    %601 = arith.mulf %598, %600 : vector<32x128xf32>
    %602 = arith.addf %585, %601 : vector<32x128xf32>
    %c25_i32 = arith.constant 25 : i32
    %603 = tpu.dynamic_rotate %434 by %c25_i32 dim 0 : vector<32x128xf32>, i32 -> vector<32x128xf32>
    %c7_i32_210 = arith.constant 7 : i32
    %604 = vector.broadcast %c7_i32_210 : i32 to vector<32x128xi32>
    %605 = arith.addi %178, %604 : vector<32x128xi32>
    %c0_i32_211 = arith.constant 0 : i32
    %606 = vector.broadcast %c0_i32_211 : i32 to vector<32x128xi32>
    %607 = arith.cmpi sge, %605, %606 : vector<32x128xi32>
    %c7_i32_212 = arith.constant 7 : i32
    %608 = vector.broadcast %c7_i32_212 : i32 to vector<32x128xi32>
    %609 = arith.addi %178, %608 : vector<32x128xi32>
    %c16_i32_213 = arith.constant 16 : i32
    %610 = vector.broadcast %c16_i32_213 : i32 to vector<32x128xi32>
    %611 = arith.cmpi slt, %609, %610 : vector<32x128xi32>
    %612 = arith.andi %607, %611 : vector<32x128xi1>
    %613 = arith.extui %612 : vector<32x128xi1> to vector<32x128xi32>
    %614 = arith.sitofp %613 : vector<32x128xi32> to vector<32x128xf32>
    %615 = arith.mulf %603, %614 : vector<32x128xf32>
    %c35 = arith.constant 35 : index
    %c0_214 = arith.constant 0 : index
    %616 = vector.load %arg10[%c35, %c0_214] : memref<39x128xf32, #tpu.memory_space<vmem>>, vector<1x128xf32>
    %617 = vector.broadcast %616 : vector<1x128xf32> to vector<32x128xf32>
    %618 = arith.mulf %615, %617 : vector<32x128xf32>
    %619 = arith.addf %602, %618 : vector<32x128xf32>
    %c24_i32 = arith.constant 24 : i32
    %620 = tpu.dynamic_rotate %434 by %c24_i32 dim 0 : vector<32x128xf32>, i32 -> vector<32x128xf32>
    %c8_i32_215 = arith.constant 8 : i32
    %621 = vector.broadcast %c8_i32_215 : i32 to vector<32x128xi32>
    %622 = arith.addi %178, %621 : vector<32x128xi32>
    %c0_i32_216 = arith.constant 0 : i32
    %623 = vector.broadcast %c0_i32_216 : i32 to vector<32x128xi32>
    %624 = arith.cmpi sge, %622, %623 : vector<32x128xi32>
    %c8_i32_217 = arith.constant 8 : i32
    %625 = vector.broadcast %c8_i32_217 : i32 to vector<32x128xi32>
    %626 = arith.addi %178, %625 : vector<32x128xi32>
    %c16_i32_218 = arith.constant 16 : i32
    %627 = vector.broadcast %c16_i32_218 : i32 to vector<32x128xi32>
    %628 = arith.cmpi slt, %626, %627 : vector<32x128xi32>
    %629 = arith.andi %624, %628 : vector<32x128xi1>
    %630 = arith.extui %629 : vector<32x128xi1> to vector<32x128xi32>
    %631 = arith.sitofp %630 : vector<32x128xi32> to vector<32x128xf32>
    %632 = arith.mulf %620, %631 : vector<32x128xf32>
    %c36 = arith.constant 36 : index
    %c0_219 = arith.constant 0 : index
    %633 = vector.load %arg10[%c36, %c0_219] : memref<39x128xf32, #tpu.memory_space<vmem>>, vector<1x128xf32>
    %634 = vector.broadcast %633 : vector<1x128xf32> to vector<32x128xf32>
    %635 = arith.mulf %632, %634 : vector<32x128xf32>
    %636 = arith.addf %619, %635 : vector<32x128xf32>
    %c23_i32 = arith.constant 23 : i32
    %637 = tpu.dynamic_rotate %434 by %c23_i32 dim 0 : vector<32x128xf32>, i32 -> vector<32x128xf32>
    %c9_i32_220 = arith.constant 9 : i32
    %638 = vector.broadcast %c9_i32_220 : i32 to vector<32x128xi32>
    %639 = arith.addi %178, %638 : vector<32x128xi32>
    %c0_i32_221 = arith.constant 0 : i32
    %640 = vector.broadcast %c0_i32_221 : i32 to vector<32x128xi32>
    %641 = arith.cmpi sge, %639, %640 : vector<32x128xi32>
    %c9_i32_222 = arith.constant 9 : i32
    %642 = vector.broadcast %c9_i32_222 : i32 to vector<32x128xi32>
    %643 = arith.addi %178, %642 : vector<32x128xi32>
    %c16_i32_223 = arith.constant 16 : i32
    %644 = vector.broadcast %c16_i32_223 : i32 to vector<32x128xi32>
    %645 = arith.cmpi slt, %643, %644 : vector<32x128xi32>
    %646 = arith.andi %641, %645 : vector<32x128xi1>
    %647 = arith.extui %646 : vector<32x128xi1> to vector<32x128xi32>
    %648 = arith.sitofp %647 : vector<32x128xi32> to vector<32x128xf32>
    %649 = arith.mulf %637, %648 : vector<32x128xf32>
    %c37 = arith.constant 37 : index
    %c0_224 = arith.constant 0 : index
    %650 = vector.load %arg10[%c37, %c0_224] : memref<39x128xf32, #tpu.memory_space<vmem>>, vector<1x128xf32>
    %651 = vector.broadcast %650 : vector<1x128xf32> to vector<32x128xf32>
    %652 = arith.mulf %649, %651 : vector<32x128xf32>
    %653 = arith.addf %636, %652 : vector<32x128xf32>
    %c22_i32 = arith.constant 22 : i32
    %654 = tpu.dynamic_rotate %434 by %c22_i32 dim 0 : vector<32x128xf32>, i32 -> vector<32x128xf32>
    %c10_i32_225 = arith.constant 10 : i32
    %655 = vector.broadcast %c10_i32_225 : i32 to vector<32x128xi32>
    %656 = arith.addi %178, %655 : vector<32x128xi32>
    %c0_i32_226 = arith.constant 0 : i32
    %657 = vector.broadcast %c0_i32_226 : i32 to vector<32x128xi32>
    %658 = arith.cmpi sge, %656, %657 : vector<32x128xi32>
    %c10_i32_227 = arith.constant 10 : i32
    %659 = vector.broadcast %c10_i32_227 : i32 to vector<32x128xi32>
    %660 = arith.addi %178, %659 : vector<32x128xi32>
    %c16_i32_228 = arith.constant 16 : i32
    %661 = vector.broadcast %c16_i32_228 : i32 to vector<32x128xi32>
    %662 = arith.cmpi slt, %660, %661 : vector<32x128xi32>
    %663 = arith.andi %658, %662 : vector<32x128xi1>
    %664 = arith.extui %663 : vector<32x128xi1> to vector<32x128xi32>
    %665 = arith.sitofp %664 : vector<32x128xi32> to vector<32x128xf32>
    %666 = arith.mulf %654, %665 : vector<32x128xf32>
    %c38 = arith.constant 38 : index
    %c0_229 = arith.constant 0 : index
    %667 = vector.load %arg10[%c38, %c0_229] : memref<39x128xf32, #tpu.memory_space<vmem>>, vector<1x128xf32>
    %668 = vector.broadcast %667 : vector<1x128xf32> to vector<32x128xf32>
    %669 = arith.mulf %666, %668 : vector<32x128xf32>
    %670 = arith.addf %653, %669 : vector<32x128xf32>
    %671 = arith.addf %430, %670 : vector<32x128xf32>
    %c0_230 = arith.constant 0 : index
    %c0_231 = arith.constant 0 : index
    %672 = vector.load %arg2[%c0_230, %c0_231] : memref<128x128xf32, #tpu.memory_space<vmem>>, vector<128x128xf32>
    %cst_232 = arith.constant dense<0.000000e+00> : vector<32x128xf32>
    %673 = tpu.matmul %671, %672, %cst_232 {dimension_numbers = #tpu.dot_dimension_numbers<[1], [0], [0], [1], [0, 0, 1, 1], [], []>} : vector<32x128xf32>, vector<128x128xf32>, vector<32x128xf32> -> vector<32x128xf32>
    %c0_233 = arith.constant 0 : index
    %c0_234 = arith.constant 0 : index
    %674 = vector.load %arg3[%c0_233, %c0_234] : memref<1x128xf32, #tpu.memory_space<vmem>>, vector<1x128xf32>
    %675 = vector.broadcast %674 : vector<1x128xf32> to vector<32x128xf32>
    %676 = arith.addf %673, %675 : vector<32x128xf32>
    %677 = arith.mulf %676, %176 : vector<32x128xf32>
    %c0_235 = arith.constant 0 : index
    %c0_236 = arith.constant 0 : index
    %678 = vector.load %arg12[%c0_235, %c0_236] : memref<128x128xf32, #tpu.memory_space<vmem>>, vector<128x128xf32>
    %cst_237 = arith.constant dense<0.000000e+00> : vector<32x128xf32>
    %679 = tpu.matmul %677, %678, %cst_237 {dimension_numbers = #tpu.dot_dimension_numbers<[1], [0], [0], [1], [0, 0, 1, 1], [], []>} : vector<32x128xf32>, vector<128x128xf32>, vector<32x128xf32> -> vector<32x128xf32>
    %c0_238 = arith.constant 0 : index
    %c0_239 = arith.constant 0 : index
    %680 = vector.load %arg13[%c0_238, %c0_239] : memref<1x128xf32, #tpu.memory_space<vmem>>, vector<1x128xf32>
    %681 = vector.broadcast %680 : vector<1x128xf32> to vector<32x128xf32>
    %682 = arith.addf %679, %681 : vector<32x128xf32>
    %c0_240 = arith.constant 0 : index
    %c0_241 = arith.constant 0 : index
    %683 = vector.load %arg14[%c0_240, %c0_241] : memref<32x128xf32, #tpu.memory_space<vmem>>, vector<32x128xf32>
    tpu.vector_store %arg14[%c0_240, %c0_241], %682 {strides = array<i32>} : memref<32x128xf32, #tpu.memory_space<vmem>>, vector<32x128xf32>,
    return
  }
  func.func @transform_0(%arg0: i32) -> (i32, i32) {
    %c0_i32 = arith.constant 0 : i32
    %c0_i32_0 = arith.constant 0 : i32
    return %arg0, %c0_i32 : i32, i32
  }
  func.func @transform_1(%arg0: i32) -> (i32, i32) {
    %c0_i32 = arith.constant 0 : i32
    %c0_i32_0 = arith.constant 0 : i32
    %c0_i32_1 = arith.constant 0 : i32
    return %c0_i32, %c0_i32_0 : i32, i32
  }
  func.func @transform_2(%arg0: i32) -> (i32, i32) {
    %c0_i32 = arith.constant 0 : i32
    %c0_i32_0 = arith.constant 0 : i32
    %c0_i32_1 = arith.constant 0 : i32
    return %c0_i32, %c0_i32_0 : i32, i32
  }
  func.func @transform_3(%arg0: i32) -> (i32, i32) {
    %c0_i32 = arith.constant 0 : i32
    %c0_i32_0 = arith.constant 0 : i32
    %c0_i32_1 = arith.constant 0 : i32
    return %c0_i32, %c0_i32_0 : i32, i32
  }
  func.func @transform_4(%arg0: i32) -> (i32, i32) {
    %c0_i32 = arith.constant 0 : i32
    %c0_i32_0 = arith.constant 0 : i32
    %c0_i32_1 = arith.constant 0 : i32
    return %c0_i32, %c0_i32_0 : i32, i32
  }
  func.func @transform_5(%arg0: i32) -> (i32, i32) {
    %c0_i32 = arith.constant 0 : i32
    %c0_i32_0 = arith.constant 0 : i32
    %c0_i32_1 = arith.constant 0 : i32
    return %c0_i32, %c0_i32_0 : i32, i32
  }
  func.func @transform_6(%arg0: i32) -> (i32, i32) {
    %c0_i32 = arith.constant 0 : i32
    %c0_i32_0 = arith.constant 0 : i32
    %c0_i32_1 = arith.constant 0 : i32
    return %c0_i32, %c0_i32_0 : i32, i32
  }
  func.func @transform_7(%arg0: i32) -> (i32, i32) {
    %c0_i32 = arith.constant 0 : i32
    %c0_i32_0 = arith.constant 0 : i32
    %c0_i32_1 = arith.constant 0 : i32
    return %c0_i32, %c0_i32_0 : i32, i32
  }
  func.func @transform_8(%arg0: i32) -> (i32, i32) {
    %c0_i32 = arith.constant 0 : i32
    %c0_i32_0 = arith.constant 0 : i32
    %c0_i32_1 = arith.constant 0 : i32
    return %c0_i32, %c0_i32_0 : i32, i32
  }
  func.func @transform_9(%arg0: i32) -> (i32, i32) {
    %c0_i32 = arith.constant 0 : i32
    %c0_i32_0 = arith.constant 0 : i32
    %c0_i32_1 = arith.constant 0 : i32
    return %c0_i32, %c0_i32_0 : i32, i32
  }
  func.func @transform_10(%arg0: i32) -> (i32, i32) {
    %c0_i32 = arith.constant 0 : i32
    %c0_i32_0 = arith.constant 0 : i32
    %c0_i32_1 = arith.constant 0 : i32
    return %c0_i32, %c0_i32_0 : i32, i32
  }
  func.func @transform_11(%arg0: i32) -> (i32, i32) {
    %c0_i32 = arith.constant 0 : i32
    %c0_i32_0 = arith.constant 0 : i32
    %c0_i32_1 = arith.constant 0 : i32
    return %c0_i32, %c0_i32_0 : i32, i32
  }
  func.func @transform_12(%arg0: i32) -> (i32, i32) {
    %c0_i32 = arith.constant 0 : i32
    %c0_i32_0 = arith.constant 0 : i32
    %c0_i32_1 = arith.constant 0 : i32
    return %c0_i32, %c0_i32_0 : i32, i32
  }
  func.func @transform_13(%arg0: i32) -> (i32, i32) {
    %c0_i32 = arith.constant 0 : i32
    %c0_i32_0 = arith.constant 0 : i32
    return %arg0, %c0_i32 : i32, i32
  }
}

</mosaic_0001>

<bundles_post_ra>
// kernel: tpu_custom_call.1
= control target key start
LH: loop header
LB: loop body
LE: loop exit
PB: predicated region body
PF: predicated region fallthrough
CT: control target
= control target key end

     0   :  { %18 = vsyncpa [#allocation3], 0  ;;  %s4939_s0 = inlined_call_operand.hbm [shape: f32[32,128], index: 0, kind: input, shape index: {}]   ;;  %s4940_s1 = inlined_call_operand.hbm [shape: f32[128,128], index: 1, kind: input, shape index: {}]   ;;  %s4941_s2 = inlined_call_operand.vmem [shape: f32[1,128], index: 2, kind: input, shape index: {}]   ;;  %s4942_s3 = inlined_call_operand.vmem [shape: f32[2,128], index: 3, kind: input, shape index: {}]   ;;  %s4943_s4 = inlined_call_operand.vmem [shape: f32[2,128], index: 4, kind: input, shape index: {}]   ;;  %s4944_s5 = inlined_call_operand.vmem [shape: f32[2,128], index: 5, kind: input, shape index: {}]   ;;  %s4945_s6 = inlined_call_operand.vmem [shape: f32[1,128], index: 6, kind: input, shape index: {}]   ;;  %s4946_s7 = inlined_call_operand.hbm [shape: f32[128,640], index: 7, kind: input, shape index: {}]   ;;  %s4947_s8 = inlined_call_operand.hbm [shape: f32[128,384], index: 8, kind: input, shape index: {}]   ;;  %s4948_s9 = inlined_call_operand.hbm [shape: f32[39,128], index: 9, kind: input, shape index: {}]   ;;  %s4949_s10 = inlined_call_operand.vmem [shape: f32[7,128], index: 10, kind: input, shape index: {}]   ;;  %s4950_s11 = inlined_call_operand.hbm [shape: f32[128,128], index: 11, kind: input, shape index: {}]   ;;  %s4951_s12 = inlined_call_operand.vmem [shape: f32[1,128], index: 12, kind: input, shape index: {}]   ;;  %s4952_s13 = inlined_call_operand.hbm [shape: f32[32,128], index: 13, kind: output, shape index: {}]  }
   0x1   :  { %19 = vsyncpa [#allocation6], 0 }
   0x2   :  { %20 = vsyncpa [#allocation9], 0 }
   0x3   :  { %21 = vsyncpa [#allocation12], 0 }
   0x4   :  { %22 = vsyncpa [#allocation4], 0  ;;  %s3327_s25 = smov [#allocation5]   ;;  %s3328_s27 = smov [#allocation8]  }
   0x5   :  { %s40_s26 = sshll.u32 %s3327_s25, 4  ;;  %s74_s28 = sshll.u32 %s3328_s27, 4  ;;  %s41_s26 = int_to_ptr.vmem [resolvable:$true] %s40_s26  ;;  %s3418_s28 = int_to_ptr.vmem [resolvable:$true] %s74_s28 }
   0x6   :  { %s3163_s14 = scalar_lea.hbm %s4940_s1, 2048 }
   0x7   :  { %p3164_p0 = scmp.ne.s32.totalorder %s4940_s1, %s3163_s14  ;;  %p3167_p1 = scmp.lt.u32.totalorder %s3163_s14, %s4940_s1 }
   0x9   :  { %p3169_p2 = pnand %p3167_p1, %p3164_p0 }
   0xb   :  { %3172 = shalt.err (!%p3169_p2)
}
   0xc   :  { %s3173_s19 = scalar_lea.vmem %s41_s26, 2048  ;;  %p3178_p4 = scmp.lt.s32.totalorder %s41_s26, %s41_s26 }
   0xd   :  { %p3174_p3 = scmp.ne.s32.totalorder %s41_s26, %s3173_s19  ;;  %p3179_p5 = scmp.lt.s32.totalorder %s3173_s19, %s3173_s19 }
   0xf   :  { %p3180_p6 = por %p3179_p5, %p3178_p4 }
  0x11   :  { %p3181_p7 = pnand %p3180_p6, %p3174_p3 }
  0x13   :  { %3184 = shalt.err (!%p3181_p7)
}
  0x14   :  { %s3329_s20 = smov 128   ;;  %s3330_s21 = smov 8  }
  0x15   :  { %46 = dma.hbm_to_vmem [thread:$0]  %s4940_s1, 2048, %s41_s26, [#allocation6], %s3329_s20, %s3329_s20, %s3330_s21  }
  0x16   :  { %s3185_s27 = scalar_lea.hbm %s4947_s8, 6144 }
  0x17   :  { %p3186_p8 = scmp.ne.s32.totalorder %s4947_s8, %s3185_s27  ;;  %p3189_p9 = scmp.lt.u32.totalorder %s3185_s27, %s4947_s8 }
  0x19   :  { %p3191_p10 = pnand %p3189_p9, %p3186_p8 }
  0x1b   :  { %3194 = shalt.err (!%p3191_p10)
}
  0x1c   :  { %s3195_s16 = scalar_lea.vmem %s3418_s28, 6144  ;;  %p3200_p12 = scmp.lt.s32.totalorder %s3418_s28, %s3418_s28 }
  0x1d   :  { %p3196_p11 = scmp.ne.s32.totalorder %s3418_s28, %s3195_s16  ;;  %p3201_p13 = scmp.lt.s32.totalorder %s3195_s16, %s3195_s16 }
  0x1f   :  { %p3202_p0 = por %p3201_p13, %p3200_p12 }
  0x21   :  { %p3203_p1 = pnand %p3202_p0, %p3196_p11 }
  0x23   :  { %3206 = shalt.err (!%p3203_p1)
}
  0x24   :  { %s3331_s1 = smov 384   ;;  %s3332_s26 = smov 24  }
  0x25   :  { %80 = dma.hbm_to_vmem [thread:$0]  %s4947_s8, 6144, %s3418_s28, [#allocation9], %s3331_s1, %s3331_s1, %s3332_s26  }
  0x26   :  { %s3333_s19 = smov [#allocation2]   ;;  %s3334_s23 = smov [#allocation7]  }
  0x27   :  { %s28_s22 = sshll.u32 %s3333_s19, 4  ;;  %s62_s24 = sshll.u32 %s3334_s23, 4  ;;  %s29_s22 = int_to_ptr.vmem [resolvable:$true] %s28_s22  ;;  %s3452_s24 = int_to_ptr.vmem [resolvable:$true] %s62_s24 }
  0x28   :  { %s3207_s29 = scalar_lea.hbm %s4939_s0, 512 }
  0x29   :  { %p3208_p2 = scmp.ne.s32.totalorder %s4939_s0, %s3207_s29  ;;  %p3211_p3 = scmp.lt.u32.totalorder %s3207_s29, %s4939_s0 }
  0x2b   :  { %p3213_p4 = pnand %p3211_p3, %p3208_p2 }
  0x2d   :  { %3216 = shalt.err (!%p3213_p4)
}
  0x2e   :  { %s3217_s8 = scalar_lea.vmem %s29_s22, 512  ;;  %p3222_p6 = scmp.lt.s32.totalorder %s29_s22, %s29_s22 }
  0x2f   :  { %p3218_p5 = scmp.ne.s32.totalorder %s29_s22, %s3217_s8  ;;  %p3223_p7 = scmp.lt.s32.totalorder %s3217_s8, %s3217_s8 }
  0x31   :  { %p3224_p8 = por %p3223_p7, %p3222_p6 }
  0x33   :  { %p3225_p9 = pnand %p3224_p8, %p3218_p5 }
  0x35   :  { %3228 = shalt.err (!%p3225_p9)
}
  0x36   :  { %34 = dma.hbm_to_vmem [thread:$0]  %s4939_s0, 512, %s29_s22, [#allocation3], %s3329_s20, %s3329_s20, %s3330_s21  }
  0x37   :  { %s3229_s18 = scalar_lea.hbm %s4946_s7, 10240 }
  0x38   :  { %p3230_p10 = scmp.ne.s32.totalorder %s4946_s7, %s3229_s18  ;;  %p3233_p11 = scmp.lt.u32.totalorder %s3229_s18, %s4946_s7 }
  0x3a   :  { %p3235_p12 = pnand %p3233_p11, %p3230_p10 }
  0x3c   :  { %3238 = shalt.err (!%p3235_p12)
}
  0x3d   :  { %s3239_s29 = scalar_lea.vmem %s3452_s24, 10240  ;;  %p3244_p0 = scmp.lt.s32.totalorder %s3452_s24, %s3452_s24 }
  0x3e   :  { %p3240_p13 = scmp.ne.s32.totalorder %s3452_s24, %s3239_s29  ;;  %p3245_p1 = scmp.lt.s32.totalorder %s3239_s29, %s3239_s29 }
  0x40   :  { %p3246_p2 = por %p3245_p1, %p3244_p0 }
  0x42   :  { %p3247_p3 = pnand %p3246_p2, %p3240_p13 }
  0x44   :  { %3250 = shalt.err (!%p3247_p3)
}
  0x45   :  { %s3335_s0 = smov 640   ;;  %s3336_s22 = smov 40  }
  0x46   :  { %68 = dma.hbm_to_vmem [thread:$0]  %s4946_s7, 10240, %s3452_s24, [#allocation6], %s3335_s0, %s3335_s0, %s3336_s22  }
  0x47   :  { %s3337_s15 = smov [#allocation10]   ;;  %s3338_s8 = smov [#allocation11]  }
  0x48   :  { %s86_s16 = sshll.u32 %s3337_s15, 4  ;;  %s100_s28 = sshll.u32 %s3338_s8, 4  ;;  %s87_s16 = int_to_ptr.vmem [resolvable:$true] %s86_s16  ;;  %s3486_s28 = int_to_ptr.vmem [resolvable:$true] %s100_s28 }
  0x49   :  { %s3251_s17 = scalar_lea.hbm %s4948_s9, 640 }
  0x4a   :  { %p3252_p4 = scmp.ne.s32.totalorder %s4948_s9, %s3251_s17  ;;  %p3255_p5 = scmp.lt.u32.totalorder %s3251_s17, %s4948_s9 }
  0x4c   :  { %p3257_p6 = pnand %p3255_p5, %p3252_p4 }
  0x4e   :  { %3260 = shalt.err (!%p3257_p6)
}
  0x4f   :  { %s3261_s7 = scalar_lea.vmem %s87_s16, 640  ;;  %p3266_p8 = scmp.lt.s32.totalorder %s87_s16, %s87_s16 }
  0x50   :  { %p3262_p7 = scmp.ne.s32.totalorder %s87_s16, %s3261_s7  ;;  %p3267_p9 = scmp.lt.s32.totalorder %s3261_s7, %s3261_s7 }
  0x52   :  { %p3268_p10 = por %p3267_p9, %p3266_p8 }
  0x54   :  { %p3269_p11 = pnand %p3268_p10, %p3262_p7 }
  0x56   :  { %3272 = shalt.err (!%p3269_p11)
}
  0x57   :  { %92 = dma.hbm_to_vmem [thread:$0]  %s4948_s9, 640, %s87_s16, [#allocation9], %s3329_s20, %s3329_s20, %s3330_s21  }
  0x58   :  { %s3273_s22 = scalar_lea.hbm %s4950_s11, 2048 }
  0x59   :  { %p3274_p12 = scmp.ne.s32.totalorder %s4950_s11, %s3273_s22  ;;  %p3277_p13 = scmp.lt.u32.totalorder %s3273_s22, %s4950_s11 }
  0x5b   :  { %p3279_p0 = pnand %p3277_p13, %p3274_p12 }
  0x5d   :  { %3282 = shalt.err (!%p3279_p0)
}
  0x5e   :  { %s3283_s1 = scalar_lea.vmem %s3486_s28, 2048  ;;  %p3288_p2 = scmp.lt.s32.totalorder %s3486_s28, %s3486_s28 }
  0x5f   :  { %p3284_p1 = scmp.ne.s32.totalorder %s3486_s28, %s3283_s1  ;;  %p3289_p3 = scmp.lt.s32.totalorder %s3283_s1, %s3283_s1 }
  0x61   :  { %p3290_p4 = por %p3289_p3, %p3288_p2 }
  0x63   :  { %p3291_p5 = pnand %p3290_p4, %p3284_p1 }
  0x65   :  { %3294 = shalt.err (!%p3291_p5)
}
  0x66   :  { %106 = dma.hbm_to_vmem [thread:$0]  %s4950_s11, 2048, %s3486_s28, [#allocation12], %s3329_s20, %s3329_s20, %s3330_s21  }
  0x67   :  { %3317 = dma.done.wait [#allocation3], 512  }
  0x68   :  { %3318 = vsyncadd [#allocation3], 4294966784 }
  0x69   :  { %3319 = dma.done.wait [#allocation6], 12288  }
  0x6a   :  { %3320 = vsyncadd [#allocation6], 4294955008 }
  0x6b   :  { %3321 = dma.done.wait [#allocation9], 6784  }
  0x6c   :  { %3322 = vsyncadd [#allocation9], 4294960512 }
  0x6d   :  { %3323 = dma.done.wait [#allocation12], 2048  }
  0x6e   :  { %3324 = vsyncadd [#allocation12], 4294965248  ;;  %v131_v0 = vld [vmem:[#allocation5] sm:$0xff]  ;;  %v132_v1 = vld [vmem:[#allocation5 + $0x8] sm:$0xff]  ;;  %vm375_vm4 = vcmask 1040384   ;;  %s3340_s26 = smov 16  }
  0x6f   :  { %v133_v2 = vld [vmem:[#allocation5 + $0x10] sm:$0xff]  ;;  %v3523_v3 = vpack.c.bf16 %v132_v1, %v131_v0  ;;  %v134_v4 = vld [vmem:[#allocation5 + $0x18] sm:$0xff]  ;;  %v135_v6 = vld [vmem:[#allocation5 + $0x20] sm:$0xff]  ;;  %s3341_s17 = smov 32   ;;  %s3342_s18 = smov 64  }
  0x70   :  { %v3525_v5 = vpack.c.bf16 %v134_v4, %v133_v2  ;;  %v136_v7 = vld [vmem:[#allocation5 + $0x28] sm:$0xff]  ;;  %v127_v9 = vld [vmem:[#allocation2] sm:$0xff]  ;;  %v137_v10 = vld [vmem:[#allocation5 + $0x30] sm:$0xff]  ;;  %s3343_s24 = smov 1   ;;  %s3344_s27 = smov 2  }
  0x71   :  { %2858 = vmatprep.subr.bf16.mxu0 %v3523_v3  ;;  %v3530_v8 = vpack.c.bf16 %v136_v7, %v135_v6  ;;  %v138_v11 = vld [vmem:[#allocation5 + $0x38] sm:$0xff]  ;;  %2699 = vmatprep.mubr.f32.mxu0 %v127_v9  ;;  %v139_v13 = vld [vmem:[#allocation5 + $0x40] sm:$0xff]  ;;  %v140_v14 = vld [vmem:[#allocation5 + $0x48] sm:$0xff]  ;;  %s3347_s0 = smov [#allocation13]  }
  0x72   :  { %2860 = vmatpush3.bf16.msra.mxu0 %v3523_v3  ;;  %v3534_v12 = vpack.c.bf16 %v138_v11, %v137_v10  ;;  %v3538_v15 = vpack.c.bf16 %v140_v14, %v139_v13  ;;  %v141_v16 = vld [vmem:[#allocation5 + $0x50] sm:$0xff]  ;;  %v142_v17 = vld [vmem:[#allocation5 + $0x58] sm:$0xff]  ;;  %v143_v19 = vld [vmem:[#allocation5 + $0x60] sm:$0xff]  ;;  %s2479_s22 = sshll.u32 %s3347_s0, 4  ;;  %s2480_s22 = int_to_ptr.vmem [resolvable:$true] %s2479_s22 }
  0x73   :  { %2862 = vmatprep.subr.bf16.mxu0 %v3525_v5  ;;  %v3542_v18 = vpack.c.bf16 %v142_v17, %v141_v16  ;;  %v144_v20 = vld [vmem:[#allocation5 + $0x68] sm:$0xff]  ;;  %v145_v22 = vld [vmem:[#allocation5 + $0x70] sm:$0xff]  ;;  %v146_v23 = vld [vmem:[#allocation5 + $0x78] sm:$0xff]  ;;  %s3295_s30 = scalar_lea.vmem %s2480_s22, 512  ;;  %p3300_p7 = scmp.lt.s32.totalorder %s2480_s22, %s2480_s22 }
  0x74   :  { %v3546_v21 = vpack.c.bf16 %v144_v20, %v143_v19  ;;  %v3550_v24 = vpack.c.bf16 %v146_v23, %v145_v22  ;;  %v128_v25 = vld [vmem:[#allocation2 + $0x8] sm:$0xff]  ;;  %v129_v26 = vld [vmem:[#allocation2 + $0x10] sm:$0xff]  ;;  %v130_v27 = vld [vmem:[#allocation2 + $0x18] sm:$0xff]  ;;  %p3296_p6 = scmp.ne.s32.totalorder %s2480_s22, %s3295_s30  ;;  %p3301_p8 = scmp.lt.s32.totalorder %s3295_s30, %s3295_s30 }
  0x75   :  { %v2494_v28 = vld [vmem:[%s4941_s2] ss:$0 sm:$0xff] }
  0x76   :  { %2864 = vmatpush3.bf16.msra.mxu0 %v3525_v5  ;;  %p3302_p9 = por %p3301_p8, %p3300_p7 }
  0x77   :  { %2866 = vmatprep.subr.bf16.mxu0 %v3530_v8 }
  0x78   :  { %p3303_p10 = pnand %p3302_p9, %p3296_p6 }
  0x7a   :  { %2868 = vmatpush3.bf16.msra.mxu0 %v3530_v8 }
  0x7b   :  { %2870 = vmatprep.subr.bf16.mxu0 %v3534_v12 }
  0x7e   :  { %2872 = vmatpush3.bf16.msra.mxu0 %v3534_v12 }
  0x7f   :  { %2874 = vmatprep.subr.bf16.mxu0 %v3538_v15 }
  0x82   :  { %2876 = vmatpush3.bf16.msra.mxu0 %v3538_v15 }
  0x83   :  { %2878 = vmatprep.subr.bf16.mxu0 %v3542_v18 }
  0x86   :  { %2880 = vmatpush3.bf16.msra.mxu0 %v3542_v18 }
  0x87   :  { %2882 = vmatprep.subr.bf16.mxu0 %v3546_v21 }
  0x8a   :  { %2884 = vmatpush3.bf16.msra.mxu0 %v3546_v21 }
  0x8b   :  { %2886 = vmatprep.subr.bf16.mxu0 %v3550_v24 }
  0x8e   :  { %2888 = vmatpush3.bf16.msra.mxu0 %v3550_v24 }
  0x91   :  { %2700 = vmatmul.mubr.f32.vlgmr.msra.gmra.mrb[0].mxu0 %v128_v25 }
  0x92   :  { %2702 = vmatprep.mubr.f32.mxu0 %v129_v26 }
  0x95   :  { %2703 = vmatmul.mubr.f32.gmra.mrb[2].mxu0 %v130_v27 }
 0x164   :  { %v2701_v29 = vpop.f32.mrb[0].mxu0 }
 0x165   :  { %v3558_v30 = vadd.f32 %v2701_v29, %v2494_v28  ;;  %v220_v31 = vpop.f32.mrb[1].mxu0 }
 0x166   :  { %v3560_v32 = vadd.f32 %v2494_v28, %v220_v31 }
 0x167   :  { %v3563_v33 = vmul.f32 0.70710677, %v3558_v30 }
 0x168   :  { %v3566_v34 = vmul.f32 0.70710677, %v3560_v32  ;;  %v2704_v35 = vpop.f32.mrb[2].mxu0 }
 0x169   :  { %v256_v36 = vand.u32 2147483647, %v3563_v33  ;;  %v3569_v37 = vadd.f32 %v2704_v35, %v2494_v28  ;;  %v230_v38 = vpop.f32.mrb[3].mxu0  ;;  %vm248_vm0 = vcmp.ge.f32.partialorder %v3563_v33, 0.0 }
 0x16a   :  { %v255_v39 = vand.u32 2147483647, %v3566_v34  ;;  %v3572_v40 = vadd.f32 %v2494_v28, %v230_v38  ;;  %vm247_vm1 = vcmp.ge.f32.partialorder %v3566_v34, 0.0 }
 0x16b   :  { %v260_v41 = vmul.f32 0.3275911, %v256_v36  ;;  %v3575_v43 = vmul.f32 0.70710677, %v3569_v37  ;;  %v312_v52 = vsub.f32 0.0, %v256_v36 }
 0x16c   :  { %v259_v42 = vmul.f32 0.3275911, %v255_v39  ;;  %v3578_v45 = vmul.f32 0.70710677, %v3572_v40  ;;  %v311_v54 = vsub.f32 0.0, %v255_v39 }
 0x16d   :  { %v264_v44 = vadd.f32 1.0, %v260_v41  ;;  %v258_v47 = vand.u32 2147483647, %v3575_v43  ;;  %v316_v56 = vmul.f32 %v312_v52, %v256_v36  ;;  %vm250_vm2 = vcmp.ge.f32.partialorder %v3575_v43, 0.0 }
 0x16e   :  { %v263_v46 = vadd.f32 1.0, %v259_v42  ;;  %v257_v49 = vand.u32 2147483647, %v3578_v45  ;;  %v315_v59 = vmul.f32 %v311_v54, %v255_v39  ;;  %vm249_vm3 = vcmp.ge.f32.partialorder %v3578_v45, 0.0 }
 0x16f   :  { %3134 = vrcp.f32 %v264_v44  ;;  %v262_v48 = vmul.f32 0.3275911, %v258_v47  ;;  %v314_v60 = vsub.f32 0.0, %v258_v47  ;;  %v321_v63 = vmul.f32 1.442695, %v316_v56 }
 0x170   :  { %3136 = vrcp.f32 %v263_v46  ;;  %v261_v51 = vmul.f32 0.3275911, %v257_v49  ;;  %v313_v1 = vsub.f32 0.0, %v257_v49  ;;  %v319_v6 = vmul.f32 1.442695, %v315_v59 }
 0x171   :  { %v266_v50 = vadd.f32 1.0, %v262_v48  ;;  %v318_v7 = vmul.f32 %v314_v60, %v258_v47  ;;  %v241_v45 = vmul.f32 0.5, %v3572_v40 }
 0x172   :  { %v265_v53 = vadd.f32 1.0, %v261_v51  ;;  %v317_v17 = vmul.f32 %v313_v1, %v257_v49 }
 0x173   :  { %3138 = vrcp.f32 %v266_v50  ;;  %v325_v20 = vmul.f32 1.442695, %v318_v7  ;;  %v240_v7 = vmul.f32 0.5, %v3558_v30 }
 0x174   :  { %3140 = vrcp.f32 %v265_v53  ;;  %v323_v31 = vmul.f32 1.442695, %v317_v17 }
 0x175   :  { %3142 = vpow2.f32 %v321_v63 }
 0x176   :  { %3144 = vpow2.f32 %v319_v6 }
 0x177   :  { %3146 = vpow2.f32 %v325_v20 }
 0x178   :  { %3148 = vpow2.f32 %v323_v31 }
 0x179   :  { %v3135_v55 = vpop.eup %3134 }
 0x17a   :  { %v3137_v57 = vpop.eup %3136  ;;  %v276_v58 = vmul.f32 1.0614054, %v3135_v55 }
 0x17b   :  { %v275_v61 = vmul.f32 1.0614054, %v3137_v57 }
 0x17c   :  { %v280_v62 = vadd.f32 -1.4531521, %v276_v58 }
 0x17d   :  { %v279_v0 = vadd.f32 -1.4531521, %v275_v61  ;;  %v3139_v2 = vpop.eup %3138  ;;  %v3339_v61 = vmov -1.0  }
 0x17e   :  { %v284_v4 = vmul.f32 %v3135_v55, %v280_v62  ;;  %v278_v10 = vmul.f32 1.0614054, %v3139_v2  ;;  %v3141_v13 = vpop.eup %3140  ;;  %v252_v62 = vsel %vm248_vm0, 1.0, %v3339_v61 }
 0x17f   :  { %v283_v9 = vmul.f32 %v3137_v57, %v279_v0  ;;  %v277_v22 = vmul.f32 1.0614054, %v3141_v13  ;;  %v3143_v49 = vpop.eup %3142 }
 0x180   :  { %v288_v11 = vadd.f32 1.4214138, %v284_v4  ;;  %v282_v16 = vadd.f32 -1.4531521, %v278_v10  ;;  %v3145_v52 = vpop.eup %3144  ;;  %v251_v4 = vsel %vm247_vm1, 1.0, %v3339_v61 }
 0x181   :  { %v287_v14 = vadd.f32 1.4214138, %v283_v9  ;;  %v281_v27 = vadd.f32 -1.4531521, %v277_v22 }
 0x182   :  { %v292_v19 = vmul.f32 %v3135_v55, %v288_v11  ;;  %v286_v25 = vmul.f32 %v3139_v2, %v282_v16  ;;  %v239_v11 = vmul.f32 0.5, %v3560_v32  ;;  %v253_v32 = vsel %vm249_vm3, 1.0, %v3339_v61 }
 0x183   :  { %v291_v23 = vmul.f32 %v3137_v57, %v287_v14  ;;  %v285_v36 = vmul.f32 %v3141_v13, %v281_v27 }
 0x184   :  { %v296_v26 = vadd.f32 -0.28449672, %v292_v19  ;;  %v290_v29 = vadd.f32 1.4214138, %v286_v25  ;;  %v242_v25 = vmul.f32 0.5, %v3569_v37 }
 0x185   :  { %v295_v28 = vadd.f32 -0.28449672, %v291_v23  ;;  %v289_v42 = vadd.f32 1.4214138, %v285_v36 }
 0x186   :  { %v300_v35 = vmul.f32 %v3135_v55, %v296_v26  ;;  %v294_v39 = vmul.f32 %v3139_v2, %v290_v29 }
 0x187   :  { %v299_v38 = vmul.f32 %v3137_v57, %v295_v28  ;;  %v293_v48 = vmul.f32 %v3141_v13, %v289_v42 }
 0x188   :  { %v304_v41 = vadd.f32 0.2548296, %v300_v35  ;;  %v298_v46 = vadd.f32 -0.28449672, %v294_v39 }
 0x189   :  { %v303_v44 = vadd.f32 0.2548296, %v299_v38  ;;  %v297_v54 = vadd.f32 -0.28449672, %v293_v48 }
 0x18a   :  { %v308_v47 = vmul.f32 %v3135_v55, %v304_v41  ;;  %v302_v51 = vmul.f32 %v3139_v2, %v298_v46  ;;  %v3147_v55 = vpop.eup %3146 }
 0x18b   :  { %v307_v50 = vmul.f32 %v3137_v57, %v303_v44  ;;  %v301_v60 = vmul.f32 %v3141_v13, %v297_v54  ;;  %v3149_v10 = vpop.eup %3148 }
 0x18c   :  { %v328_v53 = vmul.f32 %v3143_v49, %v308_v47  ;;  %v306_v58 = vadd.f32 0.2548296, %v302_v51 }
 0x18d   :  { %v327_v56 = vmul.f32 %v3145_v52, %v307_v50  ;;  %v305_v57 = vadd.f32 0.2548296, %v301_v60 }
 0x18e   :  { %v332_v59 = vsub.f32 1.0, %v328_v53  ;;  %v310_v0 = vmul.f32 %v3139_v2, %v306_v58  ;;  %v254_v2 = vsel %vm250_vm2, 1.0, %v3339_v61 }
 0x18f   :  { %v331_v63 = vsub.f32 1.0, %v327_v56  ;;  %v309_v34 = vmul.f32 %v3141_v13, %v305_v57 }
 0x190   :  { %v336_v1 = vmul.f32 %v332_v59, %v252_v62  ;;  %v330_v33 = vmul.f32 %v3147_v55, %v310_v0 }
 0x191   :  { %v335_v6 = vmul.f32 %v331_v63, %v251_v4  ;;  %v329_v19 = vmul.f32 %v3149_v10, %v309_v34 }
 0x192   :  { %v340_v9 = vadd.f32 1.0, %v336_v1  ;;  %v334_v16 = vsub.f32 1.0, %v330_v33 }
 0x193   :  { %v339_v14 = vadd.f32 1.0, %v335_v6  ;;  %v333_v43 = vsub.f32 1.0, %v329_v19 }
 0x194   :  { %v3587_v17 = vmul.f32 %v340_v9, %v240_v7  ;;  %v338_v22 = vmul.f32 %v334_v16, %v254_v2 }
 0x195   :  { %v3590_v20 = vmul.f32 %v339_v14, %v239_v11  ;;  %v337_v26 = vmul.f32 %v333_v43, %v253_v32  ;;  %v2499_v32 = vld [vmem:[%s4942_s3 + $0x1] ss:$0 sm:$0xff] }
 0x196   :  { %v342_v23 = vadd.f32 1.0, %v338_v22  ;;  %v2495_v22 = vld [vmem:[%s4942_s3] ss:$0 sm:$0xff]  ;;  %s3345_s3 = smov 4  }
 0x197   :  { %v347_v30 = vadd.f32 %v3587_v17, %v3590_v20  ;;  %v354_v13 = vmax.f32 %v3590_v20, %v3587_v17  ;;  %v341_v29 = vadd.f32 1.0, %v337_v26 }
 0x198   :  { %v3597_v28 = vmul.f32 %v342_v23, %v242_v25 }
 0x199   :  { %v348_v27 = vrot.slane %v347_v30, 4  ;;  %v355_v31 = vrot.slane %v354_v13, 4  ;;  %v3600_v36 = vmul.f32 %v341_v29, %v241_v45 }
 0x19b   :  { %v349_v35 = vadd.f32 %v348_v27, %v347_v30  ;;  %v361_v38 = vadd.f32 %v3597_v28, %v3600_v36  ;;  %v368_v39 = vmax.f32 %v3600_v36, %v3597_v28  ;;  %v356_v42 = vmax.f32 %v354_v13, %v355_v31 }
 0x19d   :  { %v350_v41 = vrot.slane %v349_v35, 2  ;;  %v362_v37 = vrot.slane %v361_v38, 4  ;;  %v369_v44 = vrot.slane %v368_v39, 4  ;;  %v357_v48 = vrot.slane %v356_v42, 2 }
 0x19f   :  { %v351_v46 = vadd.f32 %v350_v41, %v349_v35  ;;  %v363_v47 = vadd.f32 %v362_v37, %v361_v38  ;;  %v370_v49 = vmax.f32 %v368_v39, %v369_v44  ;;  %v358_v53 = vmax.f32 %v356_v42, %v357_v48 }
 0x1a1   :  { %v364_v40 = vrot.slane %v363_v47, 2  ;;  %v371_v50 = vrot.slane %v370_v49, 2  ;;  %v352_v51 = vrot.slane %v351_v46, 1  ;;  %v359_v61 = vrot.slane %v358_v53, 1 }
 0x1a3   :  { %v365_v52 = vadd.f32 %v364_v40, %v363_v47  ;;  %v372_v54 = vmax.f32 %v370_v49, %v371_v50  ;;  %v353_v59 = vadd.f32 %v352_v51, %v351_v46  ;;  %v360_v0 = vmax.f32 %v358_v53, %v359_v61  ;;  %v525_v49 = vld [vmem:[#allocation7 + $0x8] sm:$0xff]  ;;  %v530_v40 = vld [vmem:[#allocation7 + $0x30] sm:$0xff]  ;;  %v531_v61 = vld [vmem:[#allocation7 + $0x38] sm:$0xff] }
 0x1a4   :  { %v2889_v51 = vpack.c.bf16 %v530_v40, %v525_v49  ;;  %v529_v53 = vld [vmem:[#allocation7 + $0x28] sm:$0xff] }
 0x1a5   :  { %v366_v56 = vrot.slane %v365_v52, 1  ;;  %v373_v58 = vrot.slane %v372_v54, 1  ;;  %v565_v40 = vld [vmem:[#allocation7 + $0x148] sm:$0xff] }
 0x1a6   :  { %2890 = vmatprep.subr.bf16.mxu1 %v2889_v51  ;;  %v570_v51 = vld [vmem:[#allocation7 + $0x170] sm:$0xff] }
 0x1a7   :  { %v367_v60 = vadd.f32 %v366_v56, %v365_v52  ;;  %v374_v63 = vmax.f32 %v372_v54, %v373_v58  ;;  %v524_v52 = vld [vmem:[#allocation7] sm:$0xff]  ;;  %v527_v54 = vld [vmem:[#allocation7 + $0x18] sm:$0xff] }
 0x1a8   :  { %v2891_v58 = vpack.c.bf16 %v529_v53, %v524_v52  ;;  %v2905_v52 = vpack.c.bf16 %v570_v51, %v565_v40  ;;  %v564_v53 = vld [vmem:[#allocation7 + $0x140] sm:$0xff]  ;;  %v533_v40 = vld [vmem:[#allocation7 + $0x48] sm:$0xff] }
 0x1a9   :  { %v376_v62 = vsel %vm375_vm4, %v353_v59, %v367_v60  ;;  %v377_v55 = vsel %vm375_vm4, %v360_v0, %v374_v63  ;;  %v532_v59 = vld [vmem:[#allocation7 + $0x40] sm:$0xff]  ;;  %v526_v60 = vld [vmem:[#allocation7 + $0x10] sm:$0xff] }
 0x1aa   :  { %378 = vrot.lane.b32.xlu0 %v376_v62, %s3330_s21  ;;  %v2921_v63 = vpack.c.bf16 %v532_v59, %v527_v54  ;;  %v2923_v0 = vpack.c.bf16 %v531_v61, %v526_v60  ;;  %2892 = vmatpush1.bf16.msra.mxu1 %v2891_v58  ;;  %v569_v54 = vld [vmem:[#allocation7 + $0x168] sm:$0xff]  ;;  %v572_v59 = vld [vmem:[#allocation7 + $0x180] sm:$0xff]  ;;  %v566_v60 = vld [vmem:[#allocation7 + $0x150] sm:$0xff] }
 0x1ab   :  { %v2907_v58 = vpack.c.bf16 %v569_v54, %v564_v53  ;;  %v571_v61 = vld [vmem:[#allocation7 + $0x178] sm:$0xff]  ;;  %v2496_v54 = vld [vmem:[%s4943_s4] ss:$0 sm:$0xff] }
 0x1ac   :  { %2922 = vmatprep.subr.bf16.mxu0 %v2921_v63 }
 0x1ad   :  { %2924 = vmatpush1.bf16.msra.mxu0 %v2923_v0  ;;  %v2939_v0 = vpack.c.bf16 %v571_v61, %v566_v60 }
 0x1ae   :  { %391 = vrot.lane.b32.xlu0 %v377_v55, %s3330_s21 }
 0x21c   :  { %v379_v1 = vpop.permute.xlu0 %378 }
 0x21d   :  { %v380_v4 = vadd.f32 %v379_v1, %v376_v62  ;;  %v540_v1 = vld [vmem:[#allocation7 + $0x80] sm:$0xff] }
 0x21f   :  { %381 = vrot.lane.b32.xlu1 %v380_v4, %s3340_s26 }
 0x220   :  { %v392_v57 = vpop.permute.xlu0 %391 }
 0x221   :  { %v393_v6 = vmax.f32 %v377_v55, %v392_v57  ;;  %v535_v55 = vld [vmem:[#allocation7 + $0x58] sm:$0xff]  ;;  %v534_v57 = vld [vmem:[#allocation7 + $0x50] sm:$0xff] }
 0x223   :  { %394 = vrot.lane.b32.xlu1 %v393_v6, %s3340_s26 }
 0x291   :  { %v382_v33 = vpop.permute.xlu1 %381 }
 0x292   :  { %v383_v7 = vadd.f32 %v382_v33, %v380_v4  ;;  %v2893_v4 = vpack.c.bf16 %v540_v1, %v535_v55  ;;  %v537_v33 = vld [vmem:[#allocation7 + $0x68] sm:$0xff]  ;;  %v575_v55 = vld [vmem:[#allocation7 + $0x198] sm:$0xff]  ;;  %v580_v1 = vld [vmem:[#allocation7 + $0x1c0] sm:$0xff] }
 0x294   :  { %384 = vrot.lane.b32.xlu0 %v383_v7, %s3341_s17  ;;  %2894 = vmatprep.subr.bf16.mxu1 %v2893_v4  ;;  %v574_v4 = vld [vmem:[#allocation7 + $0x190] sm:$0xff] }
 0x295   :  { %v395_v9 = vpop.permute.xlu1 %394 }
 0x296   :  { %v396_v34 = vmax.f32 %v393_v6, %v395_v9  ;;  %v539_v6 = vld [vmem:[#allocation7 + $0x78] sm:$0xff]  ;;  %v542_v9 = vld [vmem:[#allocation7 + $0x90] sm:$0xff] }
 0x298   :  { %397 = vrot.lane.b32.xlu1 %v396_v34, %s3341_s17 }
 0x306   :  { %v385_v10 = vpop.permute.xlu0 %384 }
 0x307   :  { %v386_v11 = vadd.f32 %v385_v10, %v383_v7  ;;  %v2895_v7 = vpack.c.bf16 %v539_v6, %v534_v57  ;;  %v541_v10 = vld [vmem:[#allocation7 + $0x88] sm:$0xff]  ;;  %v2909_v57 = vpack.c.bf16 %v580_v1, %v575_v55  ;;  %v579_v6 = vld [vmem:[#allocation7 + $0x1b8] sm:$0xff] }
 0x309   :  { %387 = vrot.lane.b32.xlu0 %v386_v11, %s3342_s18  ;;  %2896 = vmatpush1.bf16.msra.mxu1 %v2895_v7  ;;  %v582_v7 = vld [vmem:[#allocation7 + $0x1d0] sm:$0xff] }
 0x30a   :  { %v398_v14 = vpop.permute.xlu1 %397 }
 0x30b   :  { %v399_v16 = vmax.f32 %v396_v34, %v398_v14  ;;  %v536_v34 = vld [vmem:[#allocation7 + $0x60] sm:$0xff] }
 0x30c   :  { %v2927_v14 = vpack.c.bf16 %v541_v10, %v536_v34  ;;  %v2911_v34 = vpack.c.bf16 %v579_v6, %v574_v4 }
 0x30d   :  { %400 = vrot.lane.b32.xlu1 %v399_v16, %s3342_s18 }
 0x37b   :  { %v388_v2 = vpop.permute.xlu0 %387 }
 0x37c   :  { %v389_v19 = vadd.f32 %v388_v2, %v386_v11  ;;  %v2925_v11 = vpack.c.bf16 %v542_v9, %v537_v33  ;;  %v550_v2 = vld [vmem:[#allocation7 + $0xd0] sm:$0xff]  ;;  %v577_v33 = vld [vmem:[#allocation7 + $0x1a8] sm:$0xff]  ;;  %v4953_v9 = vmov 0.0  }
 0x37d   :  { %668 = vmatprep.mubr.f32.mxu1 %v4953_v9  ;;  %v2941_v10 = vpack.c.bf16 %v582_v7, %v577_v33  ;;  %757 = vmatprep.mubr.f32.mxu0 %v4953_v9 }
 0x37e   :  { %v390_v43 = vmul.f32 0.00390625, %v389_v19  ;;  %2926 = vmatprep.subr.bf16.mxu0 %v2925_v11  ;;  %v576_v11 = vld [vmem:[#allocation7 + $0x1a0] sm:$0xff] }
 0x37f   :  { %v401_v30 = vpop.permute.xlu1 %400  ;;  %2928 = vmatpush1.bf16.msra.mxu0 %v2927_v14  ;;  %v581_v14 = vld [vmem:[#allocation7 + $0x1c8] sm:$0xff] }
 0x380   :  { %v409_v13 = vmul.f32 %v2495_v22, %v390_v43  ;;  %v402_v23 = vmax.f32 %v399_v16, %v401_v30  ;;  %v444_v26 = vmul.f32 %v2499_v32, %v390_v43  ;;  %v545_v16 = vld [vmem:[#allocation7 + $0xa8] sm:$0xff]  ;;  %v547_v30 = vld [vmem:[#allocation7 + $0xb8] sm:$0xff] }
 0x381   :  { %v2897_v19 = vpack.c.bf16 %v550_v2, %v545_v16  ;;  %v549_v43 = vld [vmem:[#allocation7 + $0xc8] sm:$0xff]  ;;  %v2943_v2 = vpack.c.bf16 %v581_v14, %v576_v11 }
 0x382   :  { %v474_v25 = vmul.f32 %v2495_v22, %v402_v23  ;;  %410 = vrot.lane.b32.xlu0 %v409_v13, %s3343_s24  ;;  %v488_v27 = vmul.f32 %v2499_v32, %v402_v23  ;;  %v544_v22 = vld [vmem:[#allocation7 + $0xa0] sm:$0xff]  ;;  %v546_v32 = vld [vmem:[#allocation7 + $0xb0] sm:$0xff]  ;;  %v585_v16 = vld [vmem:[#allocation7 + $0x1e8] sm:$0xff] }
 0x383   :  { %v552_v23 = vld [vmem:[#allocation7 + $0xe0] sm:$0xff]  ;;  %2898 = vmatprep.subr.bf16.mxu1 %v2897_v19  ;;  %v590_v19 = vld [vmem:[#allocation7 + $0x210] sm:$0xff] }
 0x384   :  { %475 = vrot.lane.b32.xlu1 %v474_v25, %s3343_s24 }
 0x386   :  { %445 = vrot.lane.b32.xlu0 %v444_v26, %s3343_s24 }
 0x388   :  { %489 = vrot.lane.b32.xlu1 %v488_v27, %s3343_s24 }
 0x3f4   :  { %v411_v45 = vpop.permute.xlu0 %410 }
 0x3f5   :  { %v412_v29 = vadd.f32 %v411_v45, %v409_v13  ;;  %v2899_v13 = vpack.c.bf16 %v549_v43, %v544_v22  ;;  %v555_v45 = vld [vmem:[#allocation7 + $0xf8] sm:$0xff]  ;;  %v584_v22 = vld [vmem:[#allocation7 + $0x1e0] sm:$0xff]  ;;  %v589_v43 = vld [vmem:[#allocation7 + $0x208] sm:$0xff] }
 0x3f6   :  { %v476_v31 = vpop.permute.xlu1 %475 }
 0x3f7   :  { %v477_v35 = vadd.f32 %v476_v31, %v474_v25  ;;  %413 = vrot.lane.b32.xlu0 %v412_v29, %s3344_s27  ;;  %v551_v25 = vld [vmem:[#allocation7 + $0xd8] sm:$0xff]  ;;  %2900 = vmatpush1.bf16.msra.mxu1 %v2899_v13 }
 0x3f8   :  { %v446_v38 = vpop.permute.xlu0 %445  ;;  %v587_v13 = vld [vmem:[#allocation7 + $0x1f8] sm:$0xff] }
 0x3f9   :  { %v447_v39 = vadd.f32 %v446_v38, %v444_v26  ;;  %478 = vrot.lane.b32.xlu1 %v477_v35, %s3344_s27  ;;  %v2929_v26 = vpack.c.bf16 %v552_v23, %v547_v30  ;;  %v559_v38 = vld [vmem:[#allocation7 + $0x118] sm:$0xff]  ;;  %v2913_v30 = vpack.c.bf16 %v590_v19, %v585_v16  ;;  %v592_v23 = vld [vmem:[#allocation7 + $0x220] sm:$0xff] }
 0x3fa   :  { %v490_v41 = vpop.permute.xlu1 %489 }
 0x3fb   :  { %v491_v42 = vadd.f32 %v490_v41, %v488_v27  ;;  %448 = vrot.lane.b32.xlu0 %v447_v39, %s3344_s27  ;;  %v2931_v27 = vpack.c.bf16 %v551_v25, %v546_v32  ;;  %2930 = vmatprep.subr.bf16.mxu0 %v2929_v26  ;;  %v586_v32 = vld [vmem:[#allocation7 + $0x1f0] sm:$0xff]  ;;  %v2915_v25 = vpack.c.bf16 %v589_v43, %v584_v22 }
 0x3fc   :  { %v2945_v26 = vpack.c.bf16 %v592_v23, %v587_v13 }
 0x3fd   :  { %492 = vrot.lane.b32.xlu1 %v491_v42, %s3344_s27  ;;  %2932 = vmatpush1.bf16.msra.mxu0 %v2931_v27  ;;  %v591_v27 = vld [vmem:[#allocation7 + $0x218] sm:$0xff] }
 0x469   :  { %v414_v37 = vpop.permute.xlu0 %413 }
 0x46a   :  { %v3614_v44 = vadd.f32 %v414_v37, %v412_v29  ;;  %v560_v29 = vld [vmem:[#allocation7 + $0x120] sm:$0xff] }
 0x46b   :  { %v479_v46 = vpop.permute.xlu1 %478  ;;  %v2901_v31 = vpack.c.bf16 %v560_v29, %v555_v45  ;;  %v556_v37 = vld [vmem:[#allocation7 + $0x100] sm:$0xff]  ;;  %v595_v45 = vld [vmem:[#allocation7 + $0x238] sm:$0xff] }
 0x46c   :  { %v3616_v47 = vadd.f32 %v479_v46, %v477_v35  ;;  %416 = vrot.lane.b32.xlu0 %v3614_v44, %s3345_s3  ;;  %v554_v35 = vld [vmem:[#allocation7 + $0xf0] sm:$0xff]  ;;  %v561_v46 = vld [vmem:[#allocation7 + $0x128] sm:$0xff]  ;;  %v600_v29 = vld [vmem:[#allocation7 + $0x260] sm:$0xff] }
 0x46d   :  { %v449_v48 = vpop.permute.xlu0 %448  ;;  %v2903_v41 = vpack.c.bf16 %v559_v38, %v554_v35  ;;  %2902 = vmatprep.subr.bf16.mxu1 %v2901_v31  ;;  %v2935_v49 = vpack.c.bf16 %v561_v46, %v556_v37  ;;  %v2917_v31 = vpack.c.bf16 %v600_v29, %v595_v45  ;;  %v594_v35 = vld [vmem:[#allocation7 + $0x230] sm:$0xff]  ;;  %v599_v38 = vld [vmem:[#allocation7 + $0x258] sm:$0xff]  ;;  %v596_v37 = vld [vmem:[#allocation7 + $0x240] sm:$0xff] }
 0x46e   :  { %v3619_v50 = vadd.f32 %v449_v48, %v447_v39  ;;  %481 = vrot.lane.b32.xlu1 %v3616_v47, %s3345_s3  ;;  %v557_v39 = vld [vmem:[#allocation7 + $0x108] sm:$0xff]  ;;  %v2919_v51 = vpack.c.bf16 %v599_v38, %v594_v35 }
 0x46f   :  { %v493_v56 = vpop.permute.xlu1 %492  ;;  %2904 = vmatpush1.bf16.msra.mxu1 %v2903_v41  ;;  %v2947_v41 = vpack.c.bf16 %v591_v27, %v586_v32 }
 0x470   :  { %v3622_v62 = vadd.f32 %v493_v56, %v491_v42  ;;  %451 = vrot.lane.b32.xlu0 %v3619_v50, %s3345_s3  ;;  %v562_v42 = vld [vmem:[#allocation7 + $0x130] sm:$0xff]  ;;  %v567_v56 = vld [vmem:[#allocation7 + $0x158] sm:$0xff]  ;;  %2906 = vmatprep.subr.bf16.mxu1 %v2905_v52 }
 0x471   :  { %v2933_v48 = vpack.c.bf16 %v562_v42, %v557_v39  ;;  %v2937_v63 = vpack.c.bf16 %v572_v59, %v567_v56  ;;  %v597_v39 = vld [vmem:[#allocation7 + $0x248] sm:$0xff]  ;;  %v602_v42 = vld [vmem:[#allocation7 + $0x270] sm:$0xff] }
 0x472   :  { %495 = vrot.lane.b32.xlu1 %v3622_v62, %s3345_s3  ;;  %v2949_v46 = vpack.c.bf16 %v602_v42, %v597_v39 }
 0x473   :  { %2934 = vmatprep.subr.bf16.mxu0 %v2933_v48  ;;  %2908 = vmatpush1.bf16.msra.mxu1 %v2907_v58  ;;  %v601_v48 = vld [vmem:[#allocation7 + $0x268] sm:$0xff] }
 0x474   :  { %2936 = vmatpush1.bf16.msra.mxu0 %v2935_v49  ;;  %2910 = vmatprep.subr.bf16.mxu1 %v2909_v57  ;;  %v528_v49 = vld [vmem:[#allocation7 + $0x20] sm:$0xff]  ;;  %v2951_v53 = vpack.c.bf16 %v601_v48, %v596_v37  ;;  %v538_v37 = vld [vmem:[#allocation7 + $0x70] sm:$0xff] }
 0x475   :  { %2938 = vmatprep.subr.bf16.mxu0 %v2937_v63  ;;  %v3628_v52 = vpack.c.bf16 %v533_v40, %v528_v49  ;;  %v2497_v63 = vld [vmem:[%s4944_s5] ss:$0 sm:$0xff] }
 0x477   :  { %2912 = vmatpush1.bf16.msra.mxu1 %v2911_v34 }
 0x478   :  { %2940 = vmatpush1.bf16.msra.mxu0 %v2939_v0  ;;  %2914 = vmatprep.subr.bf16.mxu1 %v2913_v30  ;;  %v2500_v0 = vld [vmem:[%s4943_s4 + $0x1] ss:$0 sm:$0xff] }
 0x479   :  { %2942 = vmatprep.subr.bf16.mxu0 %v2941_v10  ;;  %v2501_v10 = vld [vmem:[%s4944_s5 + $0x1] ss:$0 sm:$0xff] }
 0x47b   :  { %2916 = vmatpush1.bf16.msra.mxu1 %v2915_v25 }
 0x47c   :  { %2944 = vmatpush1.bf16.msra.mxu0 %v2943_v2  ;;  %2918 = vmatprep.subr.bf16.mxu1 %v2917_v31  ;;  %v509_v31 = vlaneseq }
 0x47d   :  { %2946 = vmatprep.subr.bf16.mxu0 %v2945_v26 }
 0x47e   :  { %v3650_v35 = vshrl.u32 %v509_v31, 7  ;;  %v1000_v31 = vld [vmem:[#allocation8 + $0x40] sm:$0xff] }
 0x47f   :  { %2920 = vmatpush1.bf16.msra.mxu1 %v2919_v51 }
 0x480   :  { %2948 = vmatpush1.bf16.msra.mxu0 %v2947_v41  ;;  %2954 = vmatprep.subr.bf16.mxu1 %v3628_v52  ;;  %v511_v39 = vsub.s32 0, %v3650_v35  ;;  %v517_v51 = vsub.s32 1, %v3650_v35  ;;  %vm872_vm5 = vcmp.lt.s32.totalorder %v3650_v35, 2  ;;  %vm905_vm6 = vcmp.lt.s32.totalorder %v3650_v35, 1 }
 0x481   :  { %2950 = vmatprep.subr.bf16.mxu0 %v2949_v46  ;;  %v543_v46 = vld [vmem:[#allocation7 + $0x98] sm:$0xff]  ;;  %vm938_vm7 = vcmp.lt.s32.totalorder %v3650_v35, 7  ;;  %vm967_vm11 = vcmp.lt.s32.totalorder %v3650_v35, 6  ;;  %vm1228_vm2 = vcmp.lt.s32.totalorder %v3650_v35, 3 }
 0x482   :  { %v2957_v40 = vpack.c.bf16 %v543_v46, %v538_v37  ;;  %v1010_v46 = vld [vmem:[#allocation8 + $0x90] sm:$0xff] }
 0x484   :  { %2952 = vmatpush1.bf16.msra.mxu0 %v2951_v53  ;;  %v548_v53 = vld [vmem:[#allocation7 + $0xc0] sm:$0xff] }
 0x4de   :  { %v417_v56 = vpop.permute.xlu0 %416 }
 0x4df   :  { %v418_v58 = vadd.f32 %v417_v56, %v3614_v44 }
 0x4e0   :  { %v482_v59 = vpop.permute.xlu1 %481 }
 0x4e1   :  { %v424_v60 = vadd.f32 %v2496_v54, %v418_v58  ;;  %v483_v61 = vadd.f32 %v482_v59, %v3616_v47  ;;  %v2498_v47 = vld [vmem:[%s4945_s6] ss:$0 sm:$0xff]  ;;  %v558_v59 = vld [vmem:[#allocation7 + $0x110] sm:$0xff] }
 0x4e2   :  { %v452_v55 = vpop.permute.xlu0 %451 }
 0x4e3   :  { %v425_v1 = vmax.f32 %v424_v60, 0.0  ;;  %v484_v4 = vadd.f32 %v2496_v54, %v483_v61  ;;  %v453_v57 = vadd.f32 %v452_v55, %v3619_v50  ;;  %v553_v54 = vld [vmem:[#allocation7 + $0xe8] sm:$0xff]  ;;  %v563_v60 = vld [vmem:[#allocation7 + $0x138] sm:$0xff] }
 0x4e4   :  { %v496_v6 = vpop.permute.xlu1 %495  ;;  %v2965_v61 = vpack.c.bf16 %v563_v60, %v558_v59  ;;  %v1016_v59 = vld [vmem:[#allocation8 + $0xc0] sm:$0xff] }
 0x4e5   :  { %v431_v33 = vmul.f32 %v2497_v63, %v425_v1  ;;  %v485_v44 = vmax.f32 %v484_v4, 0.0  ;;  %v459_v7 = vadd.f32 %v2500_v0, %v453_v57  ;;  %v497_v34 = vadd.f32 %v496_v6, %v3622_v62  ;;  %v578_v1 = vld [vmem:[#allocation7 + $0x1b0] sm:$0xff]  ;;  %v588_v57 = vld [vmem:[#allocation7 + $0x200] sm:$0xff]  ;;  %v593_v6 = vld [vmem:[#allocation7 + $0x228] sm:$0xff] }
 0x4e7   :  { %v486_v11 = vmul.f32 %v2497_v63, %v485_v44  ;;  %v460_v14 = vmax.f32 %v459_v7, 0.0  ;;  %v498_v16 = vadd.f32 %v2500_v0, %v497_v34  ;;  %v438_v2 = vadd.f32 %v2498_v47, %v431_v33  ;;  %v573_v63 = vld [vmem:[#allocation7 + $0x188] sm:$0xff]  ;;  %v598_v33 = vld [vmem:[#allocation7 + $0x250] sm:$0xff]  ;;  %v603_v44 = vld [vmem:[#allocation7 + $0x278] sm:$0xff] }
 0x4e8   :  { %v2981_v7 = vpack.c.bf16 %v603_v44, %v598_v33  ;;  %v993_v34 = vld [vmem:[#allocation8 + $0x8] sm:$0xff]  ;;  %v1018_v33 = vld [vmem:[#allocation8 + $0xd0] sm:$0xff] }
 0x4e9   :  { %v466_v19 = vmul.f32 %v2501_v10, %v460_v14  ;;  %v499_v50 = vmax.f32 %v498_v16, 0.0  ;;  %v487_v22 = vadd.f32 %v2498_v47, %v486_v11  ;;  %v996_v47 = vld [vmem:[#allocation8 + $0x20] sm:$0xff]  ;;  %v995_v14 = vld [vmem:[#allocation8 + $0x18] sm:$0xff]  ;;  %v1021_v44 = vld [vmem:[#allocation8 + $0xe8] sm:$0xff] }
 0x4ea   :  { %v992_v11 = vld [vmem:[#allocation8] sm:$0xff] }
 0x4eb   :  { %v467_v43 = vadd.f32 %v466_v19, %v438_v2  ;;  %v500_v30 = vmul.f32 %v2501_v10, %v499_v50  ;;  %v2985_v10 = vpack.c.bf16 %v996_v47, %v993_v34  ;;  %v2987_v16 = vpack.c.bf16 %v995_v14, %v992_v11  ;;  %v999_v2 = vld [vmem:[#allocation8 + $0x38] sm:$0xff]  ;;  %v1002_v19 = vld [vmem:[#allocation8 + $0x50] sm:$0xff]  ;;  %v1029_v47 = vld [vmem:[#allocation8 + $0x128] sm:$0xff] }
 0x4ec   :  { %v2989_v50 = vpack.c.bf16 %v1002_v19, %v999_v2  ;;  %v3033_v34 = vpack.c.bf16 %v1021_v44, %v1018_v33  ;;  %v1028_v14 = vld [vmem:[#allocation8 + $0x120] sm:$0xff] }
 0x4ed   :  { %v468_v13 = vsub.f32 0.0, %v467_v43  ;;  %v501_v23 = vadd.f32 %v500_v30, %v487_v22  ;;  %2986 = vmatprep.subr.bf16.mxu0 %v2985_v10  ;;  %v998_v22 = vld [vmem:[#allocation8 + $0x30] sm:$0xff]  ;;  %v1001_v43 = vld [vmem:[#allocation8 + $0x48] sm:$0xff]  ;;  %v1032_v10 = vld [vmem:[#allocation8 + $0x140] sm:$0xff] }
 0x4ee   :  { %v2991_v30 = vpack.c.bf16 %v1001_v43, %v998_v22  ;;  %v3009_v11 = vpack.c.bf16 %v1032_v10, %v1029_v47  ;;  %v1024_v19 = vld [vmem:[#allocation8 + $0x100] sm:$0xff]  ;;  %v1035_v43 = vld [vmem:[#allocation8 + $0x158] sm:$0xff] }
 0x4ef   :  { %v469_v62 = vmul.f32 1.442695, %v468_v13  ;;  %v502_v32 = vsub.f32 0.0, %v501_v23  ;;  %v994_v13 = vld [vmem:[#allocation8 + $0x10] sm:$0xff]  ;;  %v997_v23 = vld [vmem:[#allocation8 + $0x28] sm:$0xff] }
 0x4f1   :  { %3150 = vpow2.f32 %v469_v62  ;;  %v503_v25 = vmul.f32 1.442695, %v502_v32  ;;  %v3017_v62 = vpack.c.bf16 %v997_v23, %v994_v13  ;;  %v1005_v32 = vld [vmem:[#allocation8 + $0x68] sm:$0xff]  ;;  %v1034_v23 = vld [vmem:[#allocation8 + $0x150] sm:$0xff] }
 0x4f3   :  { %3152 = vpow2.f32 %v503_v25  ;;  %v1008_v25 = vld [vmem:[#allocation8 + $0x80] sm:$0xff] }
 0x4fb   :  { %v3151_v26 = vpop.eup %3150 }
 0x4fc   :  { %v471_v27 = vadd.f32 1.0, %v3151_v26  ;;  %v2993_v26 = vpack.c.bf16 %v1008_v25, %v1005_v32  ;;  %v1030_v25 = vld [vmem:[#allocation8 + $0x130] sm:$0xff] }
 0x4fd   :  { %v3153_v45 = vpop.eup %3152 }
 0x4fe   :  { %v505_v29 = vadd.f32 1.0, %v3153_v45  ;;  %3154 = vrcp.f32 %v471_v27  ;;  %v1004_v27 = vld [vmem:[#allocation8 + $0x60] sm:$0xff]  ;;  %v1007_v45 = vld [vmem:[#allocation8 + $0x78] sm:$0xff] }
 0x500   :  { %3156 = vrcp.f32 %v505_v29  ;;  %v2995_v29 = vpack.c.bf16 %v1007_v45, %v1004_v27  ;;  %v1036_v45 = vld [vmem:[#allocation8 + $0x160] sm:$0xff] }
 0x508   :  { %v3155_v38 = vpop.eup %3154 }
 0x50a   :  { %v3157_v41 = vpop.eup %3156 }
 0x50b   :  { %v508_v42 = vadd.f32 %v3157_v41, %v3155_v38  ;;  %v1003_v38 = vld [vmem:[#allocation8 + $0x58] sm:$0xff] }
 0x50c   :  { %v1011_v41 = vld [vmem:[#allocation8 + $0x98] sm:$0xff] }
 0x50d   :  { %v512_v48 = vrot.slane %v508_v42, %v511_v39  ;;  %v518_v58 = vrot.slane %v508_v42, %v517_v51  ;;  %v3021_v39 = vpack.c.bf16 %v1003_v38, %v1000_v31  ;;  %v1014_v42 = vld [vmem:[#allocation8 + $0xb0] sm:$0xff]  ;;  %v3688_v38 = vadd.s32 8, %v3650_v35 }
 0x50e   :  { %v2997_v37 = vpack.c.bf16 %v1014_v42, %v1011_v41  ;;  %v1006_v51 = vld [vmem:[#allocation8 + $0x70] sm:$0xff] }
 0x50f   :  { %v3654_v49 = vmul.f32 %v512_v48, %v3590_v20  ;;  %v3663_v56 = vmul.f32 %v512_v48, %v3587_v17  ;;  %v2961_v20 = vpack.c.bf16 %v553_v54, %v548_v53  ;;  %v568_v17 = vld [vmem:[#allocation7 + $0x160] sm:$0xff]  ;;  %v3677_v0 = vmul.f32 %v518_v58, %v3597_v28  ;;  %v1013_v48 = vld [vmem:[#allocation8 + $0xa8] sm:$0xff] }
 0x510   :  { %v2969_v55 = vpack.c.bf16 %v573_v63, %v568_v17  ;;  %v2977_v28 = vpack.c.bf16 %v593_v6, %v588_v57  ;;  %v1009_v53 = vld [vmem:[#allocation8 + $0x88] sm:$0xff]  ;;  %v1012_v17 = vld [vmem:[#allocation8 + $0xa0] sm:$0xff]  ;;  %v1015_v63 = vld [vmem:[#allocation8 + $0xb8] sm:$0xff] }
 0x511   :  { %5087 = vst [vmem:[#allocation19_spill] sm:$0xff] %v3654_v49  ;;  %669 = vmatmul.mubr.f32.vlgmr.msra.gmra.mrb[0].mxu1 %v3654_v49  ;;  %758 = vmatmul.mubr.f32.vlgmr.msra.gmra.mrb[4].mxu0 %v3654_v49  ;;  %5088 = vst [vmem:[#allocation20_spill] sm:$0xff] %v3663_v56  ;;  %v3025_v54 = vpack.c.bf16 %v1009_v53, %v1006_v51  ;;  %v1022_v57 = vld [vmem:[#allocation8 + $0xf0] sm:$0xff]  ;;  %v944_v51 = vadd.s32 1, %v3688_v38 }
 0x512   :  { %2956 = vmatpush3.bf16.msra.mxu1 %v3628_v52  ;;  %674 = vmatprep.mubr.f32.mxu1 %v4953_v9  ;;  %v3670_v52 = vmul.f32 %v518_v58, %v3600_v36  ;;  %5090 = vst [vmem:[#allocation22_spill] sm:$0xff] %v3677_v0  ;;  %v583_v36 = vld [vmem:[#allocation7 + $0x1d8] sm:$0xff]  ;;  %v1020_v58 = vld [vmem:[#allocation8 + $0xe0] sm:$0xff] }
 0x513   :  { %763 = vmatprep.mubr.f32.mxu0 %v4953_v9  ;;  %2958 = vmatprep.subr.bf16.mxu1 %v2957_v40  ;;  %v2973_v4 = vpack.c.bf16 %v583_v36, %v578_v1  ;;  %v3029_v1 = vpack.c.bf16 %v1015_v63, %v1012_v17  ;;  %v1023_v36 = vld [vmem:[#allocation8 + $0xf8] sm:$0xff]  ;;  %vm948_vm10 = vcmp.lt.s32.totalorder %v944_v51, 16 }
 0x514   :  { %5089 = vst [vmem:[#allocation21_spill] sm:$0xff] %v3670_v52  ;;  %2988 = vmatpush1.bf16.msra.mxu0 %v2987_v16  ;;  %v1031_v16 = vld [vmem:[#allocation8 + $0x138] sm:$0xff] }
 0x515   :  { %675 = vmatmul.mubr.f32.gmra.mrb[2].mxu1 %v3663_v56  ;;  %764 = vmatmul.mubr.f32.gmra.mrb[6].mxu0 %v3663_v56  ;;  %v3011_v2 = vpack.c.bf16 %v1031_v16, %v1028_v14  ;;  %v3714_v16 = vsel %vm948_vm10, 1.0, %v4953_v9 }
 0x516   :  { %2960 = vmatpush3.bf16.msra.mxu1 %v2957_v40  ;;  %680 = vmatprep.mubr.f32.mxu1 %v4953_v9  ;;  %v2999_v40 = vpack.c.bf16 %v1013_v48, %v1010_v46  ;;  %v877_v46 = vadd.s32 4294967294, %v3650_v35  ;;  %v910_v48 = vadd.s32 4294967295, %v3650_v35  ;;  %5092 = vst [vmem:[#allocation24_spill] sm:$0xff] %v3714_v16 }
 0x517   :  { %769 = vmatprep.mubr.f32.mxu0 %v4953_v9  ;;  %2962 = vmatprep.subr.bf16.mxu1 %v2961_v20 }
 0x518   :  { %2990 = vmatprep.subr.bf16.mxu0 %v2989_v50  ;;  %v1027_v50 = vld [vmem:[#allocation8 + $0x118] sm:$0xff]  ;;  %vm879_vm8 = vcmp.ge.s32.totalorder %v877_v46, 0  ;;  %vm912_vm9 = vcmp.ge.s32.totalorder %v910_v48, 0 }
 0x519   :  { %681 = vmatmul.mubr.f32.gmra.mrb[4].mxu1 %v3670_v52  ;;  %770 = vmatmul.mubr.f32.gmra.mrb[8].mxu0 %v3670_v52  ;;  %v3037_v22 = vpack.c.bf16 %v1027_v50, %v1024_v19  ;;  %v3708_v44 = vsel %vm879_vm8, 1.0, %v4953_v9 }
 0x51a   :  { %2964 = vmatpush3.bf16.msra.mxu1 %v2961_v20  ;;  %686 = vmatprep.mubr.f32.mxu1 %v4953_v9  ;;  %v1017_v20 = vld [vmem:[#allocation8 + $0xc8] sm:$0xff]  ;;  %5091 = vst [vmem:[#allocation23_spill] sm:$0xff] %v3708_v44 }
 0x51b   :  { %775 = vmatprep.mubr.f32.mxu0 %v4953_v9  ;;  %2966 = vmatprep.subr.bf16.mxu1 %v2965_v61  ;;  %v3001_v60 = vpack.c.bf16 %v1020_v58, %v1017_v20 }
 0x51c   :  { %2992 = vmatpush1.bf16.msra.mxu0 %v2991_v30  ;;  %v1038_v30 = vld [vmem:[#allocation8 + $0x170] sm:$0xff] }
 0x51d   :  { %687 = vmatmul.mubr.f32.gmra.mrb[6].mxu1 %v3677_v0  ;;  %776 = vmatmul.mubr.f32.gmra.mrb[10].mxu0 %v3677_v0  ;;  %v3013_v13 = vpack.c.bf16 %v1038_v30, %v1035_v43 }
 0x51e   :  { %2968 = vmatpush3.bf16.msra.mxu1 %v2965_v61  ;;  %2737 = vmatprep.mubr.f32.mxu1 %v3654_v49  ;;  %v1019_v61 = vld [vmem:[#allocation8 + $0xd8] sm:$0xff] }
 0x51f   :  { %2970 = vmatprep.subr.bf16.mxu1 %v2969_v55  ;;  %1104 = vmatprep.mubr.f32.mxu0 %v4953_v9 }
 0x520   :  { %2994 = vmatprep.subr.bf16.mxu0 %v2993_v26  ;;  %v1033_v26 = vld [vmem:[#allocation8 + $0x148] sm:$0xff] }
 0x521   :  { %2996 = vmatpush1.bf16.msra.mxu0 %v2995_v29  ;;  %v3041_v27 = vpack.c.bf16 %v1033_v26, %v1030_v25  ;;  %v1039_v29 = vld [vmem:[#allocation8 + $0x178] sm:$0xff] }
 0x522   :  { %2972 = vmatpush3.bf16.msra.mxu1 %v2969_v55  ;;  %2998 = vmatprep.subr.bf16.mxu0 %v2997_v37  ;;  %v3003_v55 = vpack.c.bf16 %v1019_v61, %v1016_v59  ;;  %v3045_v31 = vpack.c.bf16 %v1039_v29, %v1036_v45 }
 0x523   :  { %2974 = vmatprep.subr.bf16.mxu1 %v2973_v4 }
 0x525   :  { %3000 = vmatpush1.bf16.msra.mxu0 %v2999_v40  ;;  %v2503_v40 = vld [vmem:[%s4949_s10] ss:$0 sm:$0xff] }
 0x526   :  { %2976 = vmatpush3.bf16.msra.mxu1 %v2973_v4  ;;  %v1026_v4 = vld [vmem:[#allocation8 + $0x110] sm:$0xff]  ;;  %3002 = vmatprep.subr.bf16.mxu0 %v3001_v60 }
 0x527   :  { %2978 = vmatprep.subr.bf16.mxu1 %v2977_v28  ;;  %v3005_v6 = vpack.c.bf16 %v1026_v4, %v1023_v36 }
 0x529   :  { %3004 = vmatpush1.bf16.msra.mxu0 %v3003_v55 }
 0x52a   :  { %2980 = vmatpush3.bf16.msra.mxu1 %v2977_v28  ;;  %v1025_v28 = vld [vmem:[#allocation8 + $0x108] sm:$0xff]  ;;  %3006 = vmatprep.subr.bf16.mxu0 %v3005_v6 }
 0x52b   :  { %2982 = vmatprep.subr.bf16.mxu1 %v2981_v7 }
 0x52e   :  { %2984 = vmatpush3.bf16.msra.mxu1 %v2981_v7  ;;  %v3007_v7 = vpack.c.bf16 %v1025_v28, %v1022_v57 }
 0x52f   :  { %3018 = vmatprep.subr.bf16.mxu1 %v3017_v62 }
 0x530   :  { %3008 = vmatpush1.bf16.msra.mxu0 %v3007_v7 }
 0x531   :  { %2738 = vmatmul.mubr.f32.vlgmr.msra.gmra.mrb[8].mxu1 %v3663_v56  ;;  %3010 = vmatprep.subr.bf16.mxu0 %v3009_v11 }
 0x532   :  { %2740 = vmatprep.mubr.f32.mxu1 %v3670_v52  ;;  %3020 = vmatpush3.bf16.msra.mxu1 %v3017_v62  ;;  %v1037_v62 = vld [vmem:[#allocation8 + $0x168] sm:$0xff] }
 0x533   :  { %3022 = vmatprep.subr.bf16.mxu1 %v3021_v39  ;;  %v3015_v32 = vpack.c.bf16 %v1037_v62, %v1034_v23 }
 0x534   :  { %3012 = vmatpush1.bf16.msra.mxu0 %v3011_v2 }
 0x535   :  { %2741 = vmatmul.mubr.f32.gmra.mrb[10].mxu1 %v3677_v0  ;;  %3014 = vmatprep.subr.bf16.mxu0 %v3013_v13 }
 0x536   :  { %3024 = vmatpush3.bf16.msra.mxu1 %v3021_v39 }
 0x537   :  { %3026 = vmatprep.subr.bf16.mxu1 %v3025_v54 }
 0x538   :  { %3016 = vmatpush1.bf16.msra.mxu0 %v3015_v32 }
 0x539   :  { %3050 = vmatprep.subr.bf16.mxu0 %v3523_v3 }
 0x53a   :  { %3028 = vmatpush3.bf16.msra.mxu1 %v3025_v54 }
 0x53b   :  { %3030 = vmatprep.subr.bf16.mxu1 %v3029_v1 }
 0x53e   :  { %3032 = vmatpush3.bf16.msra.mxu1 %v3029_v1 }
 0x53f   :  { %3034 = vmatprep.subr.bf16.mxu1 %v3033_v34 }
 0x542   :  { %3036 = vmatpush3.bf16.msra.mxu1 %v3033_v34  ;;  %v3711_v34 = vsel %vm912_vm9, 1.0, %v4953_v9 }
 0x543   :  { %3038 = vmatprep.subr.bf16.mxu1 %v3037_v22 }
 0x546   :  { %3040 = vmatpush3.bf16.msra.mxu1 %v3037_v22 }
 0x547   :  { %3042 = vmatprep.subr.bf16.mxu1 %v3041_v27 }
 0x54a   :  { %3044 = vmatpush3.bf16.msra.mxu1 %v3041_v27 }
 0x54b   :  { %3046 = vmatprep.subr.bf16.mxu1 %v3045_v31 }
 0x54e   :  { %3048 = vmatpush3.bf16.msra.mxu1 %v3045_v31 }
 0x5e4   :  { %v670_v39 = vpop.f32.mrb[0].mxu1  ;;  %v3690_v41 = vpop.f32.mrb[4].mxu0 }
 0x5e5   :  { %v672_v42 = vpop.f32.mrb[1].mxu1  ;;  %v761_v37 = vpop.f32.mrb[5].mxu0  ;;  %v868_v20 = vrot.slane %v670_v39, 6 }
 0x5e6   :  { %v901_v61 = vrot.slane %v672_v42, 7  ;;  %v934_v17 = vrot.slane %v761_v37, 1 }
 0x5e8   :  { %v676_v53 = vpop.f32.mrb[2].mxu1  ;;  %v765_v54 = vpop.f32.mrb[6].mxu0 }
 0x5e9   :  { %v869_v58 = vrot.slane %v676_v53, 6  ;;  %v678_v59 = vpop.f32.mrb[3].mxu1  ;;  %v767_v60 = vpop.f32.mrb[7].mxu0 }
 0x5ea   :  { %v902_v63 = vrot.slane %v678_v59, 7  ;;  %v935_v55 = vrot.slane %v767_v60, 1 }
 0x5eb   :  { %v875_v1 = vsel %vm872_vm5, %v868_v20, %v869_v58 }
 0x5ec   :  { %v898_v36 = vadd.f32 %v2503_v40, %v875_v1  ;;  %v908_v4 = vsel %vm905_vm6, %v901_v61, %v902_v63  ;;  %v941_v57 = vsel %vm938_vm7, %v934_v17, %v935_v55  ;;  %v682_v6 = vpop.f32.mrb[4].mxu1  ;;  %v771_v28 = vpop.f32.mrb[8].mxu0 }
 0x5ed   :  { %v870_v33 = vrot.slane %v682_v6, 6  ;;  %v684_v7 = vpop.f32.mrb[5].mxu1  ;;  %v773_v47 = vpop.f32.mrb[9].mxu0 }
 0x5ee   :  { %v927_v10 = vadd.f32 %v908_v4, %v898_v36  ;;  %v903_v11 = vrot.slane %v684_v7, 7  ;;  %v936_v14 = vrot.slane %v773_v47, 1  ;;  %v973_v7 = vadd.s32 2, %v3688_v38 }
 0x5ef   :  { %v874_v2 = vsel %vm872_vm5, %v869_v58, %v870_v33 }
 0x5f0   :  { %v891_v19 = vmul.f32 %v3708_v44, %v874_v2  ;;  %v907_v50 = vsel %vm905_vm6, %v902_v63, %v903_v11  ;;  %v940_v22 = vsel %vm938_vm7, %v935_v55, %v936_v14  ;;  %v688_v43 = vpop.f32.mrb[6].mxu1  ;;  %v777_v30 = vpop.f32.mrb[10].mxu0  ;;  %v931_v13 = vadd.f32 %v927_v10, %v765_v54 }
 0x5f1   :  { %v924_v23 = vmul.f32 %v3711_v34, %v907_v50  ;;  %v956_v62 = vmul.f32 %v3714_v16, %v940_v22  ;;  %v871_v32 = vrot.slane %v688_v43, 6  ;;  %v690_v25 = vpop.f32.mrb[7].mxu1  ;;  %v779_v26 = vpop.f32.mrb[11].mxu0  ;;  %vm977_vm12 = vcmp.lt.s32.totalorder %v973_v7, 16  ;;  %v2535_v7 = vld [vmem:[%s4949_s10 + $0x5] ss:$0 sm:$0xff] }
 0x5f2   :  { %v899_v27 = vadd.f32 %v2503_v40, %v891_v19  ;;  %v904_v45 = vrot.slane %v690_v25, 7  ;;  %v937_v29 = vrot.slane %v779_v26, 1  ;;  %v1852_v25 = vadd.s32 4294967289, %v3650_v35 }
 0x5f3   :  { %v873_v31 = vsel %vm872_vm5, %v870_v33, %v871_v32  ;;  %v876_v39 = vsel %vm872_vm5, %v871_v32, %v868_v20  ;;  %v960_v42 = vadd.f32 %v956_v62, %v931_v13  ;;  %v2211_v26 = vadd.s32 9, %v3650_v35 }
 0x5f4   :  { %v928_v37 = vadd.f32 %v924_v23, %v899_v27  ;;  %v889_v46 = vmul.f32 %v3708_v44, %v876_v39  ;;  %v900_v48 = vadd.f32 %v2503_v40, %v873_v31  ;;  %v906_v51 = vsel %vm905_vm6, %v903_v11, %v904_v45  ;;  %v3811_v39 = vld [vmem:[%s4949_s10 + $0x3] ss:$0 sm:$0xff] }
 0x5f5   :  { %v909_v53 = vsel %vm905_vm6, %v904_v45, %v901_v61  ;;  %v939_v54 = vsel %vm938_vm7, %v936_v14, %v937_v29  ;;  %v942_v58 = vsel %vm938_vm7, %v937_v29, %v934_v17  ;;  %v2240_v27 = vadd.s32 10, %v3650_v35  ;;  %v3804_v45 = vld [vmem:[%s4949_s10 + $0x1] ss:$0 sm:$0xff] }
 0x5f6   :  { %v897_v59 = vadd.f32 %v2503_v40, %v889_v46  ;;  %v922_v20 = vmul.f32 %v3711_v34, %v909_v53  ;;  %v929_v60 = vadd.f32 %v906_v51, %v900_v48  ;;  %v932_v63 = vadd.f32 %v928_v37, %v771_v28 }
 0x5f7   :  { %v958_v1 = vmul.f32 %v3714_v16, %v942_v58  ;;  %v1695_v29 = vadd.s32 5, %v3688_v38  ;;  %v2126_v31 = vadd.s32 6, %v3688_v38  ;;  %vm1854_vm8 = vcmp.ge.s32.totalorder %v1852_v25, 0 }
 0x5f8   :  { %v926_v55 = vadd.f32 %v922_v20, %v897_v59  ;;  %v933_v36 = vadd.f32 %v929_v60, %v777_v30  ;;  %v961_v4 = vadd.f32 %v939_v54, %v932_v63  ;;  %vm2215_vm10 = vcmp.lt.s32.totalorder %v2211_v26, 16  ;;  %v3835_v20 = vld [vmem:[#allocation10 + $0x3] ss:$0 sm:$0xff] }
 0x5f9   :  { %5102 = vst [vmem:[#allocation34_spill] sm:$0xff] %v3835_v20 }
 0x5fa   :  { %v930_v6 = vadd.f32 %v926_v55, %v3690_v41  ;;  %v962_v33 = vadd.f32 %v958_v1, %v933_v36  ;;  %v3748_v41 = vsel %vm977_vm12, 1.0, %v4953_v9  ;;  %vm2244_vm12 = vcmp.lt.s32.totalorder %v2240_v27, 16 }
 0x5fb   :  { %5093 = vst [vmem:[#allocation25_spill] sm:$0xff] %v3748_v41  ;;  %v3844_v55 = vsel %vm1854_vm8, 1.0, %v4953_v9  ;;  %v3851_v36 = vsel %vm2215_vm10, 1.0, %v4953_v9 }
 0x5fc   :  { %v959_v61 = vadd.f32 %v941_v57, %v930_v6  ;;  %5103 = vst [vmem:[#allocation35_spill] sm:$0xff] %v3851_v36  ;;  %v3857_v6 = vadd.s32 7, %v3688_v38 }
 0x604   :  { %v2739_v47 = vpop.f32.mrb[8].mxu1 }
 0x605   :  { %v964_v10 = vrot.slane %v2739_v47, 2  ;;  %v848_v11 = vpop.f32.mrb[9].mxu1 }
 0x606   :  { %v963_v40 = vrot.slane %v848_v11, 2 }
 0x608   :  { %v970_v17 = vsel %vm967_vm11, %v963_v40, %v964_v10  ;;  %v2742_v28 = vpop.f32.mrb[10].mxu1 }
 0x609   :  { %v3745_v14 = vadd.f32 %v970_v17, %v959_v61  ;;  %v966_v2 = vrot.slane %v2742_v28, 2  ;;  %v858_v19 = vpop.f32.mrb[11].mxu1 }
 0x60a   :  { %v965_v57 = vrot.slane %v858_v19, 2 }
 0x60b   :  { %v971_v50 = vsel %vm967_vm11, %v966_v2, %v963_v40  ;;  %1105 = vmatmul.mubr.f32.vlgmr.msra.gmra.mrb[12].mxu0 %v3745_v14  ;;  %2775 = vmatprep.mubr.f32.mxu1 %v3745_v14 }
 0x60c   :  { %v969_v22 = vsel %vm967_vm11, %v964_v10, %v965_v57  ;;  %1110 = vmatprep.mubr.f32.mxu0 %v4953_v9  ;;  %v968_v43 = vsel %vm967_vm11, %v965_v57, %v966_v2  ;;  %v987_v30 = vmul.f32 %v3748_v41, %v971_v50  ;;  %3052 = vmatpush3.bf16.msra.mxu0 %v3523_v3  ;;  %v1233_v3 = vadd.s32 4294967293, %v3650_v35 }
 0x60d   :  { %v985_v13 = vmul.f32 %v3748_v41, %v969_v22  ;;  %v3762_v23 = vadd.f32 %v968_v43, %v961_v4  ;;  %3054 = vmatprep.subr.bf16.mxu0 %v3525_v5  ;;  %v3854_v4 = vsel %vm2244_vm12, 1.0, %v4953_v9 }
 0x60e   :  { %v3765_v62 = vadd.f32 %v987_v30, %v962_v33  ;;  %vm1235_vm13 = vcmp.ge.s32.totalorder %v1233_v3, 0  ;;  %5104 = vst [vmem:[#allocation36_spill] sm:$0xff] %v3854_v4  ;;  %v3941_v3 = vld [vmem:[#allocation10 + $0x6] ss:$0 sm:$0xff] }
 0x60f   :  { %5094 = vst [vmem:[#allocation26_spill] sm:$0xff] %v3762_v23  ;;  %v3767_v32 = vadd.f32 %v985_v13, %v960_v42  ;;  %v3814_v42 = vsel %vm1235_vm13, 1.0, %v4953_v9  ;;  %vm1699_vm13 = vcmp.lt.s32.totalorder %v1695_v29, 16  ;;  %v3897_v29 = vld [vmem:[#allocation10 + $0x4] ss:$0 sm:$0xff]  ;;  %5112 = vst [vmem:[#allocation44_spill] sm:$0xff] %v3941_v3 }
 0x610   :  { %5095 = vst [vmem:[#allocation27_spill] sm:$0xff] %v3765_v62  ;;  %3056 = vmatpush3.bf16.msra.mxu0 %v3525_v5  ;;  %v1389_v5 = vadd.s32 3, %v3688_v38  ;;  %5097 = vst [vmem:[#allocation29_spill] sm:$0xff] %v3814_v42  ;;  %v3865_v47 = vsel %vm1699_vm13, 1.0, %v4953_v9 }
 0x611   :  { %5096 = vst [vmem:[#allocation28_spill] sm:$0xff] %v3767_v32  ;;  %1111 = vmatmul.mubr.f32.gmra.mrb[14].mxu0 %v3767_v32  ;;  %2776 = vmatmul.mubr.f32.vlgmr.msra.gmra.mrb[12].mxu1 %v3767_v32  ;;  %5105 = vst [vmem:[#allocation37_spill] sm:$0xff] %v3865_v47 }
 0x612   :  { %2778 = vmatprep.mubr.f32.mxu1 %v3762_v23  ;;  %1116 = vmatprep.mubr.f32.mxu0 %v4953_v9  ;;  %vm1393_vm14 = vcmp.lt.s32.totalorder %v1389_v5, 16  ;;  %5109 = vst [vmem:[#allocation41_spill] sm:$0xff] %v3897_v29 }
 0x613   :  { %3058 = vmatprep.subr.bf16.mxu0 %v3530_v8  ;;  %v3817_v37 = vsel %vm1393_vm14, 1.0, %v4953_v9  ;;  %vm2130_vm14 = vcmp.lt.s32.totalorder %v2126_v31, 16 }
 0x614   :  { %3060 = vmatpush3.bf16.msra.mxu0 %v3530_v8  ;;  %v1439_v8 = vadd.s32 4294967291, %v3650_v35  ;;  %5098 = vst [vmem:[#allocation30_spill] sm:$0xff] %v3817_v37  ;;  %v3868_v10 = vsel %vm2130_vm14, 1.0, %v4953_v9 }
 0x615   :  { %1117 = vmatmul.mubr.f32.gmra.mrb[16].mxu0 %v3762_v23  ;;  %2779 = vmatmul.mubr.f32.gmra.mrb[14].mxu1 %v3765_v62  ;;  %5106 = vst [vmem:[#allocation38_spill] sm:$0xff] %v3868_v10  ;;  %v4034_v23 = vld [vmem:[#allocation10 + $0x1] ss:$0 sm:$0xff] }
 0x616   :  { %1122 = vmatprep.mubr.f32.mxu0 %v4953_v9  ;;  %3062 = vmatprep.subr.bf16.mxu0 %v3534_v12  ;;  %vm1441_vm15 = vcmp.ge.s32.totalorder %v1439_v8, 0  ;;  %5127 = vst [vmem:[#allocation53_spill] sm:$0xff] %v4034_v23 }
 0x617   :  { %v3821_v48 = vsel %vm1441_vm15, 1.0, %v4953_v9  ;;  %vm1383_vm15 = vcmp.lt.s32.totalorder %v3650_v35, 5 }
 0x618   :  { %3064 = vmatpush3.bf16.msra.mxu0 %v3534_v12  ;;  %v1481_v12 = vadd.s32 4294967292, %v3650_v35 }
 0x619   :  { %1123 = vmatmul.mubr.f32.gmra.mrb[18].mxu0 %v3765_v62  ;;  %3066 = vmatprep.subr.bf16.mxu0 %v3538_v15 }
 0x61a   :  { %vm1483_vm0 = vcmp.ge.s32.totalorder %v1481_v12, 0 }
 0x61b   :  { %v3827_v54 = vsel %vm1483_vm0, 1.0, %v4953_v9  ;;  %vm1476_vm0 = vcmp.lt.s32.totalorder %v3650_v35, 4 }
 0x61c   :  { %3068 = vmatpush3.bf16.msra.mxu0 %v3538_v15  ;;  %v1666_v15 = vadd.s32 4, %v3688_v38 }
 0x61d   :  { %3070 = vmatprep.subr.bf16.mxu0 %v3542_v18 }
 0x61e   :  { %vm1670_vm1 = vcmp.lt.s32.totalorder %v1666_v15, 16 }
 0x61f   :  { %v3830_v58 = vsel %vm1670_vm1, 1.0, %v4953_v9  ;;  %vm2159_vm1 = vcmp.lt.s32.totalorder %v3857_v6, 16 }
 0x620   :  { %3072 = vmatpush3.bf16.msra.mxu0 %v3542_v18  ;;  %v1746_v18 = vadd.s32 4294967286, %v3688_v38  ;;  %5100 = vst [vmem:[#allocation32_spill] sm:$0xff] %v3830_v58 }
 0x621   :  { %3074 = vmatprep.subr.bf16.mxu0 %v3546_v21 }
 0x622   :  { %vm1748_vm3 = vcmp.ge.s32.totalorder %v1746_v18, 0 }
 0x623   :  { %v3838_v60 = vsel %vm1748_vm3, 1.0, %v4953_v9 }
 0x624   :  { %3076 = vmatpush3.bf16.msra.mxu0 %v3546_v21  ;;  %v1787_v21 = vadd.s32 4294967287, %v3688_v38 }
 0x625   :  { %3078 = vmatprep.subr.bf16.mxu0 %v3550_v24 }
 0x626   :  { %vm1789_vm4 = vcmp.ge.s32.totalorder %v1787_v21, 0 }
 0x627   :  { %v3841_v63 = vsel %vm1789_vm4, 1.0, %v4953_v9 }
 0x628   :  { %3080 = vmatpush3.bf16.msra.mxu0 %v3550_v24  ;;  %v1889_v24 = vadd.s32 4294967290, %v3650_v35 }
 0x62a   :  { %vm1891_vm9 = vcmp.ge.s32.totalorder %v1889_v24, 0 }
 0x62b   :  { %v3848_v1 = vsel %vm1891_vm9, 1.0, %v4953_v9  ;;  %v3920_v9 = vld [vmem:[#allocation10 + $0x5] ss:$0 sm:$0xff] }
 0x62c   :  { %5110 = vst [vmem:[#allocation42_spill] sm:$0xff] %v3920_v9 }
 0x6de   :  { %v1106_v46 = vpop.f32.mrb[12].mxu0 }
 0x6df   :  { %v3824_v51 = vadd.f32 %v3804_v45, %v1106_v46  ;;  %v1108_v53 = vpop.f32.mrb[13].mxu0 }
 0x6e0   :  { %v3833_v59 = vadd.f32 %v3811_v39, %v1108_v53 }
 0x6e1   :  { %5099 = vst [vmem:[#allocation31_spill] sm:$0xff] %v3824_v51  ;;  %v4959_v33 = vrot.slane %v3824_v51, 5  ;;  %v4957_v61 = vrot.slane %v3824_v51, 6  ;;  %v3873_v38 = vmul.f32 %v3835_v20, %v3824_v51  ;;  %v4956_v28 = vrot.slane %v3824_v51, 1 }
 0x6e2   :  { %5101 = vst [vmem:[#allocation33_spill] sm:$0xff] %v3833_v59  ;;  %v4958_v2 = vrot.slane %v3824_v51, 2  ;;  %v4960_v22 = vrot.slane %v3824_v51, 3 }
 0x6e4   :  { %v1112_v40 = vpop.f32.mrb[14].mxu0  ;;  %v2777_v17 = vpop.f32.mrb[12].mxu1 }
 0x6e5   :  { %v3878_v19 = vadd.f32 %v3804_v45, %v1112_v40  ;;  %v1114_v57 = vpop.f32.mrb[15].mxu0  ;;  %v1195_v50 = vpop.f32.mrb[13].mxu1  ;;  %v3893_v25 = vadd.f32 %v2777_v17, %v2535_v7 }
 0x6e6   :  { %v3884_v13 = vadd.f32 %v3811_v39, %v1114_v57  ;;  %v3895_v24 = vadd.f32 %v2535_v7, %v1195_v50 }
 0x6e7   :  { %v4954_v12 = vrot.slane %v3878_v19, 5  ;;  %v4955_v15 = vrot.slane %v3878_v19, 6  ;;  %v1330_v18 = vrot.slane %v3878_v19, 1  ;;  %v1355_v31 = vrot.slane %v3878_v19, 2 }
 0x6e8   :  { %5107 = vst [vmem:[#allocation39_spill] sm:$0xff] %v3884_v13  ;;  %5108 = vst [vmem:[#allocation40_spill] sm:$0xff] %v3895_v24  ;;  %v1118_v26 = vpop.f32.mrb[16].mxu0  ;;  %v2780_v27 = vpop.f32.mrb[14].mxu1  ;;  %v1380_v46 = vrot.slane %v3878_v19, 3  ;;  %v1473_v30 = vrot.slane %v3884_v13, 4 }
 0x6e9   :  { %v3907_v53 = vsel %vm1228_vm2, %v4959_v33, %v4954_v12  ;;  %v3915_v40 = vsel %vm872_vm5, %v4957_v61, %v4955_v15  ;;  %v3918_v17 = vadd.f32 %v3804_v45, %v1118_v26  ;;  %v1120_v57 = vpop.f32.mrb[17].mxu0  ;;  %v1205_v50 = vpop.f32.mrb[15].mxu1  ;;  %v1335_v21 = vsel %vm938_vm7, %v4956_v28, %v1330_v18 }
 0x6ea   :  { %v3924_v12 = vadd.f32 %v3811_v39, %v1120_v57  ;;  %v1360_v26 = vsel %vm967_vm11, %v4958_v2, %v1355_v31  ;;  %v1432_v15 = vrot.slane %v3884_v13, 3  ;;  %v3937_v5 = vadd.f32 %v2780_v27, %v2535_v7 }
 0x6eb   :  { %v4961_v8 = vrot.slane %v3918_v17, 1  ;;  %v3939_v57 = vadd.f32 %v2535_v7, %v1205_v50  ;;  %v4963_v28 = vrot.slane %v3918_v17, 2  ;;  %v4962_v11 = vrot.slane %v3918_v17, 3 }
 0x6ec   :  { %5111 = vst [vmem:[#allocation43_spill] sm:$0xff] %v3924_v12  ;;  %v1124_v61 = vpop.f32.mrb[18].mxu0  ;;  %v3947_v2 = vmul.f32 %v3897_v29, %v1335_v21  ;;  %v3950_v33 = vmul.f32 %v3920_v9, %v1360_v26  ;;  %v1386_v43 = vsel %vm1383_vm15, %v4960_v22, %v1380_v46  ;;  %v4964_v21 = vrot.slane %v3924_v12, 3  ;;  %v3984_v22 = vld [vmem:[#allocation10 + $0x7] ss:$0 sm:$0xff] }
 0x6ed   :  { %v3953_v27 = vadd.f32 %v3804_v45, %v1124_v61  ;;  %v1126_v7 = vpop.f32.mrb[19].mxu0  ;;  %v3959_v50 = vsel %vm938_vm7, %v1330_v18, %v4961_v8  ;;  %v3973_v45 = vsel %vm967_vm11, %v1355_v31, %v4963_v28  ;;  %v3979_v61 = vsel %vm1383_vm15, %v1380_v46, %v4962_v11  ;;  %5118 = vst [vmem:[#allocation50_spill] sm:$0xff] %v3984_v22  ;;  %v3998_v46 = vld [vmem:[%s4949_s10 + $0x4] ss:$0 sm:$0xff] }
 0x6ee   :  { %5114 = vst [vmem:[#allocation46_spill] sm:$0xff] %v3959_v50  ;;  %v3967_v26 = vadd.f32 %v3811_v39, %v1126_v7  ;;  %5116 = vst [vmem:[#allocation48_spill] sm:$0xff] %v3973_v45  ;;  %v3982_v18 = vmul.f32 %v3941_v3, %v1386_v43  ;;  %v3993_v31 = vsel %vm1383_vm15, %v1432_v15, %v4964_v21  ;;  %v5121_v11 = vrot.slane %v3833_v59, 3 }
 0x6ef   :  { %5113 = vst [vmem:[#allocation45_spill] sm:$0xff] %v3953_v27  ;;  %5117 = vst [vmem:[#allocation49_spill] sm:$0xff] %v3979_v61  ;;  %v4970_v39 = vrot.slane %v3953_v27, 5  ;;  %v1453_v8 = vmul.f32 %v3821_v48, %v3993_v31  ;;  %v5122_v21 = vrot.slane %v3824_v51, 5  ;;  %v5123_v43 = vrot.slane %v3824_v51, 6 }
 0x6f0   :  { %5115 = vst [vmem:[#allocation47_spill] sm:$0xff] %v3967_v26  ;;  %5119 = vst [vmem:[#allocation51_spill] sm:$0xff] %v3993_v31  ;;  %v4005_v28 = vsel %vm1383_vm15, %v5121_v11, %v1432_v15  ;;  %v5124_v52 = vrot.slane %v3953_v27, 6  ;;  %v5125_v15 = vrot.slane %v3824_v51, 7  ;;  %v5126_v56 = vrot.slane %v3953_v27, 7 }
 0x6f1   :  { %5120 = vst [vmem:[#allocation52_spill] sm:$0xff] %v3998_v46  ;;  %v1232_v0 = vsel %vm1228_vm2, %v4970_v39, %v5122_v21  ;;  %v1461_v49 = vmul.f32 %v3984_v22, %v4005_v28  ;;  %v4031_v21 = vld [vmem:[#allocation10] ss:$0 sm:$0xff]  ;;  %v5129_v27 = vrot.slane %v3967_v26, 3  ;;  %v1462_v32 = vmul.f32 %v3984_v22, %v1453_v8  ;;  %v4097_v31 = vld [vmem:[#allocation10 + $0x9] ss:$0 sm:$0xff] }
 0x6f2   :  { %v1273_v11 = vsel %vm872_vm5, %v5124_v52, %v5123_v43  ;;  %v1298_v7 = vsel %vm905_vm6, %v5126_v56, %v5125_v15  ;;  %v1245_v62 = vmul.f32 %v3814_v42, %v1232_v0  ;;  %v5128_v43 = vrot.slane %v3833_v59, 3  ;;  %v4045_v15 = vld [vmem:[#allocation10 + $0x2] ss:$0 sm:$0xff]  ;;  %5139 = vst [vmem:[#allocation59_spill] sm:$0xff] %v4097_v31 }
 0x6f3   :  { %v1274_v39 = vmul.f32 %v3708_v44, %v1273_v11  ;;  %v1299_v52 = vmul.f32 %v3711_v34, %v1298_v7  ;;  %5131 = vst [vmem:[#allocation55_spill] sm:$0xff] %v4045_v15  ;;  %v1469_v11 = vadd.f32 %v3998_v46, %v1461_v49  ;;  %v4052_v7 = vld [vmem:[#allocation10 + $0x8] ss:$0 sm:$0xff]  ;;  %v4066_v49 = vld [vmem:[%s4949_s10 + $0x2] ss:$0 sm:$0xff]  ;;  %v1470_v10 = vadd.f32 %v3998_v46, %v1462_v32 }
 0x6f4   :  { %v4043_v56 = vsel %vm1383_vm15, %v5129_v27, %v5128_v43  ;;  %5132 = vst [vmem:[#allocation56_spill] sm:$0xff] %v4052_v7  ;;  %v1254_v3 = vmul.f32 %v4031_v21, %v1245_v62  ;;  %v5133_v43 = vrot.slane %v3924_v12, 4  ;;  %v5135_v62 = vrot.slane %v3833_v59, 4 }
 0x6f5   :  { %5130 = vst [vmem:[#allocation54_spill] sm:$0xff] %v4043_v56  ;;  %v1451_v0 = vmul.f32 %v3821_v48, %v4043_v56  ;;  %v1283_v9 = vmul.f32 %v4034_v23, %v1274_v39  ;;  %v1308_v27 = vmul.f32 %v4045_v15, %v1299_v52  ;;  %v4991_v20 = vrot.slane %v3924_v12, 5 }
 0x6f6   :  { %v4061_v29 = vsel %vm1476_vm0, %v1473_v30, %v5133_v43  ;;  %v4074_v39 = vsel %vm1476_vm0, %v5135_v62, %v1473_v30  ;;  %v5136_v52 = vmov %v5135_v62  ;;  %v5137_v43 = vrot.slane %v3967_v26, 4 }
 0x6f7   :  { %5134 = vst [vmem:[#allocation57_spill] sm:$0xff] %v4061_v29  ;;  %v1460_v8 = vmul.f32 %v3984_v22, %v1451_v0  ;;  %v1262_v47 = vadd.f32 %v4066_v49, %v1254_v3  ;;  %v1495_v32 = vmul.f32 %v3827_v54, %v4061_v29  ;;  %v1503_v30 = vmul.f32 %v4052_v7, %v4074_v39 }
 0x6f8   :  { %v4082_v56 = vsel %vm1476_vm0, %v5137_v43, %v5136_v52  ;;  %v1511_v22 = vrot.slane %v3884_v13, 5  ;;  %v4993_v52 = vrot.slane %v3967_v26, 5  ;;  %v5148_v45 = vrot.slane %v3967_v26, 6 }
 0x6f9   :  { %5138 = vst [vmem:[#allocation58_spill] sm:$0xff] %v4082_v56  ;;  %v1493_v0 = vmul.f32 %v3827_v54, %v4082_v56  ;;  %v1468_v62 = vadd.f32 %v3998_v46, %v1460_v8  ;;  %v1287_v43 = vadd.f32 %v1283_v9, %v1262_v47  ;;  %v1504_v61 = vmul.f32 %v4052_v7, %v1495_v32 }
 0x6fa   :  { %v1507_v56 = vadd.f32 %v1503_v30, %v1469_v11  ;;  %v4103_v29 = vsel %vm1228_vm2, %v1511_v22, %v4991_v20  ;;  %v5141_v8 = vrot.slane %v3833_v59, 5  ;;  %v4996_v11 = vrot.slane %v3884_v13, 6 }
 0x6fb   :  { %v1502_v3 = vmul.f32 %v4052_v7, %v1493_v0  ;;  %5140 = vst [vmem:[#allocation60_spill] sm:$0xff] %v4103_v29  ;;  %v4120_v0 = vld [vmem:[#allocation10 + $0xa] ss:$0 sm:$0xff]  ;;  %v1312_v32 = vadd.f32 %v1308_v27, %v1287_v43  ;;  %v1508_v20 = vadd.f32 %v1504_v61, %v1470_v10  ;;  %v5000_v43 = vrot.slane %v3884_v13, 7 }
 0x6fc   :  { %v4109_v46 = vsel %vm1228_vm2, %v5141_v8, %v1511_v22  ;;  %v5142_v9 = vmov %v5141_v8  ;;  %5144 = vst [vmem:[#allocation62_spill] sm:$0xff] %v4120_v0  ;;  %v1520_v8 = vmul.f32 %v3814_v42, %v4103_v29 }
 0x6fd   :  { %v4117_v47 = vsel %vm1228_vm2, %v4993_v52, %v5142_v9  ;;  %v1506_v30 = vadd.f32 %v1502_v3, %v1468_v62  ;;  %v1528_v7 = vmul.f32 %v4097_v31, %v4109_v46  ;;  %v5145_v52 = vrot.slane %v3833_v59, 6  ;;  %v4140_v3 = vld [vmem:[#allocation10 + $0xb] ss:$0 sm:$0xff] }
 0x6fe   :  { %5143 = vst [vmem:[#allocation61_spill] sm:$0xff] %v4117_v47  ;;  %v1518_v22 = vmul.f32 %v3814_v42, %v4117_v47  ;;  %v1325_v10 = vadd.f32 %v3873_v38, %v1312_v32  ;;  %5146 = vst [vmem:[#allocation63_spill] sm:$0xff] %v4140_v3  ;;  %v1529_v47 = vmul.f32 %v4097_v31, %v1520_v8  ;;  %v4999_v38 = vrot.slane %v3967_v26, 7 }
 0x6ff   :  { %v1541_v27 = vsel %vm872_vm5, %v5145_v52, %v4996_v11  ;;  %v1532_v9 = vadd.f32 %v1528_v7, %v1507_v56  ;;  %v5147_v29 = vmov %v5145_v52  ;;  %v5149_v11 = vrot.slane %v3833_v59, 7 }
 0x700   :  { %v1527_v61 = vmul.f32 %v4097_v31, %v1518_v22  ;;  %v1553_v62 = vmul.f32 %v4120_v0, %v1541_v27  ;;  %v1542_v52 = vsel %vm872_vm5, %v5148_v45, %v5147_v29  ;;  %v1350_v32 = vadd.f32 %v3947_v2, %v1325_v10  ;;  %v4167_v45 = vld [vmem:[#allocation10 + $0xc] ss:$0 sm:$0xff] }
 0x701   :  { %v1543_v27 = vmul.f32 %v3708_v44, %v1542_v52  ;;  %v1566_v56 = vsel %vm905_vm6, %v5149_v11, %v5000_v43  ;;  %v4158_v7 = vadd.f32 %v1529_v47, %v1508_v20  ;;  %v5151_v31 = vmov %v5149_v11  ;;  %5152 = vst [vmem:[#allocation65_spill] sm:$0xff] %v4167_v45 }
 0x702   :  { %v1531_v22 = vadd.f32 %v1527_v61, %v1506_v30  ;;  %v1557_v8 = vadd.f32 %v1553_v62, %v1532_v9  ;;  %v1567_v2 = vsel %vm905_vm6, %v4999_v38, %v5151_v31  ;;  %v1578_v29 = vmul.f32 %v4140_v3, %v1566_v56 }
 0x703   :  { %5150 = vst [vmem:[#allocation64_spill] sm:$0xff] %v4158_v7  ;;  %v1375_v30 = vadd.f32 %v3950_v33, %v1350_v32  ;;  %v1552_v10 = vmul.f32 %v4120_v0, %v1543_v27  ;;  %v1568_v11 = vmul.f32 %v3711_v34, %v1567_v2  ;;  %v1591_v20 = vmul.f32 %v4167_v45, %v3884_v13  ;;  %v4179_v33 = vld [vmem:[#allocation10 + $0xd] ss:$0 sm:$0xff] }
 0x704   :  { %v1582_v47 = vadd.f32 %v1578_v29, %v1557_v8  ;;  %v1599_v9 = vrot.slane %v3884_v13, 1  ;;  %v4998_v61 = vrot.slane %v3924_v12, 1  ;;  %v1624_v31 = vrot.slane %v3884_v13, 2  ;;  %5153 = vst [vmem:[#allocation66_spill] sm:$0xff] %v4179_v33 }
 0x705   :  { %v1413_v62 = vadd.f32 %v3982_v18, %v1375_v30  ;;  %v1556_v52 = vadd.f32 %v1552_v10, %v1531_v22  ;;  %v1577_v56 = vmul.f32 %v4140_v3, %v1568_v11  ;;  %v5003_v32 = vrot.slane %v3924_v12, 2  ;;  %v4194_v30 = vld [vmem:[#allocation10 + $0xe] ss:$0 sm:$0xff] }
 0x706   :  { %v1595_v27 = vadd.f32 %v1591_v20, %v1582_v47  ;;  %v1603_v8 = vsel %vm938_vm7, %v1599_v9, %v4998_v61  ;;  %v5154_v2 = vrot.slane %v3833_v59, 1  ;;  %v5155_v18 = vrot.slane %v3833_v59, 2  ;;  %5156 = vst [vmem:[#allocation67_spill] sm:$0xff] %v4194_v30 }
 0x707   :  { %v1581_v10 = vadd.f32 %v1577_v56, %v1556_v52  ;;  %v1590_v11 = vmul.f32 %v4167_v45, %v3833_v59  ;;  %v1607_v20 = vmul.f32 %v3714_v16, %v1603_v8  ;;  %v5157_v47 = vmov 0.0   ;;  %v4213_v56 = vld [vmem:[#allocation10 + $0xf] ss:$0 sm:$0xff]  ;;  %v4251_v45 = vld [vmem:[#allocation10 + $0x11] ss:$0 sm:$0xff] }
 0x708   :  { %v1604_v29 = vsel %vm938_vm7, %v5154_v2, %v1599_v9  ;;  %v1629_v22 = vsel %vm967_vm11, %v5155_v18, %v1624_v31  ;;  %v4202_v61 = vsel %vm2159_vm1, 1.0, %v5157_v47  ;;  %v4211_v52 = vsel %vm967_vm11, %v1624_v31, %v5003_v32  ;;  %5160 = vst [vmem:[#allocation70_spill] sm:$0xff] %v4213_v56  ;;  %5165 = vst [vmem:[#allocation75_spill] sm:$0xff] %v4251_v45 }
 0x709   :  { %5158 = vst [vmem:[#allocation68_spill] sm:$0xff] %v4202_v61  ;;  %v1615_v38 = vmul.f32 %v4179_v33, %v1604_v29  ;;  %5159 = vst [vmem:[#allocation69_spill] sm:$0xff] %v4211_v52  ;;  %v1594_v8 = vadd.f32 %v1590_v11, %v1581_v10  ;;  %v1616_v18 = vmul.f32 %v4179_v33, %v1607_v20  ;;  %v1737_v47 = vrot.slane %v3895_v24, 6  ;;  %v4226_v11 = vld [vmem:[#allocation10 + $0x10] ss:$0 sm:$0xff] }
 0x70a   :  { %v1640_v6 = vmul.f32 %v4194_v30, %v1629_v22  ;;  %v1738_v43 = vrot.slane %v3893_v25, 6  ;;  %v1739_v2 = vrot.slane %v3939_v57, 6  ;;  %v1740_v29 = vrot.slane %v3937_v5, 6  ;;  %5162 = vst [vmem:[#allocation72_spill] sm:$0xff] %v4226_v11 }
 0x70b   :  { %v1778_v9 = vrot.slane %v3895_v24, 7  ;;  %v1619_v59 = vadd.f32 %v1615_v38, %v1594_v8  ;;  %v4222_v31 = vadd.f32 %v1616_v18, %v1595_v27  ;;  %v1657_v10 = vmul.f32 %v4213_v56, %v4005_v28  ;;  %v4241_v27 = vld [vmem:[#allocation10 + $0x12] ss:$0 sm:$0xff]  ;;  %v4313_v56 = vld [vmem:[#allocation10 + $0x15] ss:$0 sm:$0xff] }
 0x70c   :  { %v4231_v20 = vsel %vm872_vm5, %v1739_v2, %v1740_v29  ;;  %v4235_v32 = vsel %vm872_vm5, %v1737_v47, %v1738_v43  ;;  %v4239_v38 = vsel %vm872_vm5, %v1740_v29, %v1737_v47  ;;  %v1417_v3 = vadd.f32 %v1413_v62, %v3745_v14  ;;  %v4256_v47 = vld [vmem:[%s4949_s10 + $0x6] ss:$0 sm:$0xff]  ;;  %5173 = vst [vmem:[#allocation81_spill] sm:$0xff] %v4313_v56 }
 0x70d   :  { %5161 = vst [vmem:[#allocation71_spill] sm:$0xff] %v4222_v31  ;;  %5163 = vst [vmem:[#allocation73_spill] sm:$0xff] %v4231_v20  ;;  %v1644_v8 = vadd.f32 %v1640_v6, %v1619_v59  ;;  %v1757_v18 = vmul.f32 0.0, %v4231_v20  ;;  %v1758_v22 = vmul.f32 %v3838_v60, %v4239_v38  ;;  %v1759_v33 = vmul.f32 0.0, %v4235_v32  ;;  %v4268_v20 = vld [vmem:[#allocation10 + $0x13] ss:$0 sm:$0xff] }
 0x70e   :  { %5164 = vst [vmem:[#allocation74_spill] sm:$0xff] %v4239_v38  ;;  %v1686_v7 = vmul.f32 %v4226_v11, %v4074_v39  ;;  %5166 = vst [vmem:[#allocation76_spill] sm:$0xff] %v4256_v47  ;;  %v1781_v59 = vrot.slane %v3937_v5, 7  ;;  %v5167_v6 = vrot.slane %v3893_v25, 7  ;;  %v4272_v0 = vsel %vm872_vm5, %v1738_v43, %v1739_v2  ;;  %v4289_v2 = vld [vmem:[#allocation10 + $0x14] ss:$0 sm:$0xff] }
 0x70f   :  { %v1661_v28 = vadd.f32 %v1657_v10, %v1644_v8  ;;  %v1766_v14 = vmul.f32 %v4241_v27, %v1757_v18  ;;  %v1767_v39 = vmul.f32 %v4241_v27, %v1758_v22  ;;  %v1768_v62 = vmul.f32 %v4241_v27, %v1759_v33  ;;  %5171 = vst [vmem:[#allocation79_spill] sm:$0xff] %v4289_v2 }
 0x710   :  { %v4263_v29 = vsel %vm905_vm6, %v1778_v9, %v5167_v6  ;;  %v5168_v13 = vrot.slane %v3939_v57, 7  ;;  %v4282_v10 = vsel %vm905_vm6, %v1781_v59, %v1778_v9  ;;  %v1715_v33 = vmul.f32 %v4251_v45, %v4109_v46 }
 0x711   :  { %5170 = vst [vmem:[#allocation78_spill] sm:$0xff] %v4282_v10  ;;  %v1800_v22 = vmul.f32 0.0, %v4263_v29  ;;  %v1690_v8 = vadd.f32 %v1686_v7, %v1661_v28  ;;  %v1774_v18 = vadd.f32 %v4256_v47, %v1766_v14  ;;  %v1776_v43 = vadd.f32 %v4256_v47, %v1768_v62 }
 0x712   :  { %v4278_v12 = vsel %vm905_vm6, %v5168_v13, %v1781_v59  ;;  %v1775_v6 = vadd.f32 %v4256_v47, %v1767_v39  ;;  %v1799_v9 = vmul.f32 %v3841_v63, %v4282_v10  ;;  %v4298_v7 = vmul.f32 %v3838_v60, %v4272_v0 }
 0x713   :  { %5169 = vst [vmem:[#allocation77_spill] sm:$0xff] %v4278_v12  ;;  %v1798_v13 = vmul.f32 0.0, %v4278_v12  ;;  %v1809_v59 = vmul.f32 %v4268_v20, %v1800_v22  ;;  %v1719_v26 = vadd.f32 %v1715_v33, %v1690_v8  ;;  %v1827_v46 = vmul.f32 0.0, %v3937_v5 }
 0x714   :  { %v1829_v28 = vmul.f32 0.0, %v3893_v25  ;;  %v1808_v39 = vmul.f32 %v4268_v20, %v1799_v9  ;;  %v1837_v61 = vmul.f32 %v4289_v2, %v3895_v24  ;;  %v1844_v60 = vrot.slane %v3895_v24, 1 }
 0x715   :  { %v1807_v14 = vmul.f32 %v4268_v20, %v1798_v13  ;;  %v1813_v62 = vadd.f32 %v1809_v59, %v1776_v43  ;;  %v4306_v45 = vadd.f32 %v1719_v26, %v1417_v3  ;;  %v1836_v22 = vmul.f32 %v4289_v2, %v1827_v46 }
 0x716   :  { %v1838_v8 = vmul.f32 %v4289_v2, %v1829_v28  ;;  %v1812_v11 = vadd.f32 %v1808_v39, %v1775_v6  ;;  %v1845_v47 = vrot.slane %v3893_v25, 1  ;;  %v5028_v13 = vrot.slane %v3939_v57, 1  ;;  %v4328_v28 = vld [vmem:[#allocation10 + $0x16] ss:$0 sm:$0xff] }
 0x717   :  { %5172 = vst [vmem:[#allocation80_spill] sm:$0xff] %v4306_v45  ;;  %v1811_v33 = vadd.f32 %v1807_v14, %v1774_v18  ;;  %v5029_v9 = vrot.slane %v3937_v5, 1  ;;  %v1881_v26 = vrot.slane %v3895_v24, 2  ;;  %v1882_v3 = vrot.slane %v3893_v25, 2  ;;  %5175 = vst [vmem:[#allocation83_spill] sm:$0xff] %v4328_v28 }
 0x718   :  { %v1842_v43 = vadd.f32 %v1838_v8, %v1813_v62  ;;  %v1841_v46 = vadd.f32 %v1837_v61, %v1812_v11  ;;  %v4322_v18 = vsel %vm938_vm7, %v1845_v47, %v5028_v13  ;;  %v4326_v6 = vsel %vm938_vm7, %v1844_v60, %v1845_v47 }
 0x719   :  { %v1840_v59 = vadd.f32 %v1836_v22, %v1811_v33  ;;  %5174 = vst [vmem:[#allocation82_spill] sm:$0xff] %v4326_v6  ;;  %v4334_v14 = vsel %vm938_vm7, %v5029_v9, %v1844_v60  ;;  %v1866_v61 = vmul.f32 %v3844_v55, %v4322_v18  ;;  %v1874_v11 = vmul.f32 %v4313_v56, %v4326_v6 }
 0x71a   :  { %5176 = vst [vmem:[#allocation84_spill] sm:$0xff] %v4334_v14  ;;  %v5030_v39 = vrot.slane %v3939_v57, 2  ;;  %v1864_v47 = vmul.f32 %v3844_v55, %v4334_v14  ;;  %v5032_v62 = vrot.slane %v3937_v5, 2  ;;  %v4346_v22 = vsel %vm967_vm11, %v1881_v26, %v1882_v3 }
 0x71b   :  { %5177 = vst [vmem:[#allocation85_spill] sm:$0xff] %v4346_v22  ;;  %v1918_v8 = vrot.slane %v3895_v24, 3  ;;  %v1875_v60 = vmul.f32 %v4313_v56, %v1866_v61  ;;  %v1878_v33 = vadd.f32 %v1874_v11, %v1841_v46  ;;  %v1911_v55 = vmul.f32 %v4328_v28, %v4346_v22  ;;  %v4368_v11 = vld [vmem:[#allocation10 + $0x17] ss:$0 sm:$0xff] }
 0x71c   :  { %v4354_v13 = vsel %vm967_vm11, %v1882_v3, %v5030_v39  ;;  %v1873_v9 = vmul.f32 %v4313_v56, %v1864_v47  ;;  %v4363_v45 = vsel %vm967_vm11, %v5032_v62, %v1881_v26  ;;  %v1919_v61 = vrot.slane %v3893_v25, 3  ;;  %5179 = vst [vmem:[#allocation87_spill] sm:$0xff] %v4368_v11 }
 0x71d   :  { %5178 = vst [vmem:[#allocation86_spill] sm:$0xff] %v4363_v45  ;;  %v1903_v46 = vmul.f32 %v3848_v1, %v4354_v13  ;;  %v5180_v3 = vrot.slane %v3939_v57, 7  ;;  %v5181_v39 = vrot.slane %v3893_v25, 7  ;;  %v1901_v56 = vmul.f32 %v3848_v1, %v4363_v45 }
 0x71e   :  { %v1915_v26 = vadd.f32 %v1911_v55, %v1878_v33  ;;  %v5036_v62 = vrot.slane %v3939_v57, 3  ;;  %v1877_v2 = vadd.f32 %v1873_v9, %v1840_v59  ;;  %v1879_v31 = vadd.f32 %v1875_v60, %v1842_v43  ;;  %v4406_v33 = vld [vmem:[#allocation10 + $0x18] ss:$0 sm:$0xff] }
 0x71f   :  { %v4376_v47 = vsel %vm905_vm6, %v5181_v39, %v5180_v3  ;;  %v5038_v30 = vrot.slane %v3937_v5, 3  ;;  %v4384_v50 = vsel %vm1383_vm15, %v1918_v8, %v1919_v61  ;;  %v1910_v52 = vmul.f32 %v4328_v28, %v1901_v56  ;;  %5183 = vst [vmem:[#allocation89_spill] sm:$0xff] %v4406_v33 }
 0x720   :  { %v4391_v39 = vsel %vm1383_vm15, %v1919_v61, %v5036_v62  ;;  %v1936_v1 = vmul.f32 %v4368_v11, %v4384_v50  ;;  %v1943_v9 = vrot.slane %v3895_v24, 4  ;;  %v1912_v43 = vmul.f32 %v4328_v28, %v1903_v46 }
 0x721   :  { %v4401_v59 = vsel %vm1383_vm15, %v5038_v30, %v1918_v8  ;;  %v1928_v56 = vmul.f32 %v3821_v48, %v4391_v39  ;;  %v1944_v60 = vrot.slane %v3893_v25, 4  ;;  %v1914_v55 = vadd.f32 %v1910_v52, %v1877_v2 }
 0x722   :  { %5182 = vst [vmem:[#allocation88_spill] sm:$0xff] %v4401_v59  ;;  %v1926_v61 = vmul.f32 %v3821_v48, %v4401_v59  ;;  %v1940_v3 = vadd.f32 %v1936_v1, %v1915_v26  ;;  %v5041_v46 = vrot.slane %v3939_v57, 4  ;;  %v1916_v62 = vadd.f32 %v1912_v43, %v1879_v31 }
 0x723   :  { %v5046_v28 = vrot.slane %v3937_v5, 4  ;;  %v4414_v8 = vsel %vm1476_vm0, %v1943_v9, %v1944_v60  ;;  %v1968_v30 = vrot.slane %v3895_v24, 5  ;;  %v1969_v31 = vrot.slane %v3893_v25, 5 }
 0x724   :  { %v1935_v15 = vmul.f32 %v4368_v11, %v1926_v61  ;;  %v4422_v52 = vsel %vm1476_vm0, %v1944_v60, %v5041_v46  ;;  %v1961_v48 = vmul.f32 %v4406_v33, %v4414_v8  ;;  %v1937_v2 = vmul.f32 %v4368_v11, %v1928_v56  ;;  %v4437_v60 = vld [vmem:[#allocation10 + $0x19] ss:$0 sm:$0xff] }
 0x725   :  { %v4432_v26 = vsel %vm1476_vm0, %v5046_v28, %v1943_v9  ;;  %v1953_v1 = vmul.f32 %v3827_v54, %v4422_v52  ;;  %v5047_v43 = vrot.slane %v3939_v57, 5  ;;  %5185 = vst [vmem:[#allocation91_spill] sm:$0xff] %v4437_v60  ;;  %v5048_v56 = vrot.slane %v3937_v5, 5 }
 0x726   :  { %5184 = vst [vmem:[#allocation90_spill] sm:$0xff] %v4432_v26  ;;  %v1939_v61 = vadd.f32 %v1935_v15, %v1914_v55  ;;  %v1951_v46 = vmul.f32 %v3827_v54, %v4432_v26  ;;  %v1965_v59 = vadd.f32 %v1961_v48, %v1940_v3  ;;  %v1801_v11 = vmul.f32 %v3841_v63, %v4376_v47  ;;  %v4454_v15 = vld [vmem:[#allocation10 + $0x1a] ss:$0 sm:$0xff] }
 0x727   :  { %v1941_v23 = vadd.f32 %v1937_v2, %v1916_v62  ;;  %v4448_v9 = vsel %vm1228_vm2, %v1969_v31, %v5047_v43  ;;  %v4452_v28 = vsel %vm1228_vm2, %v1968_v30, %v1969_v31  ;;  %5186 = vst [vmem:[#allocation92_spill] sm:$0xff] %v4454_v15  ;;  %v1962_v55 = vmul.f32 %v4406_v33, %v1953_v1  ;;  %v2550_v2 = vld [vmem:[#allocation10 + $0x1b] ss:$0 sm:$0xff] }
 0x728   :  { %v1960_v54 = vmul.f32 %v4406_v33, %v1951_v46  ;;  %v4462_v63 = vsel %vm1228_vm2, %v5048_v56, %v1968_v30  ;;  %v1986_v62 = vmul.f32 %v4437_v60, %v4452_v28  ;;  %v1978_v48 = vmul.f32 %v3814_v42, %v4448_v9 }
 0x729   :  { %5187 = vst [vmem:[#allocation93_spill] sm:$0xff] %v4462_v63  ;;  %v1976_v3 = vmul.f32 %v3814_v42, %v4462_v63  ;;  %v1993_v46 = vmul.f32 %v3708_v44, %v4239_v38  ;;  %v1995_v31 = vmul.f32 %v3708_v44, %v4272_v0  ;;  %v2003_v56 = vmul.f32 %v4454_v15, %v4235_v32  ;;  %v4481_v38 = vld [vmem:[#allocation10 + $0x1c] ss:$0 sm:$0xff] }
 0x72a   :  { %v1964_v30 = vadd.f32 %v1960_v54, %v1939_v61  ;;  %v1990_v43 = vadd.f32 %v1986_v62, %v1965_v59  ;;  %v1966_v63 = vadd.f32 %v1962_v55, %v1941_v23  ;;  %v2010_v42 = vmul.f32 %v3711_v34, %v4282_v10  ;;  %5188 = vst [vmem:[#allocation94_spill] sm:$0xff] %v4481_v38  ;;  %v4525_v10 = vld [vmem:[#allocation10 + $0x20] ss:$0 sm:$0xff] }
 0x72b   :  { %v1985_v33 = vmul.f32 %v4437_v60, %v1976_v3  ;;  %v4485_v44 = vmul.f32 %v4241_v27, %v4298_v7  ;;  %v4488_v61 = vmul.f32 %v4268_v20, %v1801_v11  ;;  %v2020_v54 = vmul.f32 %v2550_v2, %v4263_v29  ;;  %5192 = vst [vmem:[#allocation98_spill] sm:$0xff] %v4525_v10 }
 0x72c   :  { %v2007_v59 = vadd.f32 %v2003_v56, %v1990_v43  ;;  %v1987_v62 = vmul.f32 %v4437_v60, %v1978_v48  ;;  %v2002_v55 = vmul.f32 %v4454_v15, %v1993_v46  ;;  %v2004_v3 = vmul.f32 %v4454_v15, %v1995_v31  ;;  %v4500_v56 = vld [vmem:[#allocation10 + $0x1d] ss:$0 sm:$0xff]  ;;  %v5212_v15 = vld [vmem:[#allocation42_spill] sm:$0xff] }
 0x72d   :  { %v1989_v23 = vadd.f32 %v1985_v33, %v1964_v30  ;;  %v2012_v26 = vmul.f32 %v3711_v34, %v4376_v47  ;;  %v2033_v27 = vmul.f32 %v4481_v38, %v3893_v25  ;;  %v2041_v20 = vmul.f32 %v3714_v16, %v4322_v18 }
 0x72e   :  { %v2024_v1 = vadd.f32 %v2020_v54, %v2007_v59  ;;  %v1991_v7 = vadd.f32 %v1987_v62, %v1966_v63  ;;  %v2019_v43 = vmul.f32 %v2550_v2, %v2010_v42  ;;  %v2058_v33 = vmul.f32 %v3748_v41, %v4354_v13  ;;  %v4509_v59 = vld [vmem:[#allocation10 + $0x1e] ss:$0 sm:$0xff]  ;;  %v4518_v62 = vld [vmem:[#allocation10 + $0x1f] ss:$0 sm:$0xff] }
 0x72f   :  { %v2006_v11 = vadd.f32 %v2002_v55, %v1989_v23  ;;  %v2043_v46 = vmul.f32 %v3714_v16, %v4334_v14  ;;  %v2050_v31 = vmul.f32 %v4500_v56, %v2041_v20  ;;  %v2060_v30 = vmul.f32 %v3748_v41, %v4363_v45  ;;  %5190 = vst [vmem:[#allocation96_spill] sm:$0xff] %v4518_v62  ;;  %v5209_v14 = vld [vmem:[#allocation71_spill] sm:$0xff] }
 0x730   :  { %v2037_v48 = vadd.f32 %v2033_v27, %v2024_v1  ;;  %v4512_v63 = vmul.f32 %v2550_v2, %v4278_v12  ;;  %v2032_v54 = vmul.f32 %v4481_v38, %v3895_v24  ;;  %v2075_v1 = vmul.f32 %v3817_v37, %v4391_v39  ;;  %v4533_v24 = vld [vmem:[#allocation10 + $0x21] ss:$0 sm:$0xff] }
 0x731   :  { %v2023_v42 = vadd.f32 %v2019_v43, %v2006_v11  ;;  %v4520_v23 = vmul.f32 %v2550_v2, %v2012_v26  ;;  %v2067_v27 = vmul.f32 %v4509_v59, %v2058_v33  ;;  %v2092_v20 = vmul.f32 %v3830_v58, %v4422_v52  ;;  %v4545_v33 = vld [vmem:[#allocation10 + $0x23] ss:$0 sm:$0xff] }
 0x732   :  { %5189 = vst [vmem:[#allocation95_spill] sm:$0xff] %v4512_v63  ;;  %v2054_v55 = vadd.f32 %v2050_v31, %v2037_v48  ;;  %v4527_v45 = vadd.f32 %v2004_v3, %v1991_v7  ;;  %v2049_v43 = vmul.f32 %v4500_v56, %v4326_v6  ;;  %v2066_v39 = vmul.f32 %v4509_v59, %v4346_v22  ;;  %v4543_v7 = vld [vmem:[#allocation10 + $0x22] ss:$0 sm:$0xff]  ;;  %v4547_v48 = vld [vmem:[#allocation10 + $0x24] ss:$0 sm:$0xff]  ;;  %v5201_v63 = vld [vmem:[#allocation48_spill] sm:$0xff] }
 0x733   :  { %5191 = vst [vmem:[#allocation97_spill] sm:$0xff] %v4520_v23  ;;  %v2036_v11 = vadd.f32 %v2032_v54, %v2023_v42  ;;  %v4536_v26 = vmul.f32 %v4500_v56, %v2043_v46  ;;  %v4539_v2 = vmul.f32 %v4509_v59, %v2060_v30  ;;  %v2083_v3 = vmul.f32 %v4518_v62, %v4384_v50  ;;  %v4571_v22 = vld [vmem:[#allocation10 + $0x25] ss:$0 sm:$0xff]  ;;  %v5215_v23 = vld [vmem:[#allocation72_spill] sm:$0xff] }
 0x734   :  { %v2071_v52 = vadd.f32 %v2067_v27, %v2054_v55  ;;  %v2084_v42 = vmul.f32 %v4518_v62, %v2075_v1  ;;  %v2100_v46 = vmul.f32 %v4525_v10, %v4414_v8  ;;  %v2223_v30 = vmul.f32 %v3851_v36, %v4322_v18  ;;  %v5205_v36 = vld [vmem:[#allocation57_spill] sm:$0xff] }
 0x735   :  { %5193 = vst [vmem:[#allocation99_spill] sm:$0xff] %v4536_v26  ;;  %5194 = vst [vmem:[#allocation100_spill] sm:$0xff] %v4539_v2  ;;  %v2053_v31 = vadd.f32 %v2049_v43, %v2036_v11  ;;  %v2101_v54 = vmul.f32 %v4525_v10, %v2092_v20  ;;  %v2117_v50 = vmul.f32 %v4533_v24, %v4452_v28  ;;  %v5195_v27 = vrot.slane %v3878_v19, 7  ;;  %v5210_v10 = vld [vmem:[#allocation70_spill] sm:$0xff] }
 0x736   :  { %v1255_v55 = vmul.f32 %v4031_v21, %v3907_v53  ;;  %v5196_v11 = vrot.slane %v3824_v51, 7  ;;  %v2146_v8 = vmul.f32 %v4543_v7, %v4235_v32  ;;  %v2175_v18 = vmul.f32 %v4545_v33, %v4263_v29  ;;  %v5199_v29 = vld [vmem:[#allocation69_spill] sm:$0xff] }
 0x737   :  { %v2070_v43 = vadd.f32 %v2066_v39, %v2053_v31  ;;  %v2203_v28 = vmul.f32 %v4547_v48, %v3893_v25  ;;  %v2088_v20 = vadd.f32 %v2084_v42, %v2071_v52  ;;  %v2252_v53 = vmul.f32 %v3854_v4, %v4354_v13  ;;  %v5200_v52 = vld [vmem:[#allocation46_spill] sm:$0xff]  ;;  %v5202_v4 = vld [vmem:[#allocation51_spill] sm:$0xff] }
 0x738   :  { %v1297_v1 = vsel %vm905_vm6, %v5196_v11, %v5195_v27  ;;  %v1263_v6 = vadd.f32 %v4066_v49, %v1255_v55  ;;  %v5197_v27 = vld [vmem:[#allocation53_spill] sm:$0xff]  ;;  %v2232_v32 = vmul.f32 %v4571_v22, %v2223_v30  ;;  %v5198_v11 = vld [vmem:[#allocation55_spill] sm:$0xff]  ;;  %v1632_v26 = vmul.f32 %v3748_v41, %v5199_v29 }
 0x739   :  { %v1284_v39 = vmul.f32 %v5197_v27, %v3915_v40  ;;  %v2087_v31 = vadd.f32 %v2083_v3, %v2070_v43  ;;  %v1309_v2 = vmul.f32 %v5198_v11, %v1297_v1  ;;  %v1338_v42 = vmul.f32 %v3714_v16, %v5200_v52  ;;  %v4588_v40 = vld [vmem:[#allocation10 + $0x26] ss:$0 sm:$0xff]  ;;  %v5203_v3 = vld [vmem:[#allocation49_spill] sm:$0xff]  ;;  %v5204_v1 = vld [vmem:[#allocation67_spill] sm:$0xff] }
 0x73a   :  { %v1363_v13 = vmul.f32 %v3748_v41, %v5201_v63  ;;  %v1649_v55 = vmul.f32 %v3817_v37, %v5202_v4  ;;  %v1401_v30 = vmul.f32 %v3817_v37, %v5203_v3  ;;  %v1641_v43 = vmul.f32 %v5204_v1, %v1632_v26  ;;  %v5206_v52 = vld [vmem:[#allocation34_spill] sm:$0xff]  ;;  %v5207_v41 = vld [vmem:[#allocation60_spill] sm:$0xff]  ;;  %v5208_v16 = vld [vmem:[#allocation37_spill] sm:$0xff] }
 0x73b   :  { %v1288_v25 = vadd.f32 %v1284_v39, %v1263_v6  ;;  %v2104_v51 = vadd.f32 %v2100_v46, %v2087_v31  ;;  %v1678_v6 = vmul.f32 %v3830_v58, %v5205_v36  ;;  %v2261_v39 = vmul.f32 %v4588_v40, %v2252_v53  ;;  %v5211_v26 = vld [vmem:[#allocation41_spill] sm:$0xff]  ;;  %v5213_v53 = vld [vmem:[#allocation76_spill] sm:$0xff] }
 0x73c   :  { %v1322_v63 = vmul.f32 %v5206_v52, %v3878_v19  ;;  %v1707_v4 = vmul.f32 %v5208_v16, %v5207_v41  ;;  %v2105_v46 = vadd.f32 %v2101_v54, %v2088_v20  ;;  %v1645_v12 = vadd.f32 %v1641_v43, %v5209_v14  ;;  %v5214_v58 = vld [vmem:[#allocation44_spill] sm:$0xff]  ;;  %v5217_v14 = vld [vmem:[#allocation79_spill] sm:$0xff] }
 0x73d   :  { %v1313_v29 = vadd.f32 %v1309_v2, %v1288_v25  ;;  %v2121_v31 = vadd.f32 %v2117_v50, %v2104_v51  ;;  %v1658_v3 = vmul.f32 %v5210_v10, %v1649_v55  ;;  %v1347_v62 = vmul.f32 %v5211_v26, %v1338_v42  ;;  %v5216_v51 = vld [vmem:[#allocation75_spill] sm:$0xff] }
 0x73e   :  { %v1372_v36 = vmul.f32 %v5212_v15, %v1363_v13  ;;  %v1777_v2 = vadd.f32 %v5213_v53, %v4485_v44  ;;  %v1410_v60 = vmul.f32 %v5214_v58, %v1401_v30  ;;  %v1687_v41 = vmul.f32 %v5215_v23, %v1678_v6 }
 0x73f   :  { %v1326_v37 = vadd.f32 %v1322_v63, %v1313_v29  ;;  %v2150_v25 = vadd.f32 %v2146_v8, %v2121_v31  ;;  %v1662_v38 = vadd.f32 %v1658_v3, %v1645_v12  ;;  %v1716_v50 = vmul.f32 %v5216_v51, %v1707_v4  ;;  %v5222_v29 = vld [vmem:[#allocation38_spill] sm:$0xff]  ;;  %v5224_v3 = vld [vmem:[#allocation81_spill] sm:$0xff] }
 0x740   :  { %v1839_v20 = vmul.f32 %v5217_v14, %v3939_v57  ;;  %v5218_v55 = vrot.slane %v3937_v5, 1  ;;  %v5219_v42 = vrot.slane %v3939_v57, 1  ;;  %v5220_v30 = vrot.slane %v3937_v5, 2  ;;  %v5225_v14 = vld [vmem:[#allocation83_spill] sm:$0xff] }
 0x741   :  { %v1351_v54 = vadd.f32 %v1347_v62, %v1326_v37  ;;  %v2179_v44 = vadd.f32 %v2175_v18, %v2150_v25  ;;  %v1691_v8 = vadd.f32 %v1687_v41, %v1662_v38  ;;  %v5221_v12 = vrot.slane %v3939_v57, 2  ;;  %v5223_v18 = vld [vmem:[#allocation68_spill] sm:$0xff] }
 0x742   :  { %v1848_v13 = vsel %vm938_vm7, %v5219_v42, %v5218_v55  ;;  %v2109_v62 = vmul.f32 %v5208_v16, %v4448_v9  ;;  %v1814_v6 = vadd.f32 %v4488_v61, %v1777_v2  ;;  %v2138_v63 = vmul.f32 %v5222_v29, %v4272_v0  ;;  %v5226_v2 = vld [vmem:[#allocation28_spill] sm:$0xff] }
 0x743   :  { %v4623_v37 = vsel %vm967_vm11, %v5221_v12, %v5220_v30  ;;  %v1376_v43 = vadd.f32 %v1372_v36, %v1351_v54  ;;  %v2167_v38 = vmul.f32 %v5223_v18, %v4376_v47  ;;  %v2207_v4 = vadd.f32 %v2203_v28, %v2179_v44 }
 0x744   :  { %v1720_v31 = vadd.f32 %v1716_v50, %v1691_v8  ;;  %v1876_v53 = vmul.f32 %v5224_v3, %v1848_v13  ;;  %v2118_v25 = vmul.f32 %v4533_v24, %v2109_v62  ;;  %v4636_v55 = vmul.f32 %v5225_v14, %v4623_v37  ;;  %v5231_v62 = vld [vmem:[#allocation29_spill] sm:$0xff]  ;;  %v5235_v14 = vld [vmem:[#allocation80_spill] sm:$0xff] }
 0x745   :  { %v1414_v41 = vadd.f32 %v1410_v60, %v1376_v43  ;;  %v4639_v9 = vmul.f32 %v4500_v56, %v1848_v13  ;;  %v2195_v61 = vmul.f32 0.0, %v3939_v57  ;;  %v2236_v0 = vadd.f32 %v2232_v32, %v2207_v4 }
 0x746   :  { %v2122_v36 = vadd.f32 %v2118_v25, %v2105_v46  ;;  %v2147_v47 = vmul.f32 %v4543_v7, %v2138_v63  ;;  %v2176_v28 = vmul.f32 %v4545_v33, %v2167_v38  ;;  %v2224_v50 = vmul.f32 0.0, %v1848_v13  ;;  %v5232_v38 = vld [vmem:[#allocation23_spill] sm:$0xff] }
 0x747   :  { %v1418_v54 = vadd.f32 %v1414_v41, %v5226_v2  ;;  %v5227_v60 = vrot.slane %v3918_v17, 5  ;;  %v5228_v42 = vrot.slane %v3878_v19, 5  ;;  %v5229_v56 = vrot.slane %v3918_v17, 6 }
 0x748   :  { %v5230_v8 = vrot.slane %v3878_v19, 6  ;;  %v2265_v46 = vadd.f32 %v2261_v39, %v2236_v0  ;;  %v2151_v30 = vadd.f32 %v2147_v47, %v2122_v36  ;;  %v2253_v12 = vmul.f32 0.0, %v4623_v37 }
 0x749   :  { %v1230_v44 = vsel %vm1228_vm2, %v5228_v42, %v5227_v60  ;;  %v1724_v43 = vadd.f32 %v1720_v31, %v1418_v54  ;;  %v2204_v63 = vmul.f32 %v4547_v48, %v2195_v61  ;;  %v5233_v3 = vrot.slane %v3918_v17, 7  ;;  %v5236_v61 = vld [vmem:[#allocation45_spill] sm:$0xff] }
 0x74a   :  { %v1271_v32 = vsel %vm872_vm5, %v5230_v8, %v5229_v56  ;;  %v1247_v13 = vmul.f32 %v5231_v62, %v1230_v44  ;;  %v5234_v25 = vrot.slane %v3878_v19, 7  ;;  %v2269_v2 = vadd.f32 %v2265_v46, %v5235_v14 }
 0x74b   :  { %v1276_v4 = vmul.f32 %v5232_v38, %v1271_v32  ;;  %v2180_v39 = vadd.f32 %v2176_v28, %v2151_v30  ;;  %v1843_v47 = vadd.f32 %v1839_v20, %v1814_v6  ;;  %v2233_v31 = vmul.f32 %v4571_v22, %v2224_v50  ;;  %v5239_v32 = vld [vmem:[#allocation47_spill] sm:$0xff] }
 0x74c   :  { %v1296_v41 = vsel %vm905_vm6, %v5234_v25, %v5233_v3  ;;  %v1256_v0 = vmul.f32 %v4031_v21, %v1247_v13  ;;  %v1332_v54 = vrot.slane %v5236_v61, 1  ;;  %v5086_v60 = vrot.slane %v5236_v61, 2  ;;  %2813 = vmatprep.mubr.f32.mxu0 %v2269_v2  ;;  %v5241_v30 = vld [vmem:[#allocation43_spill] sm:$0xff] }
 0x74d   :  { %v1301_v36 = vmul.f32 %v3711_v34, %v1296_v41  ;;  %v2208_v42 = vadd.f32 %v2204_v63, %v2180_v39  ;;  %v2262_v19 = vmul.f32 %v4588_v40, %v2253_v12  ;;  %v1285_v56 = vmul.f32 %v5197_v27, %v1276_v4 }
 0x74e   :  { %v1264_v44 = vadd.f32 %v4066_v49, %v1256_v0  ;;  %v5237_v20 = vrot.slane %v3918_v17, 1  ;;  %v5238_v50 = vrot.slane %v3918_v17, 2  ;;  %v5240_v46 = vrot.slane %v5239_v32, 3  ;;  %v5245_v0 = vld [vmem:[#allocation50_spill] sm:$0xff] }
 0x74f   :  { %v1310_v28 = vmul.f32 %v5198_v11, %v1301_v36  ;;  %v5242_v12 = vrot.slane %v5241_v30, 3  ;;  %v2237_v13 = vadd.f32 %v2233_v31, %v2208_v42  ;;  %v5085_v4 = vrot.slane %v5236_v61, 3 }
 0x750   :  { %v1333_v6 = vsel %vm938_vm7, %v5237_v20, %v1332_v54  ;;  %v1358_v8 = vsel %vm967_vm11, %v5238_v50, %v5086_v60  ;;  %v1289_v63 = vadd.f32 %v1285_v56, %v1264_v44  ;;  %v5243_v3 = vrot.slane %v5239_v32, 4 }
 0x751   :  { %v1435_v62 = vsel %vm1383_vm15, %v5242_v12, %v5240_v46  ;;  %v5244_v25 = vrot.slane %v5241_v30, 4  ;;  %v1880_v14 = vadd.f32 %v1876_v53, %v1843_v47  ;;  %v1323_v2 = vmul.f32 %v5206_v52, %v3918_v17  ;;  %v5248_v46 = vld [vmem:[#allocation52_spill] sm:$0xff] }
 0x752   :  { %v1348_v39 = vmul.f32 %v5211_v26, %v1333_v6  ;;  %v1463_v36 = vmul.f32 %v5245_v0, %v1435_v62  ;;  %v2266_v20 = vadd.f32 %v2262_v19, %v2237_v13  ;;  %v1314_v31 = vadd.f32 %v1310_v28, %v1289_v63  ;;  %v5249_v47 = vld [vmem:[#allocation56_spill] sm:$0xff]  ;;  %v5251_v63 = vld [vmem:[#allocation59_spill] sm:$0xff] }
 0x753   :  { %v1477_v41 = vsel %vm1476_vm0, %v5244_v25, %v5243_v3  ;;  %v1373_v42 = vmul.f32 %v5212_v15, %v1358_v8  ;;  %v5246_v44 = vrot.slane %v5239_v32, 5  ;;  %v5247_v56 = vrot.slane %v5241_v30, 5  ;;  %v5252_v25 = vld [vmem:[#allocation39_spill] sm:$0xff] }
 0x754   :  { %v1471_v53 = vadd.f32 %v5248_v46, %v1463_v36  ;;  %v1505_v12 = vmul.f32 %v5249_v47, %v1477_v41  ;;  %v1537_v52 = vrot.slane %v5241_v30, 6  ;;  %v1562_v26 = vrot.slane %v5241_v30, 7 }
 0x755   :  { %v1514_v50 = vsel %vm1228_vm2, %v5247_v56, %v5246_v44  ;;  %v2270_v6 = vadd.f32 %v2266_v20, %v1724_v43  ;;  %v1327_v19 = vadd.f32 %v1323_v2, %v1314_v31  ;;  %v5250_v15 = vrot.slane %v3918_v17, 3 }
 0x756   :  { %v5084_v8 = vrot.slane %v5239_v32, 1  ;;  %v1509_v13 = vadd.f32 %v1505_v12, %v1471_v53  ;;  %v1530_v3 = vmul.f32 %v5251_v63, %v1514_v50  ;;  %v5253_v0 = vrot.slane %v5252_v25, 6 }
 0x757   :  { %v1384_v28 = vsel %vm1383_vm15, %v5250_v15, %v5085_v4  ;;  %v5083_v43 = vrot.slane %v5239_v32, 2  ;;  %2814 = vmatmul.mubr.f32.vlgmr.msra.gmra.mrb[20].mxu0 %v2270_v6  ;;  %v1352_v2 = vadd.f32 %v1348_v39, %v1327_v19  ;;  %v5254_v20 = vrot.slane %v5239_v32, 6  ;;  %v5277_v4 = vld [vmem:[#allocation92_spill] sm:$0xff] }
 0x758   :  { %v1540_v36 = vsel %vm872_vm5, %v5253_v0, %v1537_v52  ;;  %v5255_v56 = vrot.slane %v5252_v25, 7  ;;  %v2068_v53 = vmul.f32 %v4509_v59, %v4623_v37  ;;  %v1534_v47 = vadd.f32 %v1530_v3, %v1509_v13  ;;  %v5262_v0 = vld [vmem:[#allocation63_spill] sm:$0xff] }
 0x759   :  { %v1539_v31 = vsel %vm872_vm5, %v1537_v52, %v5254_v20  ;;  %v1545_v44 = vmul.f32 %v5232_v38, %v1540_v36  ;;  %v5256_v12 = vrot.slane %v5239_v32, 7  ;;  %v1377_v19 = vadd.f32 %v1373_v42, %v1352_v2  ;;  %v5257_v38 = vld [vmem:[#allocation62_spill] sm:$0xff] }
 0x75a   :  { %v1565_v46 = vsel %vm905_vm6, %v5255_v56, %v1562_v26  ;;  %v1411_v52 = vmul.f32 %v5214_v58, %v1384_v28  ;;  %v5258_v63 = vrot.slane %v5241_v30, 1  ;;  %v1917_v37 = vadd.f32 %v4636_v55, %v1880_v14  ;;  %v5261_v28 = vld [vmem:[#allocation64_spill] sm:$0xff]  ;;  %v5263_v14 = vld [vmem:[#allocation66_spill] sm:$0xff] }
 0x75b   :  { %v1564_v39 = vsel %vm905_vm6, %v1562_v26, %v5256_v12  ;;  %v1570_v6 = vmul.f32 %v3711_v34, %v1565_v46  ;;  %v1554_v15 = vmul.f32 %v5257_v38, %v1545_v44  ;;  %v1555_v13 = vmul.f32 %v5257_v38, %v1539_v31  ;;  %v5259_v26 = vld [vmem:[#allocation65_spill] sm:$0xff] }
 0x75c   :  { %v1602_v59 = vsel %vm938_vm7, %v5258_v63, %v5084_v8  ;;  %v1592_v3 = vmul.f32 %v5259_v26, %v5241_v30  ;;  %v5260_v34 = vrot.slane %v5241_v30, 2  ;;  %v1415_v42 = vadd.f32 %v1411_v52, %v1377_v19  ;;  %v5276_v8 = vld [vmem:[#allocation73_spill] sm:$0xff] }
 0x75d   :  { %v1558_v25 = vadd.f32 %v1554_v15, %v5261_v28  ;;  %v1579_v36 = vmul.f32 %v5262_v0, %v1570_v6  ;;  %v1580_v2 = vmul.f32 %v5262_v0, %v1564_v39  ;;  %v1559_v55 = vadd.f32 %v1555_v13, %v1534_v47  ;;  %v5268_v47 = vld [vmem:[#allocation87_spill] sm:$0xff]  ;;  %v5271_v13 = vld [vmem:[#allocation97_spill] sm:$0xff]  ;;  %v5272_v28 = vld [vmem:[#allocation94_spill] sm:$0xff] }
 0x75e   :  { %v1627_v58 = vsel %vm967_vm11, %v5260_v34, %v5083_v43  ;;  %v1617_v20 = vmul.f32 %v5263_v14, %v1602_v59  ;;  %v5264_v31 = vrot.slane %v3937_v5, 3  ;;  %v5265_v44 = vrot.slane %v3939_v57, 3 }
 0x75f   :  { %v5266_v56 = vrot.slane %v3937_v5, 4  ;;  %v5267_v46 = vrot.slane %v3939_v57, 4  ;;  %v1583_v6 = vadd.f32 %v1579_v36, %v1558_v25  ;;  %v1642_v39 = vmul.f32 %v5204_v1, %v1627_v58 }
 0x760   :  { %v1922_v30 = vsel %vm1383_vm15, %v5265_v44, %v5264_v31  ;;  %v5269_v52 = vrot.slane %v3937_v5, 5  ;;  %v5270_v38 = vrot.slane %v3939_v57, 5  ;;  %v1659_v63 = vmul.f32 %v5210_v10, %v1435_v62  ;;  %v5273_v31 = vld [vmem:[#allocation89_spill] sm:$0xff] }
 0x761   :  { %v1947_v12 = vsel %vm1476_vm0, %v5267_v46, %v5266_v56  ;;  %v1938_v19 = vmul.f32 %v5268_v47, %v1922_v30  ;;  %v1688_v59 = vmul.f32 %v5215_v23, %v1477_v41  ;;  %v2025_v34 = vadd.f32 %v5271_v13, %v4527_v45  ;;  %v5274_v56 = vld [vmem:[#allocation26_spill] sm:$0xff]  ;;  %v5278_v13 = vld [vmem:[#allocation96_spill] sm:$0xff] }
 0x762   :  { %v1972_v15 = vsel %vm1228_vm2, %v5270_v38, %v5269_v52  ;;  %v2034_v25 = vmul.f32 %v5272_v28, %v3939_v57  ;;  %v1596_v58 = vadd.f32 %v1592_v3, %v1583_v6  ;;  %v1717_v0 = vmul.f32 %v5216_v51, %v1514_v50  ;;  %v5275_v52 = vld [vmem:[#allocation91_spill] sm:$0xff]  ;;  %v5279_v3 = vld [vmem:[#allocation98_spill] sm:$0xff] }
 0x763   :  { %v1942_v36 = vadd.f32 %v1938_v19, %v1917_v37  ;;  %v1963_v44 = vmul.f32 %v5273_v31, %v1947_v12  ;;  %v1419_v46 = vadd.f32 %v1415_v42, %v5274_v56  ;;  %v1584_v47 = vadd.f32 %v1580_v2, %v1559_v55  ;;  %v5288_v56 = vld [vmem:[#allocation35_spill] sm:$0xff] }
 0x764   :  { %v1988_v38 = vmul.f32 %v5275_v52, %v1972_v15  ;;  %v2038_v62 = vadd.f32 %v2034_v25, %v2025_v34  ;;  %v1621_v43 = vadd.f32 %v1617_v20, %v1596_v58  ;;  %v2005_v45 = vmul.f32 %v5277_v4, %v5276_v8  ;;  %v5284_v25 = vld [vmem:[#allocation77_spill] sm:$0xff] }
 0x765   :  { %v1967_v41 = vadd.f32 %v1963_v44, %v1942_v36  ;;  %v2085_v60 = vmul.f32 %v5278_v13, %v1922_v30  ;;  %v2102_v50 = vmul.f32 %v5279_v3, %v1947_v12  ;;  %v5280_v37 = vrot.slane %v5236_v61, 5 }
 0x766   :  { %v2055_v57 = vadd.f32 %v4639_v9, %v2038_v62  ;;  %v5281_v6 = vrot.slane %v3918_v17, 5  ;;  %v5282_v2 = vrot.slane %v5236_v61, 6  ;;  %v5283_v55 = vrot.slane %v3918_v17, 6 }
 0x767   :  { %v1646_v20 = vadd.f32 %v1642_v39, %v1621_v43  ;;  %v2119_v30 = vmul.f32 %v4533_v24, %v1972_v15  ;;  %v2148_v9 = vmul.f32 %v4543_v7, %v5276_v8  ;;  %v1992_v19 = vadd.f32 %v1988_v38, %v1967_v41  ;;  %v5289_v38 = vld [vmem:[#allocation31_spill] sm:$0xff] }
 0x768   :  { %v1229_v42 = vsel %vm1228_vm2, %v5281_v6, %v5280_v37  ;;  %v1270_v4 = vsel %vm872_vm5, %v5283_v55, %v5282_v2  ;;  %v2072_v34 = vadd.f32 %v2068_v53, %v2055_v57  ;;  %v2177_v58 = vmul.f32 %v4545_v33, %v5284_v25  ;;  %v5287_v53 = vld [vmem:[#allocation84_spill] sm:$0xff]  ;;  %v5294_v55 = vld [vmem:[#allocation25_spill] sm:$0xff] }
 0x769   :  { %v1257_v12 = vmul.f32 %v4031_v21, %v1229_v42  ;;  %v5285_v36 = vrot.slane %v5236_v61, 7  ;;  %v5286_v31 = vrot.slane %v3918_v17, 7  ;;  %v1663_v43 = vadd.f32 %v1659_v63, %v1646_v20  ;;  %v5293_v37 = vld [vmem:[#allocation24_spill] sm:$0xff] }
 0x76a   :  { %v2205_v39 = vmul.f32 %v4547_v48, %v3937_v5  ;;  %v1286_v21 = vmul.f32 %v5197_v27, %v1270_v4  ;;  %v2089_v15 = vadd.f32 %v2085_v60, %v2072_v34  ;;  %v2225_v52 = vmul.f32 %v5288_v56, %v5287_v53 }
 0x76b   :  { %v1295_v44 = vsel %vm905_vm6, %v5286_v31, %v5285_v36  ;;  %v1265_v8 = vadd.f32 %v4066_v49, %v1257_v12  ;;  %v5290_v62 = vrot.slane %v5289_v38, 1  ;;  %v5291_v63 = vrot.slane %v5289_v38, 2  ;;  %v3158_v36 = vld [vmem:[#allocation10 + $0x3] ss:$0 sm:$0xff] }
 0x76c   :  { %v5292_v41 = vrot.slane %v5236_v61, 2  ;;  %v1692_v57 = vadd.f32 %v1688_v59, %v1663_v43  ;;  %v1311_v60 = vmul.f32 %v5198_v11, %v1295_v44  ;;  %v2009_v42 = vadd.f32 %v2005_v45, %v1992_v19  ;;  %v3159_v45 = vld [vmem:[#allocation10 + $0x4] ss:$0 sm:$0xff]  ;;  %v5298_v43 = vld [vmem:[#allocation33_spill] sm:$0xff] }
 0x76d   :  { %v1336_v17 = vsel %vm938_vm7, %v1332_v54, %v5290_v62  ;;  %v1290_v27 = vadd.f32 %v1286_v21, %v1265_v8  ;;  %v2106_v2 = vadd.f32 %v2102_v50, %v2089_v15  ;;  %v5295_v20 = vrot.slane %v5289_v38, 3  ;;  %v5297_v19 = vld [vmem:[#allocation30_spill] sm:$0xff]  ;;  %v5301_v38 = vld [vmem:[#allocation95_spill] sm:$0xff] }
 0x76e   :  { %v1361_v49 = vsel %vm967_vm11, %v5292_v41, %v5291_v63  ;;  %v1340_v6 = vmul.f32 %v5293_v37, %v1336_v17  ;;  %v5296_v54 = vrot.slane %v5236_v61, 3  ;;  %v1721_v34 = vadd.f32 %v1717_v0, %v1692_v57 }
 0x76f   :  { %v1365_v4 = vmul.f32 %v5294_v55, %v1361_v49  ;;  %v1315_v25 = vadd.f32 %v1311_v60, %v1290_v27  ;;  %v1324_v59 = vmul.f32 %v3158_v36, %v5236_v61  ;;  %v1593_v11 = vmul.f32 %v5259_v26, %v5239_v32 }
 0x770   :  { %v1387_v12 = vsel %vm1383_vm15, %v5296_v54, %v5295_v20  ;;  %v2123_v31 = vadd.f32 %v2119_v30, %v2106_v2  ;;  %v1349_v50 = vmul.f32 %v3159_v45, %v1340_v6  ;;  %v5299_v8 = vrot.slane %v5298_v43, 1  ;;  %v3160_v30 = vld [vmem:[#allocation10 + $0x5] ss:$0 sm:$0xff]  ;;  %v3161_v2 = vld [vmem:[#allocation10 + $0x6] ss:$0 sm:$0xff] }
 0x771   :  { %v1403_v44 = vmul.f32 %v5297_v19, %v1387_v12  ;;  %v5300_v21 = vrot.slane %v5239_v32, 1  ;;  %v1725_v0 = vadd.f32 %v1721_v34, %v1419_v46  ;;  %v1328_v53 = vadd.f32 %v1324_v59, %v1315_v25  ;;  %v5305_v6 = vld [vmem:[#allocation86_spill] sm:$0xff] }
 0x772   :  { %v1597_v56 = vadd.f32 %v1593_v11, %v1584_v47  ;;  %v2026_v62 = vadd.f32 %v5301_v38, %v2009_v42  ;;  %v2152_v26 = vadd.f32 %v2148_v9, %v2123_v31  ;;  %v1374_v17 = vmul.f32 %v3160_v30, %v1365_v4  ;;  %v5304_v47 = vld [vmem:[#allocation54_spill] sm:$0xff]  ;;  %v5306_v9 = vld [vmem:[#allocation36_spill] sm:$0xff]  ;;  %v5314_v38 = vld [vmem:[#allocation93_spill] sm:$0xff] }
 0x773   :  { %v1605_v15 = vsel %vm938_vm7, %v5300_v21, %v5299_v8  ;;  %v5302_v63 = vrot.slane %v5298_v43, 2  ;;  %v5303_v41 = vrot.slane %v5239_v32, 2  ;;  %v1353_v57 = vadd.f32 %v1349_v50, %v1328_v53  ;;  %v5307_v12 = vld [vmem:[#allocation58_spill] sm:$0xff]  ;;  %v5310_v50 = vld [vmem:[#allocation61_spill] sm:$0xff]  ;;  %v2363_v21 = vld [vmem:[#allocation11 + $0x8] sm:$0xff] }
 0x774   :  { %v1609_v61 = vmul.f32 %v5293_v37, %v1605_v15  ;;  %v1651_v60 = vmul.f32 %v5297_v19, %v5304_v47  ;;  %v2181_v37 = vadd.f32 %v2177_v58, %v2152_v26  ;;  %v2254_v42 = vmul.f32 %v5306_v9, %v5305_v6  ;;  %v5309_v58 = vld [vmem:[#allocation88_spill] sm:$0xff]  ;;  %v5312_v8 = vld [vmem:[#allocation90_spill] sm:$0xff]  ;;  %v2364_v26 = vld [vmem:[#allocation11 + $0x10] sm:$0xff] }
 0x775   :  { %v1630_v49 = vsel %vm967_vm11, %v5303_v41, %v5302_v63  ;;  %v1412_v4 = vmul.f32 %v3161_v2, %v1403_v44  ;;  %v2035_v32 = vmul.f32 %v5272_v28, %v3937_v5  ;;  %v1378_v20 = vadd.f32 %v1374_v17, %v1353_v57  ;;  %v5311_v44 = vld [vmem:[#allocation99_spill] sm:$0xff]  ;;  %v2365_v30 = vld [vmem:[#allocation11 + $0x18] sm:$0xff] }
 0x776   :  { %v1618_v27 = vmul.f32 %v5263_v14, %v1609_v61  ;;  %v1634_v46 = vmul.f32 %v5294_v55, %v1630_v49  ;;  %v5308_v14 = vld [vmem:[#allocation32_spill] sm:$0xff]  ;;  %v2209_v55 = vadd.f32 %v2205_v39, %v2181_v37  ;;  %v2234_v25 = vmul.f32 %v4571_v22, %v2225_v52  ;;  %v2362_v52 = vld [vmem:[#allocation11] sm:$0xff] }
 0x777   :  { %v1680_v34 = vmul.f32 %v5308_v14, %v5307_v12  ;;  %v2039_v36 = vadd.f32 %v2035_v32, %v2026_v62  ;;  %v2077_v59 = vmul.f32 %v5297_v19, %v5309_v58  ;;  %v1416_v11 = vadd.f32 %v1412_v4, %v1378_v20  ;;  %v2366_v47 = vld [vmem:[#allocation11 + $0x20] sm:$0xff]  ;;  %v5318_v32 = vld [vmem:[#allocation40_spill] sm:$0xff] }
 0x778   :  { %v1622_v35 = vadd.f32 %v1618_v27, %v1597_v56  ;;  %v1643_v54 = vmul.f32 %v5204_v1, %v1634_v46  ;;  %v1660_v45 = vmul.f32 %v5210_v10, %v1651_v60  ;;  %v1709_v5 = vmul.f32 %v5208_v16, %v5310_v50  ;;  %v5313_v56 = vld [vmem:[#allocation100_spill] sm:$0xff]  ;;  %v5315_v46 = vld [vmem:[#allocation74_spill] sm:$0xff]  ;;  %v5316_v37 = vld [vmem:[#allocation27_spill] sm:$0xff] }
 0x779   :  { %v2238_v28 = vadd.f32 %v2234_v25, %v2209_v55  ;;  %v2263_v1 = vmul.f32 %v4588_v40, %v2254_v42  ;;  %v2056_v43 = vadd.f32 %v5311_v44, %v2039_v36  ;;  %v2094_v39 = vmul.f32 %v5308_v14, %v5312_v8  ;;  %v2367_v60 = vld [vmem:[#allocation11 + $0x28] sm:$0xff]  ;;  %v5320_v36 = vld [vmem:[#allocation85_spill] sm:$0xff] }
 0x77a   :  { %v1647_v31 = vadd.f32 %v1643_v54, %v1622_v35  ;;  %v1689_v19 = vmul.f32 %v5215_v23, %v1680_v34  ;;  %v2086_v10 = vmul.f32 %v5278_v13, %v2077_v59  ;;  %v2111_v62 = vmul.f32 %v5208_v16, %v5314_v38  ;;  %v2368_v35 = vld [vmem:[#allocation11 + $0x30] sm:$0xff]  ;;  %v2369_v54 = vld [vmem:[#allocation11 + $0x38] sm:$0xff]  ;;  %v2370_v59 = vld [vmem:[#allocation11 + $0x40] sm:$0xff] }
 0x77b   :  { %v2267_v53 = vadd.f32 %v2263_v1, %v2238_v28  ;;  %v2073_v61 = vadd.f32 %v5313_v56, %v2056_v43  ;;  %v1718_v63 = vmul.f32 %v5216_v51, %v1709_v5  ;;  %v3081_v41 = vpack.c.bf16 %v2363_v21, %v2362_v52  ;;  %v5317_v51 = vld [vmem:[#allocation78_spill] sm:$0xff]  ;;  %v2372_v5 = vld [vmem:[#allocation11 + $0x50] sm:$0xff]  ;;  %v2374_v43 = vld [vmem:[#allocation11 + $0x60] sm:$0xff] }
 0x77c   :  { %v1664_v15 = vadd.f32 %v1660_v45, %v1647_v31  ;;  %v2103_v27 = vmul.f32 %v5279_v3, %v2094_v39  ;;  %v2140_v23 = vmul.f32 %v5222_v29, %v5315_v46  ;;  %v1420_v13 = vadd.f32 %v1416_v11, %v5316_v37  ;;  %v5319_v34 = vld [vmem:[#allocation82_spill] sm:$0xff]  ;;  %v2371_v11 = vld [vmem:[#allocation11 + $0x48] sm:$0xff] }
 0x77d   :  { %v2271_v49 = vadd.f32 %v2267_v53, %v1725_v0  ;;  %v2090_v57 = vadd.f32 %v2086_v10, %v2073_v61  ;;  %3082 = vmatprep.subr.bf16.mxu1 %v3081_v41  ;;  %v3085_v16 = vpack.c.bf16 %v2365_v30, %v2364_v26  ;;  %v2120_v42 = vmul.f32 %v4533_v24, %v2111_v62  ;;  %v2373_v28 = vld [vmem:[#allocation11 + $0x58] sm:$0xff]  ;;  %v2375_v8 = vld [vmem:[#allocation11 + $0x68] sm:$0xff]  ;;  %v5321_v61 = vld [vmem:[#allocation19_spill] sm:$0xff] }
 0x77e   :  { %v1693_v17 = vadd.f32 %v1689_v19, %v1664_v15  ;;  %v2169_v0 = vmul.f32 %v5223_v18, %v5317_v51  ;;  %3084 = vmatpush3.bf16.msra.mxu1 %v3081_v41  ;;  %v3089_v3 = vpack.c.bf16 %v2367_v60, %v2366_v47  ;;  %v2149_v29 = vmul.f32 %v4543_v7, %v2140_v23  ;;  %v2377_v52 = vld [vmem:[#allocation11 + $0x78] sm:$0xff]  ;;  %v5322_v38 = vld [vmem:[#allocation20_spill] sm:$0xff]  ;;  %v5323_v41 = vld [vmem:[#allocation21_spill] sm:$0xff] }
 0x77f   :  { %2816 = vmatprep.mubr.f32.mxu0 %v2271_v49  ;;  %v2107_v9 = vadd.f32 %v2103_v27, %v2090_v57  ;;  %3086 = vmatprep.subr.bf16.mxu1 %v3085_v16  ;;  %v2197_v20 = vmul.f32 0.0, %v5318_v32  ;;  %v2226_v55 = vmul.f32 0.0, %v5319_v34  ;;  %v3093_v24 = vpack.c.bf16 %v2369_v54, %v2368_v35  ;;  %v3162_v15 = vld [vmem:[%s4941_s2] ss:$0 sm:$0xff] }
 0x780   :  { %v1722_v6 = vadd.f32 %v1718_v63, %v1693_v17  ;;  %v2178_v14 = vmul.f32 %v4545_v33, %v2169_v0  ;;  %v2255_v58 = vmul.f32 0.0, %v5320_v36  ;;  %v3097_v45 = vpack.c.bf16 %v2371_v11, %v2370_v59  ;;  %v5324_v57 = vld [vmem:[#allocation22_spill] sm:$0xff] }
 0x781   :  { %v2124_v4 = vadd.f32 %v2120_v42, %v2107_v9  ;;  %v2206_v25 = vmul.f32 %v4547_v48, %v2197_v20  ;;  %v2235_v31 = vmul.f32 %v4571_v22, %v2226_v55  ;;  %v3101_v44 = vpack.c.bf16 %v2373_v28, %v2372_v5  ;;  %v2376_v22 = vld [vmem:[#allocation11 + $0x70] sm:$0xff]  ;;  %v2566_v46 = vld [vmem:[%s4951_s12] ss:$0 sm:$0xff] }
 0x782   :  { %v1726_v2 = vadd.f32 %v1722_v6, %v1420_v13  ;;  %3088 = vmatpush3.bf16.msra.mxu1 %v3085_v16  ;;  %v2264_v33 = vmul.f32 %v4588_v40, %v2255_v58  ;;  %v3105_v39 = vpack.c.bf16 %v2375_v8, %v2374_v43  ;;  %v3109_v21 = vpack.c.bf16 %v2377_v52, %v2376_v22 }
 0x783   :  { %v2153_v12 = vadd.f32 %v2149_v29, %v2124_v4  ;;  %3090 = vmatprep.subr.bf16.mxu1 %v3089_v3 }
 0x785   :  { %v2182_v18 = vadd.f32 %v2178_v14, %v2153_v12 }
 0x786   :  { %3092 = vmatpush3.bf16.msra.mxu1 %v3089_v3 }
 0x787   :  { %v2210_v7 = vadd.f32 %v2206_v25, %v2182_v18  ;;  %3094 = vmatprep.subr.bf16.mxu1 %v3093_v24 }
 0x789   :  { %v2239_v50 = vadd.f32 %v2235_v31, %v2210_v7 }
 0x78a   :  { %3096 = vmatpush3.bf16.msra.mxu1 %v3093_v24 }
 0x78b   :  { %v2268_v1 = vadd.f32 %v2264_v33, %v2239_v50  ;;  %3098 = vmatprep.subr.bf16.mxu1 %v3097_v45 }
 0x78d   :  { %v2272_v48 = vadd.f32 %v2268_v1, %v1726_v2 }
 0x78e   :  { %3100 = vmatpush3.bf16.msra.mxu1 %v3097_v45 }
 0x78f   :  { %2817 = vmatmul.mubr.f32.gmra.mrb[22].mxu0 %v2272_v48  ;;  %3102 = vmatprep.subr.bf16.mxu1 %v3101_v44 }
 0x792   :  { %3104 = vmatpush3.bf16.msra.mxu1 %v3101_v44 }
 0x793   :  { %3106 = vmatprep.subr.bf16.mxu1 %v3105_v39 }
 0x796   :  { %3108 = vmatpush3.bf16.msra.mxu1 %v3105_v39 }
 0x797   :  { %3110 = vmatprep.subr.bf16.mxu1 %v3109_v21 }
 0x79a   :  { %3112 = vmatpush3.bf16.msra.mxu1 %v3109_v21 }
 0x82a   :  { %v2815_v40 = vpop.f32.mrb[20].mxu0 }
 0x82b   :  { %v2345_v19 = vadd.f32 %v3162_v15, %v2815_v40  ;;  %v2339_v53 = vpop.f32.mrb[21].mxu0 }
 0x82c   :  { %v2340_v56 = vadd.f32 %v3162_v15, %v2339_v53 }
 0x82d   :  { %v2359_v62 = vmul.f32 %v2345_v19, %v5322_v38 }
 0x82e   :  { %v2358_v10 = vmul.f32 %v2340_v56, %v5321_v61 }
 0x830   :  { %2851 = vmatprep.mubr.f32.mxu1 %v2358_v10 }
 0x831   :  { %2852 = vmatmul.mubr.f32.vlgmr.msra.gmra.mrb[16].mxu1 %v2359_v62 }
 0x862   :  { %v2818_v26 = vpop.f32.mrb[22].mxu0 }
 0x863   :  { %v2355_v30 = vadd.f32 %v3162_v15, %v2818_v26  ;;  %v2349_v17 = vpop.f32.mrb[23].mxu0 }
 0x864   :  { %v2350_v63 = vadd.f32 %v3162_v15, %v2349_v17 }
 0x865   :  { %v2361_v27 = vmul.f32 %v2355_v30, %v5324_v57 }
 0x866   :  { %v2360_v49 = vmul.f32 %v2350_v63, %v5323_v41 }
 0x868   :  { %2854 = vmatprep.mubr.f32.mxu1 %v2360_v49 }
 0x869   :  { %2855 = vmatmul.mubr.f32.gmra.mrb[18].mxu1 %v2361_v27 }
 0x904   :  { %v2853_v23 = vpop.f32.mrb[16].mxu1 }
 0x905   :  { %v2457_v47 = vadd.f32 %v2853_v23, %v2566_v46  ;;  %v2451_v60 = vpop.f32.mrb[17].mxu1 }
 0x906   :  { %v2452_v37 = vadd.f32 %v2566_v46, %v2451_v60 }
 0x907   :  { %2471 = vst [vmem:[#allocation13 + $0x8] sm:$0xff] %v2457_v47 }
 0x908   :  { %2470 = vst [vmem:[#allocation13] sm:$0xff] %v2452_v37 }
 0x93c   :  { %v2856_v13 = vpop.f32.mrb[18].mxu1 }
 0x93d   :  { %v2467_v6 = vadd.f32 %v2856_v13, %v2566_v46  ;;  %v2461_v16 = vpop.f32.mrb[19].mxu1 }
 0x93e   :  { %v2462_v9 = vadd.f32 %v2566_v46, %v2461_v16 }
 0x93f   :  { %2473 = vst [vmem:[#allocation13 + $0x18] sm:$0xff] %v2467_v6 }
 0x940   :  { %2472 = vst [vmem:[#allocation13 + $0x10] sm:$0xff] %v2462_v9 }
 0x941   :  { %3306 = shalt.err (!%p3303_p10)
}
 0x942   :  { %s3307_s15 = scalar_lea.hbm %s4952_s13, 512 }
 0x943   :  { %p3308_p11 = scmp.ne.s32.totalorder %s4952_s13, %s3307_s15  ;;  %p3311_p12 = scmp.lt.u32.totalorder %s3307_s15, %s4952_s13 }
 0x945   :  { %p3313_p13 = pnand %p3311_p12, %p3308_p11 }
 0x947   :  { %3316 = shalt.err (!%p3313_p13)
}
 0x948   :  { %2485 = dma.vmem_to_hbm [thread:$0]  %s2480_s22, 512, %s4952_s13, [#allocation4], %s3329_s20, %s3329_s20, %s3330_s21  }
 0x949   :  { %3325 = dma.done.wait [#allocation4], 512  }
 0x94a   :  { %3326 = vsyncadd [#allocation4], 4294966784 }
 0x94b   :  { %2489 = vsyncpa [#allocation3], 1 }
 0x94c   :  { %2490 = vsyncpa [#allocation6], 1 }
 0x94d   :  { %2491 = vsyncpa [#allocation9], 1 }
 0x94e   :  { %2492 = vsyncpa [#allocation12], 1 }
 0x94f   :  { %2493 = vsyncpa [#allocation4], 1 }

</bundles_post_ra>
